<compile_context>
chip_gen: v7x
topology: tpu7x:2x2x1
jax: 0.10.0
libtpu: 0.0.40
codegen_flags: <defaults>
</compile_context>

<pallas_src>
import functools

import jax
import jax.numpy as jnp
from jax.experimental import pallas as pl
from jax.experimental.pallas import tpu as pltpu


# ------------------------------ fused kernel --------------------------------

def _encoder_kernel(x_ref, bias_ref,
                    wqkv_ref, bqkv_ref, wo_ref, bo_ref,
                    w1_ref, b1_ref, w2_ref, b2_ref,
                    g1_ref, be1_ref, g2_ref, be2_ref,
                    wfc_ref, bfc_ref,
                    o_ref,
                    x_scr,
                    *, n_heads, eps, ff_chunk):
    f32 = jnp.float32
    bf16 = jnp.bfloat16
    layer = pl.program_id(0)

    @pl.when(layer == 0)
    def _():
        x_scr[...] = x_ref[...]          # residual stream enters VMEM once

    x = x_scr[...]                        # (M, E) f32 residual stream
    M, E = x.shape
    H = n_heads
    hd = E // H

    def layer_norm(z, g, b):              # biased variance, eps inside rsqrt
        mu = jnp.mean(z, axis=-1, keepdims=True)
        var = jnp.mean(jnp.square(z - mu), axis=-1, keepdims=True)
        return (z - mu) * jax.lax.rsqrt(var + eps) * g + b

    # ---------------- multi-head self-attention ----------------
    qkv = jnp.dot(x.astype(bf16), wqkv_ref[0],
                  preferred_element_type=f32) + bqkv_ref[0]        # (M, 3E)
    q = qkv[:, :E]                         # 1/sqrt(hd) pre-folded into W_q
    k = qkv[:, E:2 * E]
    v = qkv[:, 2 * E:]
    bias = bias_ref[...]                   # (M, M): 0 same batch row, -1e30 else

    attn = jnp.zeros((M, E), f32)
    for h in range(H):                     # static unroll; H is small
        sl = slice(h * hd, (h + 1) * hd)
        qh = q[:, sl].astype(bf16)
        kh = k[:, sl].astype(bf16)
        vh = v[:, sl].astype(bf16)
        s = jnp.dot(qh, kh.T, preferred_element_type=f32) + bias    # (M, M)
        s = s - jnp.max(s, axis=-1, keepdims=True)
        e = jnp.exp(s)
        p = e * pl.reciprocal(jnp.sum(e, axis=-1, keepdims=True), approx=False)
        oh = jnp.dot(p.astype(bf16), vh, preferred_element_type=f32)  # (M, hd)
        # fold head h straight into its slice of the out-projection
        attn = attn + jnp.dot(oh.astype(bf16), wo_ref[0, sl, :],
                              preferred_element_type=f32)
    attn = attn + bo_ref[0]

    x = layer_norm(x + attn, g1_ref[0], be1_ref[0])                 # add & LN1

    # ---------------- feed-forward, streamed over dim_ff ----------------
    F = w1_ref.shape[2]
    x_bf = x.astype(bf16)

    def ff_body(i, acc):
        c0 = pl.multiple_of(i * ff_chunk, ff_chunk)
        w1c = w1_ref[0, :, pl.ds(c0, ff_chunk)]                     # (E, ck) bf16
        b1c = b1_ref[0, :, pl.ds(c0, ff_chunk)]                     # (1, ck) f32
        w2c = w2_ref[0, pl.ds(c0, ff_chunk), :]                     # (ck, E) bf16
        hid = jnp.maximum(
            jnp.dot(x_bf, w1c, preferred_element_type=f32) + b1c, 0.0)
        return acc + jnp.dot(hid.astype(bf16), w2c, preferred_element_type=f32)

    ff = jax.lax.fori_loop(0, F // ff_chunk, ff_body,
                           jnp.zeros((M, E), f32))
    ff = ff + b2_ref[0]

    x = layer_norm(x + ff, g2_ref[0], be2_ref[0])                   # add & LN2
    x_scr[...] = x

    # ---------------- classifier after the last encoder layer ----------------
    @pl.when(layer == pl.num_programs(0) - 1)
    def _():
        logits = jnp.dot(x.astype(bf16), wfc_ref[...],
                         preferred_element_type=f32) + bfc_ref[...]
        o_ref[...] = logits.astype(o_ref.dtype)


# ----------------------------- parameter init -------------------------------

def init_params(key, vocab_size, emb_size, n_heads, n_layers, seq_len,
                dim_ff=2048):
    # dim_feedforward=2048 is the (unchanged) nn.TransformerEncoderLayer default.
    E, H, F = emb_size, n_heads, dim_ff
    assert E % H == 0
    hd = E // H
    scale = 1.0 / float(hd) ** 0.5
    vpad = ((vocab_size + 127) // 128) * 128
    std = 0.02
    keys = jax.random.split(key, 3 + n_layers)

    def w(k, shape):
        return jax.random.normal(k, shape, jnp.float32) * std

    wqkv_l, wo_l, w1_l, w2_l = [], [], [], []
    for l in range(n_layers):
        lk = jax.random.split(keys[3 + l], 4)
        wqkv = w(lk[0], (3 * E, E)).T                 # pre-transposed: (E, 3E)
        wqkv = wqkv.at[:, :E].multiply(scale)         # fold 1/sqrt(hd) into W_q
        wqkv_l.append(wqkv)
        wo_l.append(w(lk[1], (E, E)).T)               # (E, E)
        w1_l.append(w(lk[2], (F, E)).T)               # (E, F)
        w2_l.append(w(lk[3], (E, F)).T)               # (F, E)

    fc_w = w(keys[2], (vocab_size, E)).T                              # (E, V)
    fc_w = jnp.pad(fc_w, ((0, 0), (0, vpad - vocab_size)))            # (E, Vpad)

    return {
        "token_emb": jax.random.normal(keys[0], (vocab_size, E), jnp.float32),
        "pos_emb": jax.random.normal(keys[1], (1, seq_len, E), jnp.float32),
        "wqkv": jnp.stack(wqkv_l).astype(jnp.bfloat16),               # (Lyr,E,3E)
        "bqkv": jnp.zeros((n_layers, 1, 3 * E), jnp.float32),         # q-bias pre-scaled (zero)
        "wo": jnp.stack(wo_l).astype(jnp.bfloat16),                   # (Lyr,E,E)
        "bo": jnp.zeros((n_layers, 1, E), jnp.float32),
        "w1": jnp.stack(w1_l).astype(jnp.bfloat16),                   # (Lyr,E,F)
        "b1": jnp.zeros((n_layers, 1, F), jnp.float32),
        "w2": jnp.stack(w2_l).astype(jnp.bfloat16),                   # (Lyr,F,E)
        "b2": jnp.zeros((n_layers, 1, E), jnp.float32),
        "ln1_g": jnp.ones((n_layers, 1, E), jnp.float32),
        "ln1_b": jnp.zeros((n_layers, 1, E), jnp.float32),
        "ln2_g": jnp.ones((n_layers, 1, E), jnp.float32),
        "ln2_b": jnp.zeros((n_layers, 1, E), jnp.float32),
        "fc_w": fc_w.astype(jnp.bfloat16),                            # (E, Vpad)
        "fc_b": jnp.zeros((1, vpad), jnp.float32),
    }


# ------------------------------- forward pass --------------------------------

def transformer_forward(tokens, params, n_heads):
    B, S = tokens.shape
    vocab, E = params["token_emb"].shape
    n_layers = params["wqkv"].shape[0]
    F = params["w1"].shape[2]
    vpad = params["fc_w"].shape[1]
    M = B * S
    assert S <= params["pos_emb"].shape[1], "sequence longer than pos_emb"

    # TODO(synk): embedding gather + positional add stay in plain JAX
    # (scatter/gather DMA is not worth it at this size).
    x = params["token_emb"][tokens] + params["pos_emb"][:, :S]        # (B, S, E)
    x = x.astype(jnp.float32).reshape(M, E)     # rows L-major: r = b*S + s

    # Additive attention mask: batch_first=False => attention runs over the B
    # axis; row r attends only to rows with the same "batch" index r % S.
    ridx = jnp.arange(M)
    attn_bias = jnp.where((ridx[:, None] % S) == (ridx[None, :] % S),
                          0.0, -1e30).astype(jnp.float32)             # (M, M)

    ff_chunk = min(1024, F)
    assert F % ff_chunk == 0

    kernel = functools.partial(_encoder_kernel, n_heads=n_heads,
                               eps=1e-5, ff_chunk=ff_chunk)

    layer_spec = lambda shape: pl.BlockSpec(shape, lambda l: (l, 0, 0))
    fixed_spec = lambda shape: pl.BlockSpec(shape, lambda l: tuple(0 for _ in shape))

    grid_spec = pltpu.PrefetchScalarGridSpec(
        num_scalar_prefetch=0,
        grid=(n_layers,),
        in_specs=[
            fixed_spec((M, E)),             # x (residual stream input)
            fixed_spec((M, M)),             # attention mask bias
            layer_spec((1, E, 3 * E)),      # wqkv
            layer_spec((1, 1, 3 * E)),      # bqkv
            layer_spec((1, E, E)),          # wo
            layer_spec((1, 1, E)),          # bo
            layer_spec((1, E, F)),          # w1
            layer_spec((1, 1, F)),          # b1
            layer_spec((1, F, E)),          # w2
            layer_spec((1, 1, E)),          # b2
            layer_spec((1, 1, E)),          # ln1_g
            layer_spec((1, 1, E)),          # ln1_b
            layer_spec((1, 1, E)),          # ln2_g
            layer_spec((1, 1, E)),          # ln2_b
            fixed_spec((E, vpad)),          # fc_w
            fixed_spec((1, vpad)),          # fc_b
        ],
        out_specs=fixed_spec((M, vpad)),
        scratch_shapes=[pltpu.VMEM((M, E), jnp.float32)],             # residual
    )

    logits = pl.pallas_call(
        kernel,
        out_shape=jax.ShapeDtypeStruct((M, vpad), jnp.float32),
        grid_spec=grid_spec,
        compiler_params=pltpu.CompilerParams(
            dimension_semantics=("arbitrary",),
            vmem_limit_bytes=32 * 1024 * 1024),
    )(x, attn_bias,
      params["wqkv"], params["bqkv"], params["wo"], params["bo"],
      params["w1"], params["b1"], params["w2"], params["b2"],
      params["ln1_g"], params["ln1_b"], params["ln2_g"], params["ln2_b"],
      params["fc_w"], params["fc_b"])

    return logits[:, :vocab].reshape(B, S, vocab)


# ----------------------------------- main ------------------------------------

if __name__ == "__main__":
    vocab_size, emb_size, n_heads, n_layers, seq_len = 64, 128, 4, 2, 16
    B, S = 2, 16

    key = jax.random.PRNGKey(0)
    pkey, dkey = jax.random.split(key)
    params = init_params(pkey, vocab_size, emb_size, n_heads, n_layers, seq_len)
    tokens = jax.random.randint(dkey, (B, S), 0, vocab_size, dtype=jnp.int32)

    fwd = jax.jit(functools.partial(transformer_forward, n_heads=n_heads))
    out = fwd(tokens, params)
    jax.block_until_ready(out)

    assert out.shape == (B, S, vocab_size), out.shape
    assert out.dtype == jnp.float32
    assert bool(jnp.isfinite(out).all())
    print("KERNEL_OK")
</pallas_src>

<mosaic_0001>
module attributes {stable_mosaic.version = 11 : i64} {
  func.func @_encoder_kernel(%arg0: i32, %arg1: memref<32x128xf32, #tpu.memory_space<vmem>>, %arg2: memref<32x32xf32, #tpu.memory_space<vmem>>, %arg3: memref<1x128x384xbf16, #tpu.memory_space<vmem>>, %arg4: memref<1x1x384xf32, #tpu.memory_space<vmem>>, %arg5: memref<1x128x128xbf16, #tpu.memory_space<vmem>>, %arg6: memref<1x1x128xf32, #tpu.memory_space<vmem>>, %arg7: memref<1x128x2048xbf16, #tpu.memory_space<vmem>>, %arg8: memref<1x1x2048xf32, #tpu.memory_space<vmem>>, %arg9: memref<1x2048x128xbf16, #tpu.memory_space<vmem>>, %arg10: memref<1x1x128xf32, #tpu.memory_space<vmem>>, %arg11: memref<1x1x128xf32, #tpu.memory_space<vmem>>, %arg12: memref<1x1x128xf32, #tpu.memory_space<vmem>>, %arg13: memref<1x1x128xf32, #tpu.memory_space<vmem>>, %arg14: memref<1x1x128xf32, #tpu.memory_space<vmem>>, %arg15: memref<128x128xbf16, #tpu.memory_space<vmem>>, %arg16: memref<1x128xf32, #tpu.memory_space<vmem>>, %arg17: memref<32x128xf32, #tpu.memory_space<vmem>>, %arg18: memref<32x128xf32, #tpu.memory_space<vmem>>) attributes {dimension_semantics = [#tpu.dimension_semantics<arbitrary>], iteration_bounds = array<i64: 2>, scalar_prefetch = 0 : i64, scratch_operands = 1 : i64, tpu.core_type = #tpu.core_type<tc>, window_params = [{pipeline_mode = #tpu.pipeline_mode<synchronous>, transform_indices = @transform_0, window_bounds = array<i64: 32, 128>}, {pipeline_mode = #tpu.pipeline_mode<synchronous>, transform_indices = @transform_1, window_bounds = array<i64: 32, 32>}, {transform_indices = @transform_2, window_bounds = array<i64: 1, 128, 384>}, {transform_indices = @transform_3, window_bounds = array<i64: 1, 1, 384>}, {transform_indices = @transform_4, window_bounds = array<i64: 1, 128, 128>}, {transform_indices = @transform_5, window_bounds = array<i64: 1, 1, 128>}, {transform_indices = @transform_6, window_bounds = array<i64: 1, 128, 2048>}, {transform_indices = @transform_7, window_bounds = array<i64: 1, 1, 2048>}, {transform_indices = @transform_8, window_bounds = array<i64: 1, 2048, 128>}, {transform_indices = @transform_9, window_bounds = array<i64: 1, 1, 128>}, {transform_indices = @transform_10, window_bounds = array<i64: 1, 1, 128>}, {transform_indices = @transform_11, window_bounds = array<i64: 1, 1, 128>}, {transform_indices = @transform_12, window_bounds = array<i64: 1, 1, 128>}, {transform_indices = @transform_13, window_bounds = array<i64: 1, 1, 128>}, {pipeline_mode = #tpu.pipeline_mode<synchronous>, transform_indices = @transform_14, window_bounds = array<i64: 128, 128>}, {pipeline_mode = #tpu.pipeline_mode<synchronous>, transform_indices = @transform_15, window_bounds = array<i64: 1, 128>}, {pipeline_mode = #tpu.pipeline_mode<synchronous>, transform_indices = @transform_16, window_bounds = array<i64: 32, 128>}]} {
    %c0_i32 = arith.constant 0 : i32
    %0 = arith.cmpi eq, %arg0, %c0_i32 : i32
    %1 = arith.extui %0 : i1 to i32
    %c0_i32_0 = arith.constant 0 : i32
    %2 = arith.cmpi ne, %1, %c0_i32_0 : i32
    scf.if %2 {
      %c0_75 = arith.constant 0 : index
      %c0_76 = arith.constant 0 : index
      %191 = vector.load %arg1[%c0_75, %c0_76] : memref<32x128xf32, #tpu.memory_space<vmem>>, vector<32x128xf32>
      %c0_77 = arith.constant 0 : index
      %c0_78 = arith.constant 0 : index
      %192 = vector.load %arg18[%c0_77, %c0_78] : memref<32x128xf32, #tpu.memory_space<vmem>>, vector<32x128xf32>
      tpu.vector_store %arg18[%c0_77, %c0_78], %191 {strides = array<i32>} : memref<32x128xf32, #tpu.memory_space<vmem>>, vector<32x128xf32>,
    } else {
    }
    %c0 = arith.constant 0 : index
    %c0_1 = arith.constant 0 : index
    %3 = vector.load %arg18[%c0, %c0_1] : memref<32x128xf32, #tpu.memory_space<vmem>>, vector<32x128xf32>
    %4 = arith.truncf %3 : vector<32x128xf32> to vector<32x128xbf16>
    %c0_2 = arith.constant 0 : index
    %c0_3 = arith.constant 0 : index
    %c0_4 = arith.constant 0 : index
    %5 = vector.load %arg3[%c0_2, %c0_3, %c0_4] : memref<1x128x384xbf16, #tpu.memory_space<vmem>>, vector<1x128x384xbf16>
    %6 = vector.shape_cast %5 : vector<1x128x384xbf16> to vector<128x384xbf16>
    %cst = arith.constant dense<0.000000e+00> : vector<32x384xf32>
    %7 = tpu.matmul %4, %6, %cst {dimension_numbers = #tpu.dot_dimension_numbers<[1], [0], [0], [1], [0, 0, 1, 1], [], []>} : vector<32x128xbf16>, vector<128x384xbf16>, vector<32x384xf32> -> vector<32x384xf32>
    %c0_5 = arith.constant 0 : index
    %c0_6 = arith.constant 0 : index
    %c0_7 = arith.constant 0 : index
    %8 = vector.load %arg4[%c0_5, %c0_6, %c0_7] : memref<1x1x384xf32, #tpu.memory_space<vmem>>, vector<1x1x384xf32>
    %9 = vector.shape_cast %8 : vector<1x1x384xf32> to vector<1x384xf32>
    %10 = vector.broadcast %9 : vector<1x384xf32> to vector<32x384xf32>
    %11 = arith.addf %7, %10 : vector<32x384xf32>
    %12 = vector.extract_strided_slice %11 {offsets = [0, 0], sizes = [32, 128], strides = [1, 1]} : vector<32x384xf32> to vector<32x128xf32>
    %13 = vector.extract_strided_slice %11 {offsets = [0, 128], sizes = [32, 128], strides = [1, 1]} : vector<32x384xf32> to vector<32x128xf32>
    %14 = vector.extract_strided_slice %11 {offsets = [0, 256], sizes = [32, 128], strides = [1, 1]} : vector<32x384xf32> to vector<32x128xf32>
    %c0_8 = arith.constant 0 : index
    %c0_9 = arith.constant 0 : index
    %15 = vector.load %arg2[%c0_8, %c0_9] : memref<32x32xf32, #tpu.memory_space<vmem>>, vector<32x32xf32>
    %cst_10 = arith.constant 0.000000e+00 : f32
    %16 = vector.broadcast %cst_10 : f32 to vector<32x128xf32>
    %17 = vector.extract_strided_slice %12 {offsets = [0, 0], sizes = [32, 32], strides = [1, 1]} : vector<32x128xf32> to vector<32x32xf32>
    %18 = arith.truncf %17 : vector<32x32xf32> to vector<32x32xbf16>
    %19 = vector.extract_strided_slice %13 {offsets = [0, 0], sizes = [32, 32], strides = [1, 1]} : vector<32x128xf32> to vector<32x32xf32>
    %20 = arith.truncf %19 : vector<32x32xf32> to vector<32x32xbf16>
    %21 = vector.extract_strided_slice %14 {offsets = [0, 0], sizes = [32, 32], strides = [1, 1]} : vector<32x128xf32> to vector<32x32xf32>
    %22 = arith.truncf %21 : vector<32x32xf32> to vector<32x32xbf16>
    %23 = tpu.transpose %20, [1, 0] : vector<32x32xbf16> -> vector<32x32xbf16>
    %cst_11 = arith.constant dense<0.000000e+00> : vector<32x32xf32>
    %24 = tpu.matmul %18, %23, %cst_11 {dimension_numbers = #tpu.dot_dimension_numbers<[1], [0], [0], [1], [0, 0, 1, 1], [], []>} : vector<32x32xbf16>, vector<32x32xbf16>, vector<32x32xf32> -> vector<32x32xf32>
    %25 = arith.addf %24, %15 : vector<32x32xf32>
    %cst_12 = arith.constant dense<0xFF800000> : vector<32xf32>
    %26 = vector.multi_reduction <maximumf>, %25, %cst_12 [1] : vector<32x32xf32> to vector<32xf32>
    %27 = vector.shape_cast %26 : vector<32xf32> to vector<32x1xf32>
    %28 = vector.broadcast %27 : vector<32x1xf32> to vector<32x32xf32>
    %29 = arith.subf %25, %28 : vector<32x32xf32>
    %30 = math.exp %29 : vector<32x32xf32>
    %cst_13 = arith.constant dense<0.000000e+00> : vector<32xf32>
    %31 = vector.multi_reduction <add>, %30, %cst_13 [1] : vector<32x32xf32> to vector<32xf32>
    %32 = vector.shape_cast %31 : vector<32xf32> to vector<32x1xf32>
    %33 = tpu.reciprocal %32 : vector<32x1xf32> -> vector<32x1xf32>
    %34 = vector.broadcast %33 : vector<32x1xf32> to vector<32x32xf32>
    %35 = arith.mulf %30, %34 : vector<32x32xf32>
    %36 = arith.truncf %35 : vector<32x32xf32> to vector<32x32xbf16>
    %cst_14 = arith.constant dense<0.000000e+00> : vector<32x32xf32>
    %37 = tpu.matmul %36, %22, %cst_14 {dimension_numbers = #tpu.dot_dimension_numbers<[1], [0], [0], [1], [0, 0, 1, 1], [], []>} : vector<32x32xbf16>, vector<32x32xbf16>, vector<32x32xf32> -> vector<32x32xf32>
    %38 = arith.truncf %37 : vector<32x32xf32> to vector<32x32xbf16>
    %c0_15 = arith.constant 0 : index
    %c0_16 = arith.constant 0 : index
    %c0_17 = arith.constant 0 : index
    %39 = vector.load %arg5[%c0_15, %c0_16, %c0_17] : memref<1x128x128xbf16, #tpu.memory_space<vmem>>, vector<1x32x128xbf16>
    %40 = vector.shape_cast %39 : vector<1x32x128xbf16> to vector<32x128xbf16>
    %cst_18 = arith.constant dense<0.000000e+00> : vector<32x128xf32>
    %41 = tpu.matmul %38, %40, %cst_18 {dimension_numbers = #tpu.dot_dimension_numbers<[1], [0], [0], [1], [0, 0, 1, 1], [], []>} : vector<32x32xbf16>, vector<32x128xbf16>, vector<32x128xf32> -> vector<32x128xf32>
    %42 = arith.addf %16, %41 : vector<32x128xf32>
    %43 = vector.extract_strided_slice %12 {offsets = [0, 32], sizes = [32, 32], strides = [1, 1]} : vector<32x128xf32> to vector<32x32xf32>
    %44 = arith.truncf %43 : vector<32x32xf32> to vector<32x32xbf16>
    %45 = vector.extract_strided_slice %13 {offsets = [0, 32], sizes = [32, 32], strides = [1, 1]} : vector<32x128xf32> to vector<32x32xf32>
    %46 = arith.truncf %45 : vector<32x32xf32> to vector<32x32xbf16>
    %47 = vector.extract_strided_slice %14 {offsets = [0, 32], sizes = [32, 32], strides = [1, 1]} : vector<32x128xf32> to vector<32x32xf32>
    %48 = arith.truncf %47 : vector<32x32xf32> to vector<32x32xbf16>
    %49 = tpu.transpose %46, [1, 0] : vector<32x32xbf16> -> vector<32x32xbf16>
    %cst_19 = arith.constant dense<0.000000e+00> : vector<32x32xf32>
    %50 = tpu.matmul %44, %49, %cst_19 {dimension_numbers = #tpu.dot_dimension_numbers<[1], [0], [0], [1], [0, 0, 1, 1], [], []>} : vector<32x32xbf16>, vector<32x32xbf16>, vector<32x32xf32> -> vector<32x32xf32>
    %51 = arith.addf %50, %15 : vector<32x32xf32>
    %cst_20 = arith.constant dense<0xFF800000> : vector<32xf32>
    %52 = vector.multi_reduction <maximumf>, %51, %cst_20 [1] : vector<32x32xf32> to vector<32xf32>
    %53 = vector.shape_cast %52 : vector<32xf32> to vector<32x1xf32>
    %54 = vector.broadcast %53 : vector<32x1xf32> to vector<32x32xf32>
    %55 = arith.subf %51, %54 : vector<32x32xf32>
    %56 = math.exp %55 : vector<32x32xf32>
    %cst_21 = arith.constant dense<0.000000e+00> : vector<32xf32>
    %57 = vector.multi_reduction <add>, %56, %cst_21 [1] : vector<32x32xf32> to vector<32xf32>
    %58 = vector.shape_cast %57 : vector<32xf32> to vector<32x1xf32>
    %59 = tpu.reciprocal %58 : vector<32x1xf32> -> vector<32x1xf32>
    %60 = vector.broadcast %59 : vector<32x1xf32> to vector<32x32xf32>
    %61 = arith.mulf %56, %60 : vector<32x32xf32>
    %62 = arith.truncf %61 : vector<32x32xf32> to vector<32x32xbf16>
    %cst_22 = arith.constant dense<0.000000e+00> : vector<32x32xf32>
    %63 = tpu.matmul %62, %48, %cst_22 {dimension_numbers = #tpu.dot_dimension_numbers<[1], [0], [0], [1], [0, 0, 1, 1], [], []>} : vector<32x32xbf16>, vector<32x32xbf16>, vector<32x32xf32> -> vector<32x32xf32>
    %64 = arith.truncf %63 : vector<32x32xf32> to vector<32x32xbf16>
    %c0_23 = arith.constant 0 : index
    %c32 = arith.constant 32 : index
    %c0_24 = arith.constant 0 : index
    %65 = vector.load %arg5[%c0_23, %c32, %c0_24] : memref<1x128x128xbf16, #tpu.memory_space<vmem>>, vector<1x32x128xbf16>
    %66 = vector.shape_cast %65 : vector<1x32x128xbf16> to vector<32x128xbf16>
    %cst_25 = arith.constant dense<0.000000e+00> : vector<32x128xf32>
    %67 = tpu.matmul %64, %66, %cst_25 {dimension_numbers = #tpu.dot_dimension_numbers<[1], [0], [0], [1], [0, 0, 1, 1], [], []>} : vector<32x32xbf16>, vector<32x128xbf16>, vector<32x128xf32> -> vector<32x128xf32>
    %68 = arith.addf %42, %67 : vector<32x128xf32>
    %69 = vector.extract_strided_slice %12 {offsets = [0, 64], sizes = [32, 32], strides = [1, 1]} : vector<32x128xf32> to vector<32x32xf32>
    %70 = arith.truncf %69 : vector<32x32xf32> to vector<32x32xbf16>
    %71 = vector.extract_strided_slice %13 {offsets = [0, 64], sizes = [32, 32], strides = [1, 1]} : vector<32x128xf32> to vector<32x32xf32>
    %72 = arith.truncf %71 : vector<32x32xf32> to vector<32x32xbf16>
    %73 = vector.extract_strided_slice %14 {offsets = [0, 64], sizes = [32, 32], strides = [1, 1]} : vector<32x128xf32> to vector<32x32xf32>
    %74 = arith.truncf %73 : vector<32x32xf32> to vector<32x32xbf16>
    %75 = tpu.transpose %72, [1, 0] : vector<32x32xbf16> -> vector<32x32xbf16>
    %cst_26 = arith.constant dense<0.000000e+00> : vector<32x32xf32>
    %76 = tpu.matmul %70, %75, %cst_26 {dimension_numbers = #tpu.dot_dimension_numbers<[1], [0], [0], [1], [0, 0, 1, 1], [], []>} : vector<32x32xbf16>, vector<32x32xbf16>, vector<32x32xf32> -> vector<32x32xf32>
    %77 = arith.addf %76, %15 : vector<32x32xf32>
    %cst_27 = arith.constant dense<0xFF800000> : vector<32xf32>
    %78 = vector.multi_reduction <maximumf>, %77, %cst_27 [1] : vector<32x32xf32> to vector<32xf32>
    %79 = vector.shape_cast %78 : vector<32xf32> to vector<32x1xf32>
    %80 = vector.broadcast %79 : vector<32x1xf32> to vector<32x32xf32>
    %81 = arith.subf %77, %80 : vector<32x32xf32>
    %82 = math.exp %81 : vector<32x32xf32>
    %cst_28 = arith.constant dense<0.000000e+00> : vector<32xf32>
    %83 = vector.multi_reduction <add>, %82, %cst_28 [1] : vector<32x32xf32> to vector<32xf32>
    %84 = vector.shape_cast %83 : vector<32xf32> to vector<32x1xf32>
    %85 = tpu.reciprocal %84 : vector<32x1xf32> -> vector<32x1xf32>
    %86 = vector.broadcast %85 : vector<32x1xf32> to vector<32x32xf32>
    %87 = arith.mulf %82, %86 : vector<32x32xf32>
    %88 = arith.truncf %87 : vector<32x32xf32> to vector<32x32xbf16>
    %cst_29 = arith.constant dense<0.000000e+00> : vector<32x32xf32>
    %89 = tpu.matmul %88, %74, %cst_29 {dimension_numbers = #tpu.dot_dimension_numbers<[1], [0], [0], [1], [0, 0, 1, 1], [], []>} : vector<32x32xbf16>, vector<32x32xbf16>, vector<32x32xf32> -> vector<32x32xf32>
    %90 = arith.truncf %89 : vector<32x32xf32> to vector<32x32xbf16>
    %c0_30 = arith.constant 0 : index
    %c64 = arith.constant 64 : index
    %c0_31 = arith.constant 0 : index
    %91 = vector.load %arg5[%c0_30, %c64, %c0_31] : memref<1x128x128xbf16, #tpu.memory_space<vmem>>, vector<1x32x128xbf16>
    %92 = vector.shape_cast %91 : vector<1x32x128xbf16> to vector<32x128xbf16>
    %cst_32 = arith.constant dense<0.000000e+00> : vector<32x128xf32>
    %93 = tpu.matmul %90, %92, %cst_32 {dimension_numbers = #tpu.dot_dimension_numbers<[1], [0], [0], [1], [0, 0, 1, 1], [], []>} : vector<32x32xbf16>, vector<32x128xbf16>, vector<32x128xf32> -> vector<32x128xf32>
    %94 = arith.addf %68, %93 : vector<32x128xf32>
    %95 = vector.extract_strided_slice %12 {offsets = [0, 96], sizes = [32, 32], strides = [1, 1]} : vector<32x128xf32> to vector<32x32xf32>
    %96 = arith.truncf %95 : vector<32x32xf32> to vector<32x32xbf16>
    %97 = vector.extract_strided_slice %13 {offsets = [0, 96], sizes = [32, 32], strides = [1, 1]} : vector<32x128xf32> to vector<32x32xf32>
    %98 = arith.truncf %97 : vector<32x32xf32> to vector<32x32xbf16>
    %99 = vector.extract_strided_slice %14 {offsets = [0, 96], sizes = [32, 32], strides = [1, 1]} : vector<32x128xf32> to vector<32x32xf32>
    %100 = arith.truncf %99 : vector<32x32xf32> to vector<32x32xbf16>
    %101 = tpu.transpose %98, [1, 0] : vector<32x32xbf16> -> vector<32x32xbf16>
    %cst_33 = arith.constant dense<0.000000e+00> : vector<32x32xf32>
    %102 = tpu.matmul %96, %101, %cst_33 {dimension_numbers = #tpu.dot_dimension_numbers<[1], [0], [0], [1], [0, 0, 1, 1], [], []>} : vector<32x32xbf16>, vector<32x32xbf16>, vector<32x32xf32> -> vector<32x32xf32>
    %103 = arith.addf %102, %15 : vector<32x32xf32>
    %cst_34 = arith.constant dense<0xFF800000> : vector<32xf32>
    %104 = vector.multi_reduction <maximumf>, %103, %cst_34 [1] : vector<32x32xf32> to vector<32xf32>
    %105 = vector.shape_cast %104 : vector<32xf32> to vector<32x1xf32>
    %106 = vector.broadcast %105 : vector<32x1xf32> to vector<32x32xf32>
    %107 = arith.subf %103, %106 : vector<32x32xf32>
    %108 = math.exp %107 : vector<32x32xf32>
    %cst_35 = arith.constant dense<0.000000e+00> : vector<32xf32>
    %109 = vector.multi_reduction <add>, %108, %cst_35 [1] : vector<32x32xf32> to vector<32xf32>
    %110 = vector.shape_cast %109 : vector<32xf32> to vector<32x1xf32>
    %111 = tpu.reciprocal %110 : vector<32x1xf32> -> vector<32x1xf32>
    %112 = vector.broadcast %111 : vector<32x1xf32> to vector<32x32xf32>
    %113 = arith.mulf %108, %112 : vector<32x32xf32>
    %114 = arith.truncf %113 : vector<32x32xf32> to vector<32x32xbf16>
    %cst_36 = arith.constant dense<0.000000e+00> : vector<32x32xf32>
    %115 = tpu.matmul %114, %100, %cst_36 {dimension_numbers = #tpu.dot_dimension_numbers<[1], [0], [0], [1], [0, 0, 1, 1], [], []>} : vector<32x32xbf16>, vector<32x32xbf16>, vector<32x32xf32> -> vector<32x32xf32>
    %116 = arith.truncf %115 : vector<32x32xf32> to vector<32x32xbf16>
    %c0_37 = arith.constant 0 : index
    %c96 = arith.constant 96 : index
    %c0_38 = arith.constant 0 : index
    %117 = vector.load %arg5[%c0_37, %c96, %c0_38] : memref<1x128x128xbf16, #tpu.memory_space<vmem>>, vector<1x32x128xbf16>
    %118 = vector.shape_cast %117 : vector<1x32x128xbf16> to vector<32x128xbf16>
    %cst_39 = arith.constant dense<0.000000e+00> : vector<32x128xf32>
    %119 = tpu.matmul %116, %118, %cst_39 {dimension_numbers = #tpu.dot_dimension_numbers<[1], [0], [0], [1], [0, 0, 1, 1], [], []>} : vector<32x32xbf16>, vector<32x128xbf16>, vector<32x128xf32> -> vector<32x128xf32>
    %120 = arith.addf %94, %119 : vector<32x128xf32>
    %c0_40 = arith.constant 0 : index
    %c0_41 = arith.constant 0 : index
    %c0_42 = arith.constant 0 : index
    %121 = vector.load %arg6[%c0_40, %c0_41, %c0_42] : memref<1x1x128xf32, #tpu.memory_space<vmem>>, vector<1x1x128xf32>
    %122 = vector.shape_cast %121 : vector<1x1x128xf32> to vector<1x128xf32>
    %123 = vector.broadcast %122 : vector<1x128xf32> to vector<32x128xf32>
    %124 = arith.addf %120, %123 : vector<32x128xf32>
    %125 = arith.addf %3, %124 : vector<32x128xf32>
    %c0_43 = arith.constant 0 : index
    %c0_44 = arith.constant 0 : index
    %c0_45 = arith.constant 0 : index
    %126 = vector.load %arg11[%c0_43, %c0_44, %c0_45] : memref<1x1x128xf32, #tpu.memory_space<vmem>>, vector<1x1x128xf32>
    %127 = vector.shape_cast %126 : vector<1x1x128xf32> to vector<1x128xf32>
    %c0_46 = arith.constant 0 : index
    %c0_47 = arith.constant 0 : index
    %c0_48 = arith.constant 0 : index
    %128 = vector.load %arg12[%c0_46, %c0_47, %c0_48] : memref<1x1x128xf32, #tpu.memory_space<vmem>>, vector<1x1x128xf32>
    %129 = vector.shape_cast %128 : vector<1x1x128xf32> to vector<1x128xf32>
    %cst_49 = arith.constant dense<0.000000e+00> : vector<32xf32>
    %130 = vector.multi_reduction <add>, %125, %cst_49 [1] : vector<32x128xf32> to vector<32xf32>
    %131 = vector.shape_cast %130 : vector<32xf32> to vector<32x1xf32>
    %cst_50 = arith.constant 1.280000e+02 : f32
    %132 = vector.broadcast %cst_50 : f32 to vector<32x1xf32>
    %133 = arith.divf %131, %132 : vector<32x1xf32>
    %134 = vector.broadcast %133 : vector<32x1xf32> to vector<32x128xf32>
    %135 = arith.subf %125, %134 : vector<32x128xf32>
    %136 = arith.mulf %135, %135 : vector<32x128xf32>
    %cst_51 = arith.constant dense<0.000000e+00> : vector<32xf32>
    %137 = vector.multi_reduction <add>, %136, %cst_51 [1] : vector<32x128xf32> to vector<32xf32>
    %138 = vector.shape_cast %137 : vector<32xf32> to vector<32x1xf32>
    %cst_52 = arith.constant 1.280000e+02 : f32
    %139 = vector.broadcast %cst_52 : f32 to vector<32x1xf32>
    %140 = arith.divf %138, %139 : vector<32x1xf32>
    %141 = vector.broadcast %133 : vector<32x1xf32> to vector<32x128xf32>
    %142 = arith.subf %125, %141 : vector<32x128xf32>
    %cst_53 = arith.constant 9.99999974E-6 : f32
    %143 = vector.broadcast %cst_53 : f32 to vector<32x1xf32>
    %144 = arith.addf %140, %143 : vector<32x1xf32>
    %145 = math.rsqrt %144 : vector<32x1xf32>
    %146 = vector.broadcast %145 : vector<32x1xf32> to vector<32x128xf32>
    %147 = arith.mulf %142, %146 : vector<32x128xf32>
    %148 = vector.broadcast %127 : vector<1x128xf32> to vector<32x128xf32>
    %149 = arith.mulf %147, %148 : vector<32x128xf32>
    %150 = vector.broadcast %129 : vector<1x128xf32> to vector<32x128xf32>
    %151 = arith.addf %149, %150 : vector<32x128xf32>
    %152 = arith.truncf %151 : vector<32x128xf32> to vector<32x128xbf16>
    %cst_54 = arith.constant 0.000000e+00 : f32
    %153 = vector.broadcast %cst_54 : f32 to vector<32x128xf32>
    %c0_i32_55 = arith.constant 0 : i32
    %c2_i32 = arith.constant 2 : i32
    %154 = arith.addi %c0_i32_55, %c2_i32 : i32
    %c1_i32 = arith.constant 1 : i32
    %155 = scf.for %arg19 = %c0_i32_55 to %154 step %c1_i32 iter_args(%arg20 = %153) -> (vector<32x128xf32>)  : i32 {
      %c1024_i32 = arith.constant 1024 : i32
      %191 = arith.muli %arg19, %c1024_i32 : i32
      %192 = tpu.assume_multiple %191, 1024 : i32
      %c0_75 = arith.constant 0 : index
      %c0_76 = arith.constant 0 : index
      %193 = arith.index_cast %192 : i32 to index
      %194 = vector.load %arg7[%c0_75, %c0_76, %193] : memref<1x128x2048xbf16, #tpu.memory_space<vmem>>, vector<1x128x1024xbf16>
      %195 = vector.shape_cast %194 : vector<1x128x1024xbf16> to vector<128x1024xbf16>
      %c0_77 = arith.constant 0 : index
      %c0_78 = arith.constant 0 : index
      %196 = arith.index_cast %192 : i32 to index
      %197 = vector.load %arg8[%c0_77, %c0_78, %196] : memref<1x1x2048xf32, #tpu.memory_space<vmem>>, vector<1x1x1024xf32>
      %198 = vector.shape_cast %197 : vector<1x1x1024xf32> to vector<1x1024xf32>
      %c0_79 = arith.constant 0 : index
      %199 = arith.index_cast %192 : i32 to index
      %c0_80 = arith.constant 0 : index
      %200 = vector.load %arg9[%c0_79, %199, %c0_80] : memref<1x2048x128xbf16, #tpu.memory_space<vmem>>, vector<1x1024x128xbf16>
      %201 = vector.shape_cast %200 : vector<1x1024x128xbf16> to vector<1024x128xbf16>
      %cst_81 = arith.constant dense<0.000000e+00> : vector<32x1024xf32>
      %202 = tpu.matmul %152, %195, %cst_81 {dimension_numbers = #tpu.dot_dimension_numbers<[1], [0], [0], [1], [0, 0, 1, 1], [], []>} : vector<32x128xbf16>, vector<128x1024xbf16>, vector<32x1024xf32> -> vector<32x1024xf32>
      %203 = vector.broadcast %198 : vector<1x1024xf32> to vector<32x1024xf32>
      %204 = arith.addf %202, %203 : vector<32x1024xf32>
      %cst_82 = arith.constant 0.000000e+00 : f32
      %205 = vector.broadcast %cst_82 : f32 to vector<32x1024xf32>
      %206 = arith.maximumf %204, %205 : vector<32x1024xf32>
      %207 = arith.truncf %206 : vector<32x1024xf32> to vector<32x1024xbf16>
      %cst_83 = arith.constant dense<0.000000e+00> : vector<32x128xf32>
      %208 = tpu.matmul %207, %201, %cst_83 {dimension_numbers = #tpu.dot_dimension_numbers<[1], [0], [0], [1], [0, 0, 1, 1], [], []>} : vector<32x1024xbf16>, vector<1024x128xbf16>, vector<32x128xf32> -> vector<32x128xf32>
      %209 = arith.addf %arg20, %208 : vector<32x128xf32>
      scf.yield %209 : vector<32x128xf32>
    }
    %c2_i32_56 = arith.constant 2 : i32
    %c0_57 = arith.constant 0 : index
    %c0_58 = arith.constant 0 : index
    %c0_59 = arith.constant 0 : index
    %156 = vector.load %arg10[%c0_57, %c0_58, %c0_59] : memref<1x1x128xf32, #tpu.memory_space<vmem>>, vector<1x1x128xf32>
    %157 = vector.shape_cast %156 : vector<1x1x128xf32> to vector<1x128xf32>
    %158 = vector.broadcast %157 : vector<1x128xf32> to vector<32x128xf32>
    %159 = arith.addf %155, %158 : vector<32x128xf32>
    %160 = arith.addf %151, %159 : vector<32x128xf32>
    %c0_60 = arith.constant 0 : index
    %c0_61 = arith.constant 0 : index
    %c0_62 = arith.constant 0 : index
    %161 = vector.load %arg13[%c0_60, %c0_61, %c0_62] : memref<1x1x128xf32, #tpu.memory_space<vmem>>, vector<1x1x128xf32>
    %162 = vector.shape_cast %161 : vector<1x1x128xf32> to vector<1x128xf32>
    %c0_63 = arith.constant 0 : index
    %c0_64 = arith.constant 0 : index
    %c0_65 = arith.constant 0 : index
    %163 = vector.load %arg14[%c0_63, %c0_64, %c0_65] : memref<1x1x128xf32, #tpu.memory_space<vmem>>, vector<1x1x128xf32>
    %164 = vector.shape_cast %163 : vector<1x1x128xf32> to vector<1x128xf32>
    %cst_66 = arith.constant dense<0.000000e+00> : vector<32xf32>
    %165 = vector.multi_reduction <add>, %160, %cst_66 [1] : vector<32x128xf32> to vector<32xf32>
    %166 = vector.shape_cast %165 : vector<32xf32> to vector<32x1xf32>
    %cst_67 = arith.constant 1.280000e+02 : f32
    %167 = vector.broadcast %cst_67 : f32 to vector<32x1xf32>
    %168 = arith.divf %166, %167 : vector<32x1xf32>
    %169 = vector.broadcast %168 : vector<32x1xf32> to vector<32x128xf32>
    %170 = arith.subf %160, %169 : vector<32x128xf32>
    %171 = arith.mulf %170, %170 : vector<32x128xf32>
    %cst_68 = arith.constant dense<0.000000e+00> : vector<32xf32>
    %172 = vector.multi_reduction <add>, %171, %cst_68 [1] : vector<32x128xf32> to vector<32xf32>
    %173 = vector.shape_cast %172 : vector<32xf32> to vector<32x1xf32>
    %cst_69 = arith.constant 1.280000e+02 : f32
    %174 = vector.broadcast %cst_69 : f32 to vector<32x1xf32>
    %175 = arith.divf %173, %174 : vector<32x1xf32>
    %176 = vector.broadcast %168 : vector<32x1xf32> to vector<32x128xf32>
    %177 = arith.subf %160, %176 : vector<32x128xf32>
    %cst_70 = arith.constant 9.99999974E-6 : f32
    %178 = vector.broadcast %cst_70 : f32 to vector<32x1xf32>
    %179 = arith.addf %175, %178 : vector<32x1xf32>
    %180 = math.rsqrt %179 : vector<32x1xf32>
    %181 = vector.broadcast %180 : vector<32x1xf32> to vector<32x128xf32>
    %182 = arith.mulf %177, %181 : vector<32x128xf32>
    %183 = vector.broadcast %162 : vector<1x128xf32> to vector<32x128xf32>
    %184 = arith.mulf %182, %183 : vector<32x128xf32>
    %185 = vector.broadcast %164 : vector<1x128xf32> to vector<32x128xf32>
    %186 = arith.addf %184, %185 : vector<32x128xf32>
    %c0_71 = arith.constant 0 : index
    %c0_72 = arith.constant 0 : index
    %187 = vector.load %arg18[%c0_71, %c0_72] : memref<32x128xf32, #tpu.memory_space<vmem>>, vector<32x128xf32>
    tpu.vector_store %arg18[%c0_71, %c0_72], %186 {strides = array<i32>} : memref<32x128xf32, #tpu.memory_space<vmem>>, vector<32x128xf32>,
    %c1_i32_73 = arith.constant 1 : i32
    %188 = arith.cmpi eq, %arg0, %c1_i32_73 : i32
    %189 = arith.extui %188 : i1 to i32
    %c0_i32_74 = arith.constant 0 : i32
    %190 = arith.cmpi ne, %189, %c0_i32_74 : i32
    scf.if %190 {
      %191 = arith.truncf %186 : vector<32x128xf32> to vector<32x128xbf16>
      %c0_75 = arith.constant 0 : index
      %c0_76 = arith.constant 0 : index
      %192 = vector.load %arg15[%c0_75, %c0_76] : memref<128x128xbf16, #tpu.memory_space<vmem>>, vector<128x128xbf16>
      %cst_77 = arith.constant dense<0.000000e+00> : vector<32x128xf32>
      %193 = tpu.matmul %191, %192, %cst_77 {dimension_numbers = #tpu.dot_dimension_numbers<[1], [0], [0], [1], [0, 0, 1, 1], [], []>} : vector<32x128xbf16>, vector<128x128xbf16>, vector<32x128xf32> -> vector<32x128xf32>
      %c0_78 = arith.constant 0 : index
      %c0_79 = arith.constant 0 : index
      %194 = vector.load %arg16[%c0_78, %c0_79] : memref<1x128xf32, #tpu.memory_space<vmem>>, vector<1x128xf32>
      %195 = vector.broadcast %194 : vector<1x128xf32> to vector<32x128xf32>
      %196 = arith.addf %193, %195 : vector<32x128xf32>
      %c0_80 = arith.constant 0 : index
      %c0_81 = arith.constant 0 : index
      %197 = vector.load %arg17[%c0_80, %c0_81] : memref<32x128xf32, #tpu.memory_space<vmem>>, vector<32x128xf32>
      tpu.vector_store %arg17[%c0_80, %c0_81], %196 {strides = array<i32>} : memref<32x128xf32, #tpu.memory_space<vmem>>, vector<32x128xf32>,
    } else {
    }
    return
  }
  func.func @transform_0(%arg0: i32) -> (i32, i32) {
    %c0_i32 = arith.constant 0 : i32
    %c0_i32_0 = arith.constant 0 : i32
    %c0_i32_1 = arith.constant 0 : i32
    return %c0_i32, %c0_i32_0 : i32, i32
  }
  func.func @transform_1(%arg0: i32) -> (i32, i32) {
    %c0_i32 = arith.constant 0 : i32
    %c0_i32_0 = arith.constant 0 : i32
    %c0_i32_1 = arith.constant 0 : i32
    return %c0_i32, %c0_i32_0 : i32, i32
  }
  func.func @transform_2(%arg0: i32) -> (i32, i32, i32) {
    %c0_i32 = arith.constant 0 : i32
    %c0_i32_0 = arith.constant 0 : i32
    %c0_i32_1 = arith.constant 0 : i32
    return %arg0, %c0_i32, %c0_i32_0 : i32, i32, i32
  }
  func.func @transform_3(%arg0: i32) -> (i32, i32, i32) {
    %c0_i32 = arith.constant 0 : i32
    %c0_i32_0 = arith.constant 0 : i32
    %c0_i32_1 = arith.constant 0 : i32
    return %arg0, %c0_i32, %c0_i32_0 : i32, i32, i32
  }
  func.func @transform_4(%arg0: i32) -> (i32, i32, i32) {
    %c0_i32 = arith.constant 0 : i32
    %c0_i32_0 = arith.constant 0 : i32
    %c0_i32_1 = arith.constant 0 : i32
    return %arg0, %c0_i32, %c0_i32_0 : i32, i32, i32
  }
  func.func @transform_5(%arg0: i32) -> (i32, i32, i32) {
    %c0_i32 = arith.constant 0 : i32
    %c0_i32_0 = arith.constant 0 : i32
    %c0_i32_1 = arith.constant 0 : i32
    return %arg0, %c0_i32, %c0_i32_0 : i32, i32, i32
  }
  func.func @transform_6(%arg0: i32) -> (i32, i32, i32) {
    %c0_i32 = arith.constant 0 : i32
    %c0_i32_0 = arith.constant 0 : i32
    %c0_i32_1 = arith.constant 0 : i32
    return %arg0, %c0_i32, %c0_i32_0 : i32, i32, i32
  }
  func.func @transform_7(%arg0: i32) -> (i32, i32, i32) {
    %c0_i32 = arith.constant 0 : i32
    %c0_i32_0 = arith.constant 0 : i32
    %c0_i32_1 = arith.constant 0 : i32
    return %arg0, %c0_i32, %c0_i32_0 : i32, i32, i32
  }
  func.func @transform_8(%arg0: i32) -> (i32, i32, i32) {
    %c0_i32 = arith.constant 0 : i32
    %c0_i32_0 = arith.constant 0 : i32
    %c0_i32_1 = arith.constant 0 : i32
    return %arg0, %c0_i32, %c0_i32_0 : i32, i32, i32
  }
  func.func @transform_9(%arg0: i32) -> (i32, i32, i32) {
    %c0_i32 = arith.constant 0 : i32
    %c0_i32_0 = arith.constant 0 : i32
    %c0_i32_1 = arith.constant 0 : i32
    return %arg0, %c0_i32, %c0_i32_0 : i32, i32, i32
  }
  func.func @transform_10(%arg0: i32) -> (i32, i32, i32) {
    %c0_i32 = arith.constant 0 : i32
    %c0_i32_0 = arith.constant 0 : i32
    %c0_i32_1 = arith.constant 0 : i32
    return %arg0, %c0_i32, %c0_i32_0 : i32, i32, i32
  }
  func.func @transform_11(%arg0: i32) -> (i32, i32, i32) {
    %c0_i32 = arith.constant 0 : i32
    %c0_i32_0 = arith.constant 0 : i32
    %c0_i32_1 = arith.constant 0 : i32
    return %arg0, %c0_i32, %c0_i32_0 : i32, i32, i32
  }
  func.func @transform_12(%arg0: i32) -> (i32, i32, i32) {
    %c0_i32 = arith.constant 0 : i32
    %c0_i32_0 = arith.constant 0 : i32
    %c0_i32_1 = arith.constant 0 : i32
    return %arg0, %c0_i32, %c0_i32_0 : i32, i32, i32
  }
  func.func @transform_13(%arg0: i32) -> (i32, i32, i32) {
    %c0_i32 = arith.constant 0 : i32
    %c0_i32_0 = arith.constant 0 : i32
    %c0_i32_1 = arith.constant 0 : i32
    return %arg0, %c0_i32, %c0_i32_0 : i32, i32, i32
  }
  func.func @transform_14(%arg0: i32) -> (i32, i32) {
    %c0_i32 = arith.constant 0 : i32
    %c0_i32_0 = arith.constant 0 : i32
    %c0_i32_1 = arith.constant 0 : i32
    return %c0_i32, %c0_i32_0 : i32, i32
  }
  func.func @transform_15(%arg0: i32) -> (i32, i32) {
    %c0_i32 = arith.constant 0 : i32
    %c0_i32_0 = arith.constant 0 : i32
    %c0_i32_1 = arith.constant 0 : i32
    return %c0_i32, %c0_i32_0 : i32, i32
  }
  func.func @transform_16(%arg0: i32) -> (i32, i32) {
    %c0_i32 = arith.constant 0 : i32
    %c0_i32_0 = arith.constant 0 : i32
    %c0_i32_1 = arith.constant 0 : i32
    return %c0_i32, %c0_i32_0 : i32, i32
  }
}

</mosaic_0001>

<bundles_post_ra>
// kernel: transformer_forward.1
= control target key start
LH: loop header
LB: loop body
LE: loop exit
PB: predicated region body
PF: predicated region fallthrough
CT: control target
= control target key end

     0   :  { %s6197_s0 = inlined_call_operand.vmem [shape: f32[32,128], index: 0, kind: input, shape index: {}]   ;;  %s6198_s1 = inlined_call_operand.vmem [shape: f32[32,32], index: 1, kind: input, shape index: {}]   ;;  %s6199_s2 = inlined_call_operand.vmem [shape: bf16[2,128,384], index: 2, kind: input, shape index: {}]   ;;  %s6200_s3 = inlined_call_operand.vmem [shape: f32[2,1,384], index: 3, kind: input, shape index: {}]   ;;  %s6201_s4 = inlined_call_operand.hbm [shape: bf16[2,128,128], index: 4, kind: input, shape index: {}]   ;;  %s6202_s5 = inlined_call_operand.vmem [shape: f32[2,1,128], index: 5, kind: input, shape index: {}]   ;;  %s6203_s6 = inlined_call_operand.hbm [shape: bf16[2,128,2048], index: 6, kind: input, shape index: {}]   ;;  %s6204_s7 = inlined_call_operand.vmem [shape: f32[2,1,2048], index: 7, kind: input, shape index: {}]   ;;  %s6205_s8 = inlined_call_operand.hbm [shape: bf16[2,2048,128], index: 8, kind: input, shape index: {}]   ;;  %s6206_s9 = inlined_call_operand.vmem [shape: f32[2,1,128], index: 9, kind: input, shape index: {}]   ;;  %s6207_s10 = inlined_call_operand.vmem [shape: f32[2,1,128], index: 10, kind: input, shape index: {}]   ;;  %s6208_s11 = inlined_call_operand.vmem [shape: f32[2,1,128], index: 11, kind: input, shape index: {}]   ;;  %s6209_s12 = inlined_call_operand.vmem [shape: f32[2,1,128], index: 12, kind: input, shape index: {}]   ;;  %s6210_s13 = inlined_call_operand.hbm [shape: f32[2,1,128], index: 13, kind: input, shape index: {}]   ;;  %s6211_s14 = inlined_call_operand.vmem [shape: bf16[128,128], index: 14, kind: input, shape index: {}]   ;;  %s6212_s15 = inlined_call_operand.hbm [shape: f32[1,128], index: 15, kind: input, shape index: {}]   ;;  %s6213_s16 = inlined_call_operand.hbm [shape: f32[32,128], index: 16, kind: output, shape index: {}]  }
   0x1   :  { %6229 = sst [smem:[#allocation21_spill]] %s6197_s0 }
   0x2   :  { %6230 = sst [smem:[#allocation22_spill]] %s6198_s1 }
   0x3   :  { %6231 = sst [smem:[#allocation23_spill]] %s6199_s2 }
   0x4   :  { %6232 = sst [smem:[#allocation24_spill]] %s6200_s3 }
   0x5   :  { %6233 = sst [smem:[#allocation25_spill]] %s6201_s4 }
   0x6   :  { %6234 = sst [smem:[#allocation26_spill]] %s6203_s6 }
   0x7   :  { %6235 = sst [smem:[#allocation27_spill]] %s6204_s7 }
   0x8   :  { %6236 = sst [smem:[#allocation28_spill]] %s6205_s8 }
   0x9   :  { %6237 = sst [smem:[#allocation29_spill]] %s6206_s9 }
   0xa   :  { %6238 = sst [smem:[#allocation30_spill]] %s6207_s10 }
   0xb   :  { %6239 = sst [smem:[#allocation31_spill]] %s6208_s11 }
   0xc   :  { %6240 = sst [smem:[#allocation32_spill]] %s6209_s12 }
   0xd   :  { %6241 = sst [smem:[#allocation33_spill]] %s6210_s13 }
   0xe   :  { %6242 = sst [smem:[#allocation34_spill]] %s6211_s14 }
   0xf   :  { %6243 = sst [smem:[#allocation35_spill]] %s6212_s15 }
  0x10   :  { %6244 = sst [smem:[#allocation36_spill]] %s6213_s16 }
  0x11   :  { %21 = vsyncpa [#allocation4], 0 }
  0x12   :  { %23 = vsyncpa [#allocation4 + $0x1], 0 }
  0x13   :  { %24 = vsyncpa [#allocation7], 0 }
  0x14   :  { %26 = vsyncpa [#allocation7 + $0x1], 0 }
  0x15   :  { %27 = vsyncpa [#allocation10], 0 }
  0x16   :  { %29 = vsyncpa [#allocation10 + $0x1], 0 }
  0x17   :  { %30 = vsyncpa [#allocation5], 0  ;;  %s5284_s21 = smov 0   ;;  %s5286_s22 = smov 0  }
  0x18   :  { %s5288_s23 = smov 0   ;;  %s5290_s24 = smov 0  }
  0x19 LB: > { %6245 = sst [smem:[#allocation18_spill]] %s5157_s23  ;;  %s5303_s25 = sadd.s32 4294967295, %s5161_s24   ;;  %s5161_s24 = sphi %s5290_s24, %s6290_s24   ;;  %s5157_s23 = sphi %s5288_s23, %s6292_s23   ;;  %s5153_s22 = sphi %s5286_s22, %s6294_s22   ;;  %s5149_s21 = sphi %s5284_s21, %s6293_s21  }
  0x1a   : > { %s5306_s26 = sadd.s32 1, %s5161_s24   ;;  %s137_s28 = sadd.s32 1, %s5157_s23 }
  0x1b   : > { %6246 = sst [smem:[#allocation19_spill]] %s5306_s26  ;;  %s134_s27 = ssub.s32 %s5161_s24, %s5306_s26 }
  0x1c   : > { %p135_p0 = scmp.eq.s32.totalorder %s134_s27, 0  ;;  %p144_p1 = scmp.ne.s32.totalorder %s5157_s23, %s5153_s22 }
  0x1d   : > { %p145_p2 = scmp.eq.s32.totalorder %s5161_s24, 0  ;;  %p150_p3 = scmp.ne.s32.totalorder %s5153_s22, %s5149_s21 }
  0x1e   : > { %s5316_s29 = scalar_select %p135_p0, %s5157_s23, %s137_s28  }
  0x1f   : > { %p5318_p4 = por %p145_p2, %p144_p1  ;;  %p6221_p5 = scmp.eq.s32.totalorder %s5303_s25, 0 }
  0x20   : > { %6247 = sst [smem:[#allocation20_spill]] %s5316_s29  ;;  %p4032_p6 = scmp.ge.s32.totalorder %s5161_s24, 1 }
  0x21   : > { %p458_p7 = scmp.lt.s32.totalorder %s5161_s24, 3  ;;  %p5327_p8 = por %p6221_p5, %p150_p3 }
  0x22   : > { %s5183_s18 = smov [#allocation11]   ;;  %p4635_p12 = scmp.lt.s32.totalorder %s5161_s24, 2 }
  0x23   : > { %s6249_s0 = scalar_select %p5327_p8, 1, 0 }
  0x24   : > { %p5332_p10 = pnand %p4032_p6, %p458_p7  ;;  %s480_s19 = sshll.u32 %s5183_s18, 4  ;;  %s481_s19 = int_to_ptr.vmem [resolvable:$true] %s480_s19 }
  0x25   : > { %s5340_s20 = sand.u32 1, %s5157_s23   ;;  %p5350_p0 = pnand %p4635_p12, %p5318_p4 }
  0x26   : > { %s6250_s17 = scalar_select %p5332_p10, 1, 0 }
  0x27   : > { %p4617_p11 = pneg %p5332_p10  ;;  %s6227_s28 = sand.u32 1, %s5161_s24  }
  0x28   : > { %s6252_s27 = scalar_select %p5350_p0, 1, 0 }
  0x29   : > { %p5344_p13 = pnand %p4617_p11, %p6221_p5  ;;  %s6253_s15 = sld [smem:[#allocation35_spill]] }
  0x2b   : > { %p4919_p2 = pneg %p5344_p13 }
  0x2f   : > { %s4917_s26 = scalar_lea.hbm %s6253_s15, 16 }
  0x30   : > { %p4918_p1 = scmp.ne.s32.totalorder %s6253_s15, %s4917_s26  ;;  %p4924_p4 = scmp.lt.u32.totalorder %s4917_s26, %s6253_s15 }
  0x32   : > { %p4920_p3 = pnand %p4919_p2, %p4918_p1 }
  0x34   : > { %p4921_p6 = pneg %p4920_p3 }
  0x36   : > { %p4926_p7 = pnand %p4924_p4, %p4921_p6 }
  0x38   : > { %4929 = shalt.err (!%p4926_p7)
}
  0x39   : > { %s4930_s1 = scalar_lea.vmem %s481_s19, 16  ;;  %s4937_s29 = scalar_lea.vmem %s481_s19, 32 }
  0x3a   : > { %p4931_p11 = scmp.ne.s32.totalorder %s481_s19, %s4930_s1  ;;  %p4938_p5 = scmp.lt.s32.totalorder %s481_s19, %s481_s19 }
  0x3b   : > { %p4939_p8 = scmp.lt.s32.totalorder %s4937_s29, %s4930_s1 }
  0x3c   : > { %p4933_p12 = pnand %p4931_p11, %p4919_p2 }
  0x3d   : > { %p4940_p10 = por %p4939_p8, %p4938_p5 }
  0x3e   : > { %p4934_p9 = pneg %p4933_p12 }
  0x40   : > { %p4941_p0 = pnand %p4940_p10, %p4934_p9 }
  0x42   : > { %4944 = shalt.err (!%p4941_p0)
}
  0x43   : > { %4620 = dma.hbm_to_vmem [thread:$0]  (!%p5344_p13), %s6253_s15, 16, %s481_s19, [#allocation10]  }
  0x44   : > { %s6225_s23 = sshll.u32 %s5340_s20, 10  ;;  %s6226_s26 = sshll.u32 %s5161_s24, 14 }
  0x45   : > { %s6254_s6 = sld [smem:[#allocation26_spill]]  ;;  %s537_s21 = scalar_lea.vmem [#allocation6], %s6225_s23 }
  0x46   : > { %s544_s29 = sshll.u32 %s537_s21, 4  ;;  %s5386_s14 = scalar_lea.sflag [#allocation7], %s6227_s28  ;;  %s5382_s29 = int_to_ptr.vmem [resolvable:$true] %s544_s29 }
  0x47   : > { %p6255_p8 = scmp.ne.s32.totalorder %s6252_s27, 0 }
  0x49   : > { %p5392_p9 = pneg %p6255_p8 }
  0x4b   : > { %s5378_s30 = scalar_lea.hbm %s6254_s6, %s6226_s26  ;;  %s4950_s21 = scalar_lea.hbm %s6254_s6, 32768 }
  0x4c   : > { %s4945_s19 = scalar_lea.hbm %s5378_s30, 16384  ;;  %p4951_p0 = scmp.lt.u32.totalorder %s5378_s30, %s6254_s6 }
  0x4d   : > { %p4946_p5 = scmp.ne.s32.totalorder %s5378_s30, %s4945_s19  ;;  %p4952_p1 = scmp.lt.u32.totalorder %s4950_s21, %s4945_s19 }
  0x4e   : > { %p4954_p3 = scmp.lt.u32.totalorder %s4945_s19, %s5378_s30 }
  0x4f   : > { %p4948_p10 = pnand %p5392_p9, %p4946_p5  ;;  %p4953_p2 = por %p4952_p1, %p4951_p0 }
  0x51   : > { %p4949_p13 = pneg %p4948_p10  ;;  %p4955_p6 = por %p4954_p3, %p4953_p2 }
  0x53   : > { %p4956_p4 = pnand %p4955_p6, %p4949_p13 }
  0x55   : > { %4959 = shalt.err (!%p4956_p4)
}
  0x56   : > { %s4960_s28 = scalar_lea.vmem %s5382_s29, 16384  ;;  %s5184_s18 = smov [#allocation6]  }
  0x57   : > { %p4961_p7 = scmp.ne.s32.totalorder %s5382_s29, %s4960_s28  ;;  %s4965_s1 = sshll.u32 %s5184_s18, 4  ;;  %s4966_s1 = int_to_ptr.vmem [resolvable:$false] %s4965_s1 }
  0x58   : > { %s4967_s23 = scalar_lea.vmem %s4966_s1, 32768  ;;  %p4968_p5 = scmp.lt.s32.totalorder %s5382_s29, %s4966_s1 }
  0x59   : > { %p4963_p11 = pnand %p4961_p7, %p5392_p9  ;;  %p4969_p10 = scmp.lt.s32.totalorder %s4967_s23, %s4960_s28 }
  0x5b   : > { %p4964_p12 = pneg %p4963_p11  ;;  %p4970_p0 = por %p4969_p10, %p4968_p5 }
  0x5d   : > { %p4971_p1 = pnand %p4970_p0, %p4964_p12 }
  0x5f   : > { %4974 = shalt.err (!%p4971_p1)
}
  0x60   : > { %s5185_s26 = smov 1024   ;;  %s5186_s19 = smov 64  }
  0x61   : > { %4627 = dma.hbm_to_vmem [thread:$0]  (!%p6255_p8), %s5378_s30, 16384, %s5382_s29, %s5386_s14, %s5185_s26, %s5185_s26, %s5186_s19  }
  0x62   : > { %s6257_s21 = sshll.u32 %s5161_s24, 14  ;;  %s6258_s8 = sld [smem:[#allocation28_spill]] }
  0x63   : > { %s6259_s23 = sshll.u32 %s5340_s20, 10  ;;  %s4035_s12 = sshll.u32 %s5340_s20, 6 }
  0x64   : > { %s565_s6 = scalar_lea.vmem [#allocation8], %s6259_s23  ;;  %s4260_s11 = sshll.u32 %s5161_s24, 10 }
  0x65   : > { %s572_s15 = sshll.u32 %s565_s6, 4  ;;  %s6260_s4 = sld [smem:[#allocation25_spill]]  ;;  %s5426_s15 = int_to_ptr.vmem [resolvable:$true] %s572_s15 }
  0x66   : > { %s510_s30 = scalar_lea.vmem [#allocation3], %s4035_s12  ;;  %s507_s26 = scalar_lea.sflag [#allocation4], %s5340_s20 }
  0x67   : > { %s517_s29 = sshll.u32 %s510_s30, 4  ;;  %s5435_s29 = int_to_ptr.vmem [resolvable:$true] %s517_s29 }
  0x68   : > { %s5422_s1 = scalar_lea.hbm %s6258_s8, %s6257_s21 }
  0x6b   : > { %s5433_s3 = scalar_lea.hbm %s6260_s4, %s4260_s11  ;;  %s4980_s9 = scalar_lea.hbm %s6260_s4, 2048 }
  0x6c   : > { %s4975_s21 = scalar_lea.hbm %s5433_s3, 1024  ;;  %p4981_p6 = scmp.lt.u32.totalorder %s5433_s3, %s6260_s4 }
  0x6d   : > { %p4976_p13 = scmp.ne.s32.totalorder %s5433_s3, %s4975_s21  ;;  %p4982_p4 = scmp.lt.u32.totalorder %s4980_s9, %s4975_s21 }
  0x6e   : > { %p4984_p11 = scmp.lt.u32.totalorder %s4975_s21, %s5433_s3 }
  0x6f   : > { %p4978_p2 = pnand %p4976_p13, %p5392_p9  ;;  %p4983_p7 = por %p4982_p4, %p4981_p6 }
  0x71   : > { %p4979_p3 = pneg %p4978_p2  ;;  %p4985_p12 = por %p4984_p11, %p4983_p7 }
  0x73   : > { %p4986_p5 = pnand %p4985_p12, %p4979_p3 }
  0x75   : > { %4989 = shalt.err (!%p4986_p5)
}
  0x76   : > { %s4990_s12 = scalar_lea.vmem %s5435_s29, 1024  ;;  %s5187_s18 = smov [#allocation3]  }
  0x77   : > { %p4991_p10 = scmp.ne.s32.totalorder %s5435_s29, %s4990_s12  ;;  %s4995_s23 = sshll.u32 %s5187_s18, 4  ;;  %s4996_s23 = int_to_ptr.vmem [resolvable:$false] %s4995_s23 }
  0x78   : > { %s4997_s30 = scalar_lea.vmem %s4996_s23, 2048  ;;  %p4998_p13 = scmp.lt.s32.totalorder %s5435_s29, %s4996_s23 }
  0x79   : > { %p4993_p0 = pnand %p4991_p10, %p5392_p9  ;;  %p4999_p2 = scmp.lt.s32.totalorder %s4997_s30, %s4990_s12 }
  0x7b   : > { %p4994_p1 = pneg %p4993_p0  ;;  %p5000_p6 = por %p4999_p2, %p4998_p13 }
  0x7d   : > { %p5001_p4 = pnand %p5000_p6, %p4994_p1 }
  0x7f   : > { %5004 = shalt.err (!%p5001_p4)
}
  0x80   : > { %s5188_s21 = smov 4   ;;  %s5005_s6 = scalar_lea.hbm %s5422_s1, 16384 }
  0x81   : > { %4624 = dma.hbm_to_vmem [thread:$0]  (!%p6255_p8), %s5433_s3, 1024, %s5435_s29, %s507_s26, %s5186_s19, %s5186_s19, %s5188_s21  }
  0x82   : > { %p5006_p3 = scmp.ne.s32.totalorder %s5422_s1, %s5005_s6  ;;  %s5010_s10 = scalar_lea.hbm %s6258_s8, 32768 }
  0x83   : > { %p5011_p12 = scmp.lt.u32.totalorder %s5422_s1, %s6258_s8  ;;  %p5012_p5 = scmp.lt.u32.totalorder %s5010_s10, %s5005_s6 }
  0x84   : > { %p5008_p7 = pnand %p5006_p3, %p5392_p9  ;;  %p5014_p0 = scmp.lt.u32.totalorder %s5005_s6, %s5422_s1 }
  0x85   : > { %p5013_p10 = por %p5012_p5, %p5011_p12 }
  0x86   : > { %p5009_p11 = pneg %p5008_p7 }
  0x87   : > { %p5015_p1 = por %p5014_p0, %p5013_p10 }
  0x89   : > { %p5016_p13 = pnand %p5015_p1, %p5009_p11 }
  0x8b   : > { %5019 = shalt.err (!%p5016_p13)
}
  0x8c   : > { %s5020_s3 = scalar_lea.vmem %s5426_s15, 16384  ;;  %s5189_s29 = smov [#allocation8]  }
  0x8d   : > { %p5021_p2 = scmp.ne.s32.totalorder %s5426_s15, %s5020_s3  ;;  %s5025_s26 = sshll.u32 %s5189_s29, 4  ;;  %s5026_s26 = int_to_ptr.vmem [resolvable:$false] %s5025_s26 }
  0x8e   : > { %s5027_s18 = scalar_lea.vmem %s5026_s26, 32768  ;;  %p5028_p3 = scmp.lt.s32.totalorder %s5426_s15, %s5026_s26 }
  0x8f   : > { %p5023_p6 = pnand %p5021_p2, %p5392_p9  ;;  %p5029_p7 = scmp.lt.s32.totalorder %s5027_s18, %s5020_s3 }
  0x91   : > { %p5024_p4 = pneg %p5023_p6  ;;  %p5030_p12 = por %p5029_p7, %p5028_p3 }
  0x93   : > { %p5031_p5 = pnand %p5030_p12, %p5024_p4 }
  0x95   : > { %5034 = shalt.err (!%p5031_p5)
}
  0x96   : > { %4630 = dma.hbm_to_vmem [thread:$0]  (!%p6255_p8), %s5422_s1, 16384, %s5426_s15, %s5386_s14, %s5186_s19, %s5186_s19, %s5188_s21  }
  0x97   : > { %s4044_s23 = sshll.u32 %s5161_s24, 4  ;;  %s609_s30 = scalar_lea.vmem [#allocation9], %s5340_s20 }
  0x98   : > { %s616_s6 = sshll.u32 %s609_s30, 4  ;;  %s6261_s13 = sld [smem:[#allocation33_spill]]  ;;  %s617_s6 = int_to_ptr.vmem [resolvable:$true] %s616_s6 }
  0x99   : > { %s6262_s11 = sand.u32 1, %s5161_s24  }
  0x9a   : > { %s607_s12 = scalar_lea.sflag [#allocation10], %s6262_s11 }
  0x9e   : > { %s5494_s10 = scalar_lea.hbm %s6261_s13, %s4044_s23  ;;  %s5040_s14 = scalar_lea.hbm %s6261_s13, 32 }
  0x9f   : > { %s5035_s3 = scalar_lea.hbm %s5494_s10, 16  ;;  %p5041_p1 = scmp.lt.u32.totalorder %s5494_s10, %s6261_s13 }
  0xa0   : > { %p5036_p11 = scmp.ne.s32.totalorder %s5494_s10, %s5035_s3  ;;  %p5042_p13 = scmp.lt.u32.totalorder %s5040_s14, %s5035_s3 }
  0xa1   : > { %p5044_p6 = scmp.lt.u32.totalorder %s5035_s3, %s5494_s10 }
  0xa2   : > { %p5038_p10 = pnand %p5036_p11, %p5392_p9  ;;  %p5043_p2 = por %p5042_p13, %p5041_p1 }
  0xa4   : > { %p5039_p0 = pneg %p5038_p10  ;;  %p5045_p4 = por %p5044_p6, %p5043_p2 }
  0xa6   : > { %p5046_p3 = pnand %p5045_p4, %p5039_p0 }
  0xa8   : > { %5049 = shalt.err (!%p5046_p3)
}
  0xa9   : > { %s5050_s24 = scalar_lea.vmem %s617_s6, 16  ;;  %s5190_s21 = smov [#allocation9]  }
  0xaa   : > { %p5051_p7 = scmp.ne.s32.totalorder %s617_s6, %s5050_s24  ;;  %s5055_s29 = sshll.u32 %s5190_s21, 4  ;;  %s5056_s29 = int_to_ptr.vmem [resolvable:$false] %s5055_s29 }
  0xab   : > { %s5057_s26 = scalar_lea.vmem %s5056_s29, 32  ;;  %p5058_p11 = scmp.lt.s32.totalorder %s617_s6, %s5056_s29 }
  0xac   : > { %p5053_p12 = pnand %p5051_p7, %p5392_p9  ;;  %p5059_p10 = scmp.lt.s32.totalorder %s5057_s26, %s5050_s24 }
  0xae   : > { %p5054_p5 = pneg %p5053_p12  ;;  %p5060_p8 = por %p5059_p10, %p5058_p11 }
  0xb0   : > { %p5061_p1 = pnand %p5060_p8, %p5054_p5 }
  0xb2   : > { %5064 = shalt.err (!%p5061_p1)
}
  0xb3   : > { %p6263_p13 = scmp.ne.s32.totalorder %s6252_s27, 0  ;;  %p6264_p0 = scmp.ne.s32.totalorder %s6250_s17, 0 }
  0xb4   : > { %s5518_s16 = sand.u32 (!%p6264_p0), 1, %s5153_s22   ;;  %p6265_p9 = scmp.ne.s32.totalorder (!%p6264_p0), %s6249_s0, 0 }
  0xb5   : > { %4633 = dma.hbm_to_vmem [thread:$0]  (!%p6263_p13), %s5494_s10, 16, %s617_s6, %s607_s12  }
  0xb6   : > { %625 = sbr.rel (%p6264_p0) target bundleno = 4218 (0x107a), region = 84  ;;  %s4046_s18 = sshll.u32 (!%p6264_p0), %s5518_s16, 6 }
  0xb7   : > { %s628_s23 = scalar_lea.sflag (!%p6264_p0), [#allocation4], %s5518_s16  ;;  %s5522_s30 = scalar_lea.vmem (!%p6264_p0), [#allocation3], %s4046_s18 }
  0xbd   : > { %5128 = dma.done.wait (%p6265_p9), %s628_s23, 1024  }
  0xbe   : > { %5130 = vsyncadd (%p6265_p9), %s628_s23, 4294966272  ;;  %s636_s17 = sand.u32 1, %s5303_s25   ;;  %s4047_s27 = sshll.u32 %s5518_s16, 10 }
  0xbf   : > { %s637_s6 = scalar_lea.sflag [#allocation7], %s636_s17  ;;  %s5530_s28 = scalar_lea.vmem [#allocation6], %s4047_s27 }
  0xc0   : > { %5132 = dma.done.wait (%p6265_p9), %s637_s6, 32768  }
  0xc1   : > { %5134 = vsyncadd (%p6265_p9), %s637_s6, 4294934528  ;;  %s5536_s9 = scalar_lea.vmem [#allocation8], %s4047_s27  ;;  %s655_s10 = scalar_lea.sflag [#allocation10], %s636_s17 }
  0xc2   : > { %5136 = dma.done.wait (%p6265_p9), %s655_s10, 16  }
  0xc3   : > { %5138 = vsyncadd (%p6265_p9), %s655_s10, 4294967280  ;;  %p6266_p8 = scmp.eq.s32.totalorder %s5303_s25, 0 }
  0xc5   : > { %5140 = dma.done.wait (%p6266_p8), [#allocation10], 16   ;;  %p6267_p2 = pmov %p6266_p8 }
  0xc6   : > { %p747_p6 = scmp.lt.s32.totalorder %s5303_s25, 1  ;;  %s6268_s2 = sld [smem:[#allocation23_spill]] }
  0xc7   : > { %5142 = vsyncadd (%p6267_p2), [#allocation10], 4294967280  ;;  %s6269_s7 = sld [smem:[#allocation27_spill]]  ;;  %s6270_s27 = sld [smem:[#allocation24_spill]] }
  0xc8   : > { %s5549_s12 = scalar_select %p747_p6, %s5303_s25, 1 }
  0xc9   : > { %s6271_s15 = sld [smem:[#allocation29_spill]]  ;;  %s6272_s8 = sld [smem:[#allocation30_spill]] }
  0xca   : > { %s4599_s0 = smul.u32 192, %s5549_s12  ;;  %s4051_s19 = sshll.u32 %s5549_s12, 4 }
  0xcb   : > { %s4600_s14 = smul.u32 3, %s5549_s12  ;;  %s6274_s26 = sld [smem:[#allocation32_spill]] }
  0xcc   : > { %s5561_s21 = scalar_lea.vmem %s6268_s2, %s4599_s0  ;;  %s6273_s2 = sld [smem:[#allocation31_spill]] }
  0xcd   : > { %s5566_s18 = scalar_lea.vmem %s6269_s7, %s4051_s19  ;;  %s5571_s6 = scalar_lea.vmem %s6270_s27, %s4600_s14 }
  0xce   : > { %p6275_p4 = scmp.ne.s32.totalorder %s5303_s25, 0 }
  0xcf   : > { %s765_s11 = scalar_lea.vmem %s6271_s15, %s5549_s12  ;;  %s768_s1 = scalar_lea.vmem %s6272_s8, %s5549_s12 }
  0xd0   : > { %779 = sbr.rel (%p6275_p4) target bundleno = 217 (0xd9), region = 108  ;;  %s6276_s17 = sld [smem:[#allocation21_spill]] (!%p6275_p4) }
  0xd1   : > { %s774_s7 = scalar_lea.vmem %s6274_s26, %s5549_s12 }
  0xd2   : > { %s771_s13 = scalar_lea.vmem %s6273_s2, %s5549_s12 }
  0xd6   : > { %v780_v0 = vld [vmem:[%s6276_s17] sm:$0xff] (!%p6275_p4)  ;;  %v781_v1 = vld [vmem:[%s6276_s17 + $0x8] sm:$0xff] (!%p6275_p4)  ;;  %v782_v2 = vld [vmem:[%s6276_s17 + $0x10] sm:$0xff] (!%p6275_p4) }
  0xd7   : > { %784 = vst [vmem:[#allocation2] sm:$0xff] %v780_v0  ;;  %785 = vst [vmem:[#allocation2 + $0x8] sm:$0xff] %v781_v1  ;;  %v783_v3 = vld [vmem:[%s6276_s17 + $0x18] sm:$0xff] }
  0xd8   : > { %786 = vst [vmem:[#allocation2 + $0x10] sm:$0xff] %v782_v2  ;;  %787 = vst [vmem:[#allocation2 + $0x18] sm:$0xff] %v783_v3 }
  0xd9 PF: > { %v4723_v4 = vld [vmem:[%s5561_s21 + $0x4] ss:$12 sps:$4 sm:$0xff]   ;;  %v4725_v5 = vld [vmem:[%s5561_s21] ss:$12 sps:$4 sm:$0xff]   ;;  %v5191_v6 = vmov 0   ;;  %v828_v27 = vlaneseq  ;;  %vm1083_vm0 = vcmask 261120   ;;  %s6278_s8 = scalar_lea.vmem %s6202_s5, %s5549_s12 }
  0xda   : > { %1003 = vmatprep.mubr.bf16.mxu0 %v5191_v6  ;;  %971 = vmatprep.subr.bf16.mxu0 %v4723_v4  ;;  %v4726_v7 = vld [vmem:[%s5561_s21 + $0x1c] ss:$12 sps:$4 sm:$0xff]   ;;  %v4728_v8 = vld [vmem:[%s5561_s21 + $0x18] ss:$12 sps:$4 sm:$0xff]   ;;  %v4729_v9 = vld [vmem:[%s5561_s21 + $0x34] ss:$12 sps:$4 sm:$0xff]  }
  0xdb   : > { %972 = vmatpush1.bf16.msra.mxu0 %v4725_v5  ;;  %v4731_v10 = vld [vmem:[%s5561_s21 + $0x30] ss:$12 sps:$4 sm:$0xff]   ;;  %v4732_v11 = vld [vmem:[%s5561_s21 + $0x4c] ss:$12 sps:$4 sm:$0xff]   ;;  %v4734_v13 = vld [vmem:[%s5561_s21 + $0x48] ss:$12 sps:$4 sm:$0xff]  }
  0xdc   : > { %973 = vmatprep.subr.bf16.mxu0 %v4726_v7  ;;  %v4735_v15 = vld [vmem:[%s5561_s21 + $0x64] ss:$12 sps:$4 sm:$0xff]   ;;  %v4737_v17 = vld [vmem:[%s5561_s21 + $0x60] ss:$12 sps:$4 sm:$0xff]   ;;  %v4738_v18 = vld [vmem:[%s5561_s21 + $0x7c] ss:$12 sps:$4 sm:$0xff]  }
  0xdd   : > { %v4740_v19 = vld [vmem:[%s5561_s21 + $0x78] ss:$12 sps:$4 sm:$0xff]   ;;  %v4741_v20 = vld [vmem:[%s5561_s21 + $0x94] ss:$12 sps:$4 sm:$0xff]   ;;  %v4743_v21 = vld [vmem:[%s5561_s21 + $0x90] ss:$12 sps:$4 sm:$0xff]  }
  0xde   : > { %v4744_v22 = vld [vmem:[%s5561_s21 + $0xac] ss:$12 sps:$4 sm:$0xff]   ;;  %v4746_v23 = vld [vmem:[%s5561_s21 + $0xa8] ss:$12 sps:$4 sm:$0xff]   ;;  %v5625_v28 = vshrl.u32 %v828_v27, 7  ;;  %s6277_s15 = sld [smem:[#allocation22_spill]] }
  0xdf   : > { %974 = vmatpush1.bf16.msra.mxu0 %v4728_v8  ;;  %v5619_v24 = vld [vmem:[#allocation2 + $0x10] sm:$0xff]  ;;  %v5621_v25 = vld [vmem:[#allocation2 + $0x18] sm:$0xff]  ;;  %v5629_v30 = vld [vmem:[%s5571_s6] sm:$0x7]  ;;  %s5192_s14 = smov 96   ;;  %s5193_s23 = smov 64  }
  0xe0   : > { %975 = vmatprep.subr.bf16.mxu0 %v4729_v9  ;;  %v788_v12 = vld [vmem:[#allocation2] sm:$0xff]  ;;  %v789_v14 = vld [vmem:[#allocation2 + $0x8] sm:$0xff]  ;;  %v793_v26 = vpack.c.bf16 %v5621_v25, %v5619_v24  ;;  %v830_v29 = vsub.s32 0, %v5625_v28  ;;  %v834_v31 = vsub.s32 1, %v5625_v28  ;;  %v4750_v59 = vld [vmem:[%s5561_s21 + $0x50] ss:$12 sps:$4 sm:$0xff]  }
  0xe1   : > { %v792_v16 = vpack.c.bf16 %v789_v14, %v788_v12  ;;  %v4747_v56 = vld [vmem:[%s5561_s21 + $0x8] ss:$12 sps:$4 sm:$0xff]   ;;  %v4748_v57 = vld [vmem:[%s5561_s21 + $0x20] ss:$12 sps:$4 sm:$0xff]   ;;  %v4749_v58 = vld [vmem:[%s5561_s21 + $0x38] ss:$12 sps:$4 sm:$0xff]  }
  0xe2   : > { %v831_v32 = vrot.slane %v5629_v30, %v830_v29  ;;  %v835_v34 = vrot.slane %v5629_v30, %v834_v31  ;;  %4443 = vmatprep.subr.bf16.mxu1 %v4747_v56  ;;  %v4751_v60 = vld [vmem:[%s5561_s21 + $0x68] ss:$12 sps:$4 sm:$0xff]   ;;  %v4752_v61 = vld [vmem:[%s5561_s21 + $0x80] ss:$12 sps:$4 sm:$0xff]   ;;  %v4753_v62 = vld [vmem:[%s5561_s21 + $0x98] ss:$12 sps:$4 sm:$0xff]  }
  0xe3   : > { %976 = vmatpush1.bf16.msra.mxu0 %v4731_v10  ;;  %4459 = vmatprep.mubr.bf16.mxu1 %v792_v16  ;;  %v4754_v63 = vld [vmem:[%s5561_s21 + $0xb0] ss:$12 sps:$4 sm:$0xff]   ;;  %s5194_s27 = smov 32  }
  0xe4   : > { %977 = vmatprep.subr.bf16.mxu0 %v4732_v11  ;;  %4444 = vmatpush3.bf16.msra.mxu1 %v4747_v56  ;;  %v5669_v0 = vld [vmem:[%s6277_s15 + $0x10] sm:$0xff]  ;;  %v5674_v1 = vld [vmem:[%s6277_s15] sm:$0xff]  ;;  %v5679_v3 = vld [vmem:[%s6277_s15 + $0x18] sm:$0xff] }
  0xe5   : > { %4445 = vmatprep.subr.bf16.mxu1 %v4748_v57 }
  0xe7   : > { %978 = vmatpush1.bf16.msra.mxu0 %v4734_v13 }
  0xe8   : > { %979 = vmatprep.subr.bf16.mxu0 %v4735_v15  ;;  %4446 = vmatpush3.bf16.msra.mxu1 %v4748_v57 }
  0xe9   : > { %4447 = vmatprep.subr.bf16.mxu1 %v4749_v58 }
  0xeb   : > { %980 = vmatpush1.bf16.msra.mxu0 %v4737_v17 }
  0xec   : > { %981 = vmatprep.subr.bf16.mxu0 %v4738_v18  ;;  %4448 = vmatpush3.bf16.msra.mxu1 %v4749_v58 }
  0xed   : > { %4449 = vmatprep.subr.bf16.mxu1 %v4750_v59 }
  0xef   : > { %982 = vmatpush1.bf16.msra.mxu0 %v4740_v19 }
  0xf0   : > { %983 = vmatprep.subr.bf16.mxu0 %v4741_v20  ;;  %4450 = vmatpush3.bf16.msra.mxu1 %v4750_v59 }
  0xf1   : > { %4451 = vmatprep.subr.bf16.mxu1 %v4751_v60 }
  0xf3   : > { %984 = vmatpush1.bf16.msra.mxu0 %v4743_v21 }
  0xf4   : > { %985 = vmatprep.subr.bf16.mxu0 %v4744_v22  ;;  %4452 = vmatpush3.bf16.msra.mxu1 %v4751_v60 }
  0xf5   : > { %4453 = vmatprep.subr.bf16.mxu1 %v4752_v61 }
  0xf7   : > { %986 = vmatpush1.bf16.msra.mxu0 %v4746_v23 }
  0xf8   : > { %4454 = vmatpush3.bf16.msra.mxu1 %v4752_v61 }
  0xf9   : > { %4455 = vmatprep.subr.bf16.mxu1 %v4753_v62 }
  0xfa   : > { %1004 = vmatmul.mubr.bf16.vlgmr.msra.gmra.mrb[0].mxu0 %v792_v16  ;;  %v838_v16 = vsub.s32 2, %v5625_v28 }
  0xfb   : > { %1013 = vmatprep.mubr.bf16.mxu0 %v5191_v6  ;;  %v5685_v6 = vld [vmem:[%s6277_s15 + $0x8] sm:$0xff] }
  0xfc   : > { %4456 = vmatpush3.bf16.msra.mxu1 %v4753_v62  ;;  %v839_v17 = vrot.slane %v5629_v30, %v838_v16 }
  0xfd   : > { %4457 = vmatprep.subr.bf16.mxu1 %v4754_v63 }
 0x100   : > { %4458 = vmatpush3.bf16.msra.mxu1 %v4754_v63 }
 0x102   : > { %1014 = vmatmul.mubr.bf16.gmra.mrb[4].mxu0 %v793_v26 }
 0x103   : > { %4460 = vmatmul.mubr.bf16.vlgmr.msra.gmra.mrb[0].mxu1 %v793_v26 }
 0x1cd   : > { %v1005_v33 = vpop.f32.mrb[0].mxu0 }
 0x1ce   : > { %v1007_v35 = vpop.f32.mrb[1].mxu0  ;;  %v1006_v37 = vadd.f32 %v1005_v33, %v831_v32 }
 0x1cf   : > { %v1009_v36 = vpop.f32.mrb[2].mxu0  ;;  %v1008_v40 = vadd.f32 %v1007_v35, %v835_v34 }
 0x1d0   : > { %v1010_v38 = vadd.f32 %v1009_v36, %v831_v32  ;;  %v1011_v39 = vpop.f32.mrb[3].mxu0 }
 0x1d1   : > { %v1012_v41 = vadd.f32 %v1011_v39, %v835_v34 }
 0x1d2   : > { %v5638_v42 = vpack.c.bf16 %v1010_v38, %v1006_v37 }
 0x1d3   : > { %v5640_v43 = vpack.c.bf16 %v1012_v41, %v1008_v40 }
 0x1d4   : > { %4467 = vmatprep.mubr.msk.bf16.mxu0 %vm1083_vm0, %v5638_v42 }
 0x1d5   : > { %v1015_v44 = vpop.f32.mrb[4].mxu0  ;;  %4591 = vmatprep.subr.msk.bf16.mxu0 %vm1083_vm0, %v5640_v43  ;;  %v1091_v45 = vsel %vm1083_vm0, %v5640_v43, 0 }
 0x1d6   : > { %v1017_v46 = vpop.f32.mrb[5].mxu0  ;;  %4464 = vmatpush3.bf16.xpose.msra.mxu0 %v1091_v45  ;;  %v1016_v48 = vadd.f32 %v1015_v44, %v831_v32  ;;  %v4461_v18 = vpop.f32.mrb[0].mxu1 }
 0x1d7   : > { %v1019_v47 = vpop.f32.mrb[6].mxu0  ;;  %v1018_v51 = vadd.f32 %v1017_v46, %v835_v34  ;;  %v1067_v19 = vadd.f32 %v4461_v18, %v839_v17  ;;  %v1058_v20 = vpop.f32.mrb[1].mxu1 }
 0x1d8   : > { %v1020_v49 = vadd.f32 %v1019_v47, %v831_v32  ;;  %v1021_v50 = vpop.f32.mrb[7].mxu0  ;;  %v1059_v21 = vadd.f32 %v1058_v20, %v839_v17  ;;  %v4462_v22 = vpop.f32.mrb[2].mxu1 }
 0x1d9   : > { %v1022_v52 = vadd.f32 %v1021_v50, %v835_v34  ;;  %v1070_v23 = vadd.f32 %v4462_v22, %v839_v17  ;;  %v1061_v26 = vpop.f32.mrb[3].mxu1 }
 0x1da   : > { %v5648_v53 = vpack.c.bf16 %v1020_v49, %v1016_v48  ;;  %v1062_v27 = vadd.f32 %v1061_v26, %v839_v17 }
 0x1db   : > { %v5650_v54 = vpack.c.bf16 %v1022_v52, %v1018_v51  ;;  %v5698_v32 = vpack.c.bf16 %v1070_v23, %v1067_v19 }
 0x1dc   : > { %v5700_v33 = vpack.c.bf16 %v1062_v27, %v1059_v21 }
 0x1dd   : > { %4592 = vmatprep.subr.msk.bf16.mxu0 %vm1083_vm0, %v5650_v54  ;;  %v1094_v55 = vsel %vm1083_vm0, %v5650_v54, 0 }
 0x1de   : > { %4466 = vmatpush3.bf16.xpose.msra.mxu0 %v1094_v55  ;;  %4471 = vmatprep.subr.bf16.mxu1 %v5700_v33 }
 0x1df   : > { %4472 = vmatpush3.bf16.msra.mxu1 %v5700_v33 }
 0x1e0   : > { %4473 = vmatprep.subr.bf16.mxu1 %v5698_v32 }
 0x1e3   : > { %4474 = vmatpush3.bf16.msra.mxu1 %v5698_v32 }
 0x1e5   : > { %4468 = vmatmul.mubr.msk.bf16.vlgmr.msra.gmra.mrb[8].mxu0 %vm1083_vm0, %v5648_v53 }
 0x2b8   : > { %v4469_v2 = vpop.f32.mrb[8].mxu0 }
 0x2b9   : > { %v1139_v4 = vadd.f32 %v4469_v2, %v5669_v0  ;;  %v1130_v5 = vpop.f32.mrb[9].mxu0 }
 0x2ba   : > { %v1131_v7 = vadd.f32 %v1130_v5, %v5674_v1  ;;  %v4470_v8 = vpop.f32.mrb[10].mxu0 }
 0x2bb   : > { %v1142_v9 = vadd.f32 %v4470_v8, %v5679_v3  ;;  %v1133_v10 = vpop.f32.mrb[11].mxu0  ;;  %v1151_v11 = vsel %vm1083_vm0, %v1139_v4, -inf }
 0x2bc   : > { %v1134_v12 = vadd.f32 %v1133_v10, %v5685_v6  ;;  %1152 = vmax.xlane.f32.xlu1 %v1151_v11  ;;  %v1145_v13 = vsel %vm1083_vm0, %v1131_v7, -inf }
 0x2bd   : > { %1146 = vmax.xlane.f32.xlu0 %v1145_v13  ;;  %v1154_v14 = vsel %vm1083_vm0, %v1142_v9, -inf }
 0x2be   : > { %v1148_v15 = vsel %vm1083_vm0, %v1134_v12, -inf }
 0x2c0   : > { %1155 = vmax.xlane.f32.xlu1 %v1154_v14 }
 0x2c1   : > { %1149 = vmax.xlane.f32.xlu0 %v1148_v15 }
 0x349   : > { %v1153_v30 = vpop.xlane.xlu1 %1152 }
 0x34a   : > { %v1159_v34 = vsub.f32 %v1139_v4, %v1153_v30  ;;  %v1147_v35 = vpop.xlane.xlu0 %1146 }
 0x34b   : > { %v1157_v36 = vsub.f32 %v1131_v7, %v1147_v35 }
 0x34c   : > { %v1165_v37 = vmul.f32 1.442695, %v1159_v34 }
 0x34d   : > { %v1161_v38 = vmul.f32 1.442695, %v1157_v36  ;;  %v1156_v39 = vpop.xlane.xlu1 %1155 }
 0x34e   : > { %4763 = vpow2.f32 %v1165_v37  ;;  %v1160_v40 = vsub.f32 %v1142_v9, %v1156_v39  ;;  %v1150_v41 = vpop.xlane.xlu0 %1149 }
 0x34f   : > { %v1158_v44 = vsub.f32 %v1134_v12, %v1150_v41  ;;  %4765 = vpow2.f32 %v1161_v38 }
 0x350   : > { %v1167_v45 = vmul.f32 1.442695, %v1160_v40 }
 0x351   : > { %v1163_v46 = vmul.f32 1.442695, %v1158_v44 }
 0x353   : > { %4767 = vpow2.f32 %v1163_v46 }
 0x354   : > { %4769 = vpow2.f32 %v1167_v45 }
 0x358   : > { %v4764_v47 = vpop.eup %4763 }
 0x359   : > { %v1175_v48 = vsel %vm1083_vm0, %v4764_v47, 0.0  ;;  %v4766_v49 = vpop.eup %4765 }
 0x35a   : > { %1176 = vadd.xlane.f32.xlu0 %v1175_v48  ;;  %v1169_v51 = vsel %vm1083_vm0, %v4766_v49, 0.0 }
 0x35d   : > { %v4768_v50 = vpop.eup %4767 }
 0x35e   : > { %1170 = vadd.xlane.f32.xlu0 %v1169_v51  ;;  %v1172_v52 = vsel %vm1083_vm0, %v4768_v50, 0.0  ;;  %v4770_v55 = vpop.eup %4769 }
 0x35f   : > { %1173 = vadd.xlane.f32.xlu1 %v1172_v52  ;;  %v1178_v56 = vsel %vm1083_vm0, %v4770_v55, 0.0 }
 0x363   : > { %1179 = vadd.xlane.f32.xlu1 %v1178_v56 }
 0x374   : > { %1260 = vrot.lane.b32.xlu0 %v5640_v43, %s5192_s14  ;;  %1262 = vrot.lane.b32.xlu1 %v5650_v54, %s5192_s14 }
 0x378   : > { %1254 = vrot.lane.b32.xlu1 %v5638_v42, %s5192_s14 }
 0x37c   : > { %1256 = vrot.lane.b32.xlu1 %v5648_v53, %s5192_s14 }
 0x3e7   : > { %v1177_v57 = vpop.xlane.xlu0 %1176 }
 0x3eb   : > { %v1171_v58 = vpop.xlane.xlu0 %1170 }
 0x3ec   : > { %4771 = vrcp.f32 %v1171_v58  ;;  %v1174_v59 = vpop.xlane.xlu1 %1173 }
 0x3ed   : > { %4773 = vrcp.f32 %v1174_v59 }
 0x3ee   : > { %4775 = vrcp.f32 %v1177_v57 }
 0x3ef   : > { %v1261_v60 = vpop.permute.xlu0 %1260 }
 0x3f0   : > { %v1180_v61 = vpop.xlane.xlu1 %1179  ;;  %4593 = vmatprep.subr.msk.bf16.mxu1 %vm1083_vm0, %v1261_v60  ;;  %v1271_v13 = vsel %vm1083_vm0, %v1261_v60, 0 }
 0x3f1   : > { %4777 = vrcp.f32 %v1180_v61 }
 0x3f4   : > { %v1263_v7 = vpop.permute.xlu1 %1262 }
 0x3f5   : > { %v1274_v15 = vsel %vm1083_vm0, %v1263_v7, 0 }
 0x3f6   : > { %v4772_v62 = vpop.eup %4771 }
 0x3f7   : > { %v4774_v63 = vpop.eup %4773  ;;  %v1185_v2 = vmul.f32 %v4772_v62, %v4766_v49 }
 0x3f8   : > { %v1186_v4 = vmul.f32 %v4774_v63, %v4768_v50  ;;  %v4776_v5 = vpop.eup %4775  ;;  %v1255_v14 = vpop.permute.xlu1 %1254 }
 0x3f9   : > { %v1187_v10 = vmul.f32 %v4776_v5, %v4764_v47 }
 0x3fa   : > { %v1189_v8 = vpack.c.bf16 %v1186_v4, %v1185_v2 }
 0x3fb   : > { %v4778_v9 = vpop.eup %4777 }
 0x3fc   : > { %v1188_v11 = vmul.f32 %v4778_v9, %v4770_v55  ;;  %4475 = vmatprep.mubr.msk.bf16.mxu1 %vm1083_vm0, %v1189_v8  ;;  %v1257_v17 = vpop.permute.xlu1 %1256 }
 0x3fe   : > { %v1190_v12 = vpack.c.bf16 %v1188_v11, %v1187_v10 }
 0x400   : > { %4476 = vmatmul.mubr.msk.bf16.vlgmr.msra.gmra.mrb[4].mxu1 %vm1083_vm0, %v1190_v12 }
 0x401   : > { %4480 = vmatpush3.bf16.xpose.msra.mxu1 %v1271_v13  ;;  %4483 = vmatprep.mubr.msk.bf16.mxu1 %vm1083_vm0, %v1255_v14 }
 0x402   : > { %4594 = vmatprep.subr.msk.bf16.mxu1 %vm1083_vm0, %v1263_v7  ;;  %v4755_v7 = vld [vmem:[%s5522_s30 + $0x10] sm:$0xff]  }
 0x403   : > { %4495 = vmatprep.subr.bf16.mxu0 %v4755_v7 }
 0x404   : > { %4496 = vmatpush3.bf16.msra.mxu0 %v4755_v7 }
 0x409   : > { %4482 = vmatpush3.bf16.xpose.msra.mxu1 %v1274_v15 }
 0x410   : > { %4484 = vmatmul.mubr.msk.bf16.vlgmr.msra.gmra.mrb[8].mxu1 %vm1083_vm0, %v1257_v17 }
 0x4d3   : > { %v5726_v18 = vpop.f32.mrb[4].mxu1 }
 0x4d4   : > { %v5728_v19 = vpop.f32.mrb[5].mxu1 }
 0x4d5   : > { %v5730_v20 = vpop.f32.mrb[6].mxu1 }
 0x4d6   : > { %v1247_v21 = vpack.c.bf16 %v5730_v20, %v5726_v18  ;;  %v5734_v22 = vpop.f32.mrb[7].mxu1 }
 0x4d7   : > { %v1246_v23 = vpack.c.bf16 %v5734_v22, %v5728_v19 }
 0x4e3   : > { %v4485_v26 = vpop.f32.mrb[8].mxu1 }
 0x4e4   : > { %v1310_v27 = vpop.f32.mrb[9].mxu1  ;;  %v1319_v36 = vadd.f32 %v4485_v26, %v5669_v0 }
 0x4e5   : > { %v1311_v30 = vadd.f32 %v1310_v27, %v5674_v1  ;;  %v4486_v34 = vpop.f32.mrb[10].mxu1 }
 0x4e6   : > { %v1313_v35 = vpop.f32.mrb[11].mxu1  ;;  %v1322_v40 = vadd.f32 %v4486_v34, %v5679_v3  ;;  %v1331_v41 = vsel %vm1083_vm0, %v1319_v36, -inf }
 0x4e7   : > { %v1314_v37 = vadd.f32 %v1313_v35, %v5685_v6  ;;  %v1325_v38 = vsel %vm1083_vm0, %v1311_v30, -inf }
 0x4e8   : > { %1326 = vmax.xlane.f32.xlu0 %v1325_v38  ;;  %v1334_v44 = vsel %vm1083_vm0, %v1322_v40, -inf }
 0x4e9   : > { %v1328_v39 = vsel %vm1083_vm0, %v1314_v37, -inf }
 0x4ea   : > { %1329 = vmax.xlane.f32.xlu1 %v1328_v39 }
 0x4ec   : > { %1332 = vmax.xlane.f32.xlu0 %v1331_v41 }
 0x4f0   : > { %1335 = vmax.xlane.f32.xlu0 %v1334_v44 }
 0x4fb   : > { %1375 = vrot.lane.b32.xlu1 %v5698_v32, %s5192_s14 }
 0x575   : > { %v1327_v45 = vpop.xlane.xlu0 %1326 }
 0x576   : > { %v1337_v46 = vsub.f32 %v1311_v30, %v1327_v45 }
 0x577   : > { %v1330_v47 = vpop.xlane.xlu1 %1329 }
 0x578   : > { %v1341_v50 = vmul.f32 1.442695, %v1337_v46  ;;  %v1338_v51 = vsub.f32 %v1314_v37, %v1330_v47 }
 0x579   : > { %v1333_v48 = vpop.xlane.xlu0 %1332 }
 0x57a   : > { %v1339_v49 = vsub.f32 %v1319_v36, %v1333_v48  ;;  %v1343_v57 = vmul.f32 1.442695, %v1338_v51  ;;  %v4756_v48 = vld [vmem:[%s5522_s30 + $0x18] sm:$0xff]  }
 0x57b   : > { %v1376_v8 = vpop.permute.xlu1 %1375  ;;  %4497 = vmatprep.subr.bf16.mxu0 %v4756_v48 }
 0x57c   : > { %v1345_v52 = vmul.f32 1.442695, %v1339_v49  ;;  %4498 = vmatpush3.bf16.msra.mxu0 %v4756_v48  ;;  %v4757_v49 = vld [vmem:[%s5522_s30] sm:$0xff]  }
 0x57d   : > { %v1336_v55 = vpop.xlane.xlu0 %1335  ;;  %4503 = vmatprep.subr.bf16.mxu0 %v4757_v49 }
 0x57e   : > { %4779 = vpow2.f32 %v1345_v52  ;;  %v1340_v56 = vsub.f32 %v1322_v40, %v1336_v55 }
 0x57f   : > { %4781 = vpow2.f32 %v1341_v50 }
 0x580   : > { %v1347_v58 = vmul.f32 1.442695, %v1340_v56 }
 0x582   : > { %4783 = vpow2.f32 %v1347_v58  ;;  %v4758_v58 = vld [vmem:[%s5522_s30 + $0x8] sm:$0xff]  }
 0x583   : > { %4785 = vpow2.f32 %v1343_v57 }
 0x588   : > { %v4780_v59 = vpop.eup %4779 }
 0x589   : > { %v1355_v60 = vsel %vm1083_vm0, %v4780_v59, 0.0  ;;  %v4782_v61 = vpop.eup %4781 }
 0x58a   : > { %1356 = vadd.xlane.f32.xlu0 %v1355_v60  ;;  %v1349_v63 = vsel %vm1083_vm0, %v4782_v61, 0.0 }
 0x58c   : > { %v4784_v62 = vpop.eup %4783 }
 0x58d   : > { %v1358_v2 = vsel %vm1083_vm0, %v4784_v62, 0.0  ;;  %v4786_v4 = vpop.eup %4785 }
 0x58e   : > { %1350 = vadd.xlane.f32.xlu0 %v1349_v63  ;;  %1359 = vadd.xlane.f32.xlu1 %v1358_v2  ;;  %v1352_v5 = vsel %vm1083_vm0, %v4786_v4, 0.0 }
 0x592   : > { %1353 = vadd.xlane.f32.xlu1 %v1352_v5 }
 0x5a3   : > { %1578 = vrot.lane.b32.xlu1 %v5640_v43, %s5193_s23 }
 0x5a4   : > { %1373 = vrot.lane.b32.xlu0 %v5700_v33, %s5192_s14 }
 0x5a7   : > { %1580 = vrot.lane.b32.xlu1 %v5650_v54, %s5193_s23 }
 0x5a8   : > { %1574 = vrot.lane.b32.xlu0 %v5638_v42, %s5193_s23 }
 0x5ab   : > { %1576 = vrot.lane.b32.xlu1 %v5648_v53, %s5193_s23 }
 0x5ac   : > { %1831 = vrot.lane.b32.xlu0 %v5640_v43, %s5194_s27 }
 0x5af   : > { %1833 = vrot.lane.b32.xlu1 %v5650_v54, %s5194_s27 }
 0x5b0   : > { %1827 = vrot.lane.b32.xlu0 %v5638_v42, %s5194_s27 }
 0x5b3   : > { %1829 = vrot.lane.b32.xlu1 %v5648_v53, %s5194_s27 }
 0x617   : > { %v1357_v9 = vpop.xlane.xlu0 %1356 }
 0x61b   : > { %v1360_v10 = vpop.xlane.xlu1 %1359  ;;  %v1351_v11 = vpop.xlane.xlu0 %1350 }
 0x61c   : > { %4787 = vrcp.f32 %v1360_v10 }
 0x61d   : > { %4789 = vrcp.f32 %v1351_v11 }
 0x61e   : > { %4791 = vrcp.f32 %v1357_v9 }
 0x61f   : > { %v1354_v43 = vpop.xlane.xlu1 %1353  ;;  %v1374_v12 = vpop.permute.xlu0 %1373 }
 0x620   : > { %4793 = vrcp.f32 %v1354_v43  ;;  %4487 = vmatprep.subr.bf16.mxu1 %v1374_v12 }
 0x621   : > { %4488 = vmatpush3.bf16.msra.mxu1 %v1374_v12 }
 0x622   : > { %4489 = vmatprep.subr.bf16.mxu1 %v1376_v8 }
 0x623   : > { %v1579_v42 = vpop.permute.xlu1 %1578  ;;  %v1575_v36 = vpop.permute.xlu0 %1574 }
 0x624   : > { %v1589_v35 = vsel %vm1083_vm0, %v1579_v42, 0 }
 0x625   : > { %4490 = vmatpush3.bf16.msra.mxu1 %v1376_v8 }
 0x626   : > { %4595 = vmatprep.subr.msk.bf16.mxu1 %vm1083_vm0, %v1579_v42  ;;  %v4788_v53 = vpop.eup %4787 }
 0x627   : > { %v4790_v54 = vpop.eup %4789  ;;  %v1368_v15 = vmul.f32 %v4788_v53, %v4784_v62  ;;  %v1581_v37 = vpop.permute.xlu1 %1580 }
 0x628   : > { %v4792_v13 = vpop.eup %4791  ;;  %v1365_v17 = vmul.f32 %v4790_v54, %v4782_v61  ;;  %v1592_v38 = vsel %vm1083_vm0, %v1581_v37, 0  ;;  %v1832_v39 = vpop.permute.xlu0 %1831 }
 0x629   : > { %v1367_v27 = vmul.f32 %v4792_v13, %v4780_v59  ;;  %v1842_v41 = vsel %vm1083_vm0, %v1832_v39, 0 }
 0x62a   : > { %v4794_v14 = vpop.eup %4793 }
 0x62b   : > { %v1366_v26 = vmul.f32 %v4794_v14, %v4786_v4  ;;  %v1370_v34 = vpack.c.bf16 %v1368_v15, %v1367_v27  ;;  %v1577_v40 = vpop.permute.xlu1 %1576 }
 0x62c   : > { %v1828_v44 = vpop.permute.xlu0 %1827 }
 0x62d   : > { %v1369_v30 = vpack.c.bf16 %v1366_v26, %v1365_v17 }
 0x62f   : > { %4491 = vmatprep.mubr.msk.bf16.mxu1 %vm1083_vm0, %v1369_v30  ;;  %v1834_v45 = vpop.permute.xlu1 %1833 }
 0x630   : > { %4492 = vmatmul.mubr.msk.bf16.vlgmr.msra.gmra.mrb[12].mxu1 %vm1083_vm0, %v1370_v34  ;;  %v1845_v46 = vsel %vm1083_vm0, %v1834_v45, 0 }
 0x631   : > { %4512 = vmatpush3.bf16.xpose.msra.mxu1 %v1589_v35  ;;  %4515 = vmatprep.mubr.msk.bf16.mxu1 %vm1083_vm0, %v1575_v36 }
 0x632   : > { %4596 = vmatprep.subr.msk.bf16.mxu1 %vm1083_vm0, %v1581_v37 }
 0x633   : > { %v1830_v47 = vpop.permute.xlu1 %1829 }
 0x639   : > { %4514 = vmatpush3.bf16.xpose.msra.mxu1 %v1592_v38 }
 0x63a   : > { %4597 = vmatprep.subr.msk.bf16.mxu1 %vm1083_vm0, %v1832_v39 }
 0x640   : > { %4516 = vmatmul.mubr.msk.bf16.vlgmr.msra.gmra.mrb[16].mxu1 %vm1083_vm0, %v1577_v40 }
 0x641   : > { %4536 = vmatpush3.bf16.xpose.msra.mxu1 %v1842_v41  ;;  %4539 = vmatprep.mubr.msk.bf16.mxu1 %vm1083_vm0, %v1828_v44 }
 0x642   : > { %4598 = vmatprep.subr.msk.bf16.mxu1 %vm1083_vm0, %v1834_v45 }
 0x649   : > { %4538 = vmatpush3.bf16.xpose.msra.mxu1 %v1845_v46 }
 0x650   : > { %4540 = vmatmul.mubr.msk.bf16.vlgmr.msra.gmra.mrb[20].mxu1 %vm1083_vm0, %v1830_v47 }
 0x703   : > { %v4493_v50 = vpop.f32.mrb[12].mxu1 }
 0x704   : > { %v1419_v51 = vpop.f32.mrb[13].mxu1 }
 0x705   : > { %v4494_v52 = vpop.f32.mrb[14].mxu1 }
 0x706   : > { %v1435_v55 = vpack.c.bf16 %v4494_v52, %v4493_v50  ;;  %v1422_v56 = vpop.f32.mrb[15].mxu1 }
 0x707   : > { %v1434_v57 = vpack.c.bf16 %v1422_v56, %v1419_v51 }
 0x709   : > { %4499 = vmatprep.mubr.msk.bf16.mxu0 %vm1083_vm0, %v1434_v57 }
 0x70a   : > { %4500 = vmatmul.mubr.msk.bf16.vlgmr.msra.gmra.mrb[12].mxu0 %vm1083_vm0, %v1435_v55 }
 0x70b   : > { %4507 = vmatprep.mubr.msk.bf16.mxu0 %vm1083_vm0, %v1246_v23  ;;  %4504 = vmatpush3.bf16.msra.mxu0 %v4757_v49 }
 0x70c   : > { %4505 = vmatprep.subr.bf16.mxu0 %v4758_v58 }
 0x70f   : > { %4506 = vmatpush3.bf16.msra.mxu0 %v4758_v58 }
 0x713   : > { %v4517_v59 = vpop.f32.mrb[16].mxu1 }
 0x714   : > { %v1628_v60 = vpop.f32.mrb[17].mxu1  ;;  %v1637_v2 = vadd.f32 %v4517_v59, %v5669_v0 }
 0x715   : > { %v1629_v61 = vadd.f32 %v1628_v60, %v5674_v1  ;;  %v4518_v62 = vpop.f32.mrb[18].mxu1 }
 0x716   : > { %v1631_v63 = vpop.f32.mrb[19].mxu1  ;;  %4508 = vmatmul.mubr.msk.bf16.vlgmr.msra.gmra.mrb[12].mxu0 %vm1083_vm0, %v1247_v21  ;;  %v1640_v4 = vadd.f32 %v4518_v62, %v5679_v3  ;;  %v1649_v5 = vsel %vm1083_vm0, %v1637_v2, -inf }
 0x717   : > { %v1632_v19 = vadd.f32 %v1631_v63, %v5685_v6  ;;  %v1643_v22 = vsel %vm1083_vm0, %v1629_v61, -inf }
 0x718   : > { %1644 = vmax.xlane.f32.xlu0 %v1643_v22  ;;  %v1652_v7 = vsel %vm1083_vm0, %v1640_v4, -inf }
 0x719   : > { %v1646_v23 = vsel %vm1083_vm0, %v1632_v19, -inf }
 0x71a   : > { %1647 = vmax.xlane.f32.xlu1 %v1646_v23 }
 0x71c   : > { %1650 = vmax.xlane.f32.xlu0 %v1649_v5 }
 0x720   : > { %1653 = vmax.xlane.f32.xlu0 %v1652_v7 }
 0x723   : > { %v4541_v18 = vpop.f32.mrb[20].mxu1 }
 0x724   : > { %v1881_v20 = vpop.f32.mrb[21].mxu1  ;;  %v1890_v40 = vadd.f32 %v4541_v18, %v5669_v0 }
 0x725   : > { %v4542_v21 = vpop.f32.mrb[22].mxu1  ;;  %v1882_v41 = vadd.f32 %v1881_v20, %v5674_v1 }
 0x726   : > { %v1884_v8 = vpop.f32.mrb[23].mxu1  ;;  %v1893_v45 = vadd.f32 %v4542_v21, %v5679_v3  ;;  %v1902_v46 = vsel %vm1083_vm0, %v1890_v40, -inf }
 0x727   : > { %v1885_v39 = vadd.f32 %v1884_v8, %v5685_v6  ;;  %v1896_v47 = vsel %vm1083_vm0, %v1882_v41, -inf }
 0x728   : > { %v1905_v48 = vsel %vm1083_vm0, %v1893_v45, -inf }
 0x729   : > { %v1899_v44 = vsel %vm1083_vm0, %v1885_v39, -inf }
 0x7a5   : > { %v1645_v9 = vpop.xlane.xlu0 %1644 }
 0x7a6   : > { %v1655_v10 = vsub.f32 %v1629_v61, %v1645_v9 }
 0x7a7   : > { %v1648_v11 = vpop.xlane.xlu1 %1647 }
 0x7a8   : > { %v1659_v42 = vmul.f32 1.442695, %v1655_v10  ;;  %v1656_v53 = vsub.f32 %v1632_v19, %v1648_v11 }
 0x7a9   : > { %v1651_v43 = vpop.xlane.xlu0 %1650 }
 0x7aa   : > { %v1657_v12 = vsub.f32 %v1637_v2, %v1651_v43  ;;  %v1661_v15 = vmul.f32 1.442695, %v1656_v53 }
 0x7ac   : > { %v1663_v54 = vmul.f32 1.442695, %v1657_v12 }
 0x7ad   : > { %v1654_v13 = vpop.xlane.xlu0 %1653 }
 0x7ae   : > { %4795 = vpow2.f32 %v1663_v54  ;;  %v1658_v14 = vsub.f32 %v1640_v4, %v1654_v13  ;;  %v4759_v13 = vld [vmem:[%s5522_s30 + $0x20] sm:$0xff]  }
 0x7af   : > { %4797 = vpow2.f32 %v1659_v42 }
 0x7b0   : > { %v1665_v17 = vmul.f32 1.442695, %v1658_v14  ;;  %v4760_v14 = vld [vmem:[%s5522_s30 + $0x28] sm:$0xff]  }
 0x7b2   : > { %4799 = vpow2.f32 %v1665_v17 }
 0x7b3   : > { %4801 = vpow2.f32 %v1661_v15 }
 0x7b8   : > { %v4796_v26 = vpop.eup %4795 }
 0x7b9   : > { %v1673_v27 = vsel %vm1083_vm0, %v4796_v26, 0.0  ;;  %v4798_v30 = vpop.eup %4797 }
 0x7ba   : > { %1674 = vadd.xlane.f32.xlu0 %v1673_v27  ;;  %v1667_v35 = vsel %vm1083_vm0, %v4798_v30, 0.0 }
 0x7bc   : > { %v4800_v34 = vpop.eup %4799 }
 0x7bd   : > { %v1676_v36 = vsel %vm1083_vm0, %v4800_v34, 0.0  ;;  %v4802_v37 = vpop.eup %4801 }
 0x7be   : > { %1668 = vadd.xlane.f32.xlu0 %v1667_v35  ;;  %1677 = vadd.xlane.f32.xlu1 %v1676_v36  ;;  %v1670_v38 = vsel %vm1083_vm0, %v4802_v37, 0.0 }
 0x7c2   : > { %1671 = vadd.xlane.f32.xlu1 %v1670_v38 }
 0x7d3   : > { %1691 = vrot.lane.b32.xlu1 %v5698_v32, %s5193_s23 }
 0x7d4   : > { %1689 = vrot.lane.b32.xlu0 %v5700_v33, %s5193_s23 }
 0x7f3   : > { %1900 = vmax.xlane.f32.xlu0 %v1899_v44 }
 0x7f7   : > { %1903 = vmax.xlane.f32.xlu0 %v1902_v46  ;;  %1897 = vmax.xlane.f32.xlu1 %v1896_v47 }
 0x7fb   : > { %1906 = vmax.xlane.f32.xlu1 %v1905_v48 }
 0x847   : > { %v1675_v49 = vpop.xlane.xlu0 %1674 }
 0x84b   : > { %v1678_v6 = vpop.xlane.xlu1 %1677  ;;  %v1669_v50 = vpop.xlane.xlu0 %1668 }
 0x84c   : > { %4803 = vrcp.f32 %v1678_v6 }
 0x84d   : > { %4805 = vrcp.f32 %v1669_v50 }
 0x84e   : > { %4807 = vrcp.f32 %v1675_v49  ;;  %v4761_v49 = vld [vmem:[%s5522_s30 + $0x30] sm:$0xff]  }
 0x84f   : > { %v1672_v0 = vpop.xlane.xlu1 %1671  ;;  %v1690_v1 = vpop.permute.xlu0 %1689 }
 0x850   : > { %4809 = vrcp.f32 %v1672_v0  ;;  %4519 = vmatprep.subr.bf16.mxu0 %v1690_v1  ;;  %v4762_v0 = vld [vmem:[%s5522_s30 + $0x38] sm:$0xff]  }
 0x851   : > { %4520 = vmatpush3.bf16.msra.mxu0 %v1690_v1 }
 0x853   : > { %v1692_v3 = vpop.permute.xlu1 %1691 }
 0x854   : > { %4521 = vmatprep.subr.bf16.mxu0 %v1692_v3 }
 0x855   : > { %4522 = vmatpush3.bf16.msra.mxu0 %v1692_v3 }
 0x856   : > { %v4804_v51 = vpop.eup %4803  ;;  %4527 = vmatprep.subr.bf16.mxu0 %v4759_v13 }
 0x857   : > { %v4806_v52 = vpop.eup %4805  ;;  %v1686_v57 = vmul.f32 %v4804_v51, %v4800_v34 }
 0x858   : > { %v4808_v55 = vpop.eup %4807  ;;  %v1683_v58 = vmul.f32 %v4806_v52, %v4798_v30 }
 0x859   : > { %v1685_v60 = vmul.f32 %v4808_v55, %v4796_v26 }
 0x85a   : > { %v4810_v56 = vpop.eup %4809 }
 0x85b   : > { %v1684_v59 = vmul.f32 %v4810_v56, %v4802_v37  ;;  %v1688_v62 = vpack.c.bf16 %v1686_v57, %v1685_v60  ;;  %v4109_v57 = vld [vmem:[%s6278_s8] ss:$0 sm:$0xff] }
 0x85d   : > { %v1687_v61 = vpack.c.bf16 %v1684_v59, %v1683_v58 }
 0x85f   : > { %4523 = vmatprep.mubr.msk.bf16.mxu0 %vm1083_vm0, %v1687_v61 }
 0x860   : > { %4524 = vmatmul.mubr.msk.bf16.vlgmr.msra.gmra.mrb[16].mxu0 %vm1083_vm0, %v1688_v62 }
 0x861   : > { %4528 = vmatpush3.bf16.msra.mxu0 %v4759_v13 }
 0x862   : > { %4529 = vmatprep.subr.bf16.mxu0 %v4760_v14 }
 0x865   : > { %4530 = vmatpush3.bf16.msra.mxu0 %v4760_v14 }
 0x880   : > { %v1901_v63 = vpop.xlane.xlu0 %1900 }
 0x881   : > { %v1909_v4 = vsub.f32 %v1885_v39, %v1901_v63 }
 0x883   : > { %v1914_v21 = vmul.f32 1.442695, %v1909_v4  ;;  %v4836_v4 = vld [vmem:[#allocation2 + $0x8] sm:$0xff] }
 0x884   : > { %v1898_v2 = vpop.xlane.xlu1 %1897  ;;  %v1904_v19 = vpop.xlane.xlu0 %1903 }
 0x885   : > { %v1908_v22 = vsub.f32 %v1882_v41, %v1898_v2  ;;  %v1910_v23 = vsub.f32 %v1890_v40, %v1904_v19  ;;  %v4835_v19 = vld [vmem:[#allocation2] sm:$0xff] }
 0x887   : > { %v1916_v5 = vmul.f32 1.442695, %v1910_v23  ;;  %v1912_v7 = vmul.f32 1.442695, %v1908_v22 }
 0x888   : > { %v1907_v18 = vpop.xlane.xlu1 %1906 }
 0x889   : > { %v1911_v20 = vsub.f32 %v1893_v45, %v1907_v18  ;;  %4811 = vpow2.f32 %v1916_v5 }
 0x88a   : > { %4813 = vpow2.f32 %v1912_v7 }
 0x88b   : > { %v1918_v8 = vmul.f32 1.442695, %v1911_v20 }
 0x88d   : > { %4815 = vpow2.f32 %v1918_v8 }
 0x88e   : > { %4817 = vpow2.f32 %v1914_v21 }
 0x893   : > { %v4812_v9 = vpop.eup %4811 }
 0x894   : > { %v1926_v10 = vsel %vm1083_vm0, %v4812_v9, 0.0  ;;  %v4814_v11 = vpop.eup %4813 }
 0x895   : > { %1927 = vadd.xlane.f32.xlu0 %v1926_v10  ;;  %v1920_v53 = vsel %vm1083_vm0, %v4814_v11, 0.0 }
 0x897   : > { %v4816_v43 = vpop.eup %4815 }
 0x898   : > { %v1929_v12 = vsel %vm1083_vm0, %v4816_v43, 0.0  ;;  %v4818_v42 = vpop.eup %4817 }
 0x899   : > { %1930 = vadd.xlane.f32.xlu1 %v1929_v12  ;;  %1921 = vadd.xlane.f32.xlu0 %v1920_v53  ;;  %v1923_v54 = vsel %vm1083_vm0, %v4818_v42, 0.0 }
 0x89d   : > { %1924 = vadd.xlane.f32.xlu1 %v1923_v54 }
 0x8ae   : > { %1944 = vrot.lane.b32.xlu1 %v5698_v32, %s5194_s27 }
 0x8af   : > { %1942 = vrot.lane.b32.xlu0 %v5700_v33, %s5194_s27 }
 0x922   : > { %v1928_v15 = vpop.xlane.xlu0 %1927 }
 0x926   : > { %v1931_v17 = vpop.xlane.xlu1 %1930  ;;  %v1922_v26 = vpop.xlane.xlu0 %1921 }
 0x927   : > { %4819 = vrcp.f32 %v1922_v26 }
 0x92a   : > { %v1925_v27 = vpop.xlane.xlu1 %1924  ;;  %v1943_v30 = vpop.permute.xlu0 %1942 }
 0x92b   : > { %4821 = vrcp.f32 %v1925_v27  ;;  %4543 = vmatprep.subr.bf16.mxu0 %v1943_v30 }
 0x92c   : > { %4823 = vrcp.f32 %v1931_v17 }
 0x92d   : > { %4825 = vrcp.f32 %v1928_v15 }
 0x92e   : > { %v1945_v47 = vpop.permute.xlu1 %1944 }
 0x931   : > { %v4820_v34 = vpop.eup %4819 }
 0x932   : > { %v1936_v40 = vmul.f32 %v4820_v34, %v4814_v11 }
 0x933   : > { %v4525_v35 = vpop.f32.mrb[16].mxu0 }
 0x934   : > { %v1735_v36 = vpop.f32.mrb[17].mxu0 }
 0x935   : > { %v4822_v37 = vpop.eup %4821  ;;  %v4526_v38 = vpop.f32.mrb[18].mxu0 }
 0x936   : > { %v1751_v32 = vpack.c.bf16 %v4526_v38, %v4525_v35  ;;  %v1738_v39 = vpop.f32.mrb[19].mxu0  ;;  %v1937_v33 = vmul.f32 %v4822_v37, %v4818_v42  ;;  %v4824_v45 = vpop.eup %4823 }
 0x937   : > { %v1750_v41 = vpack.c.bf16 %v1738_v39, %v1735_v36  ;;  %v4826_v46 = vpop.eup %4825  ;;  %v1939_v48 = vmul.f32 %v4824_v45, %v4816_v43 }
 0x938   : > { %v1940_v44 = vpack.c.bf16 %v1937_v33, %v1936_v40  ;;  %v1938_v6 = vmul.f32 %v4826_v46, %v4812_v9 }
 0x939   : > { %4531 = vmatprep.mubr.msk.bf16.mxu0 %vm1083_vm0, %v1750_v41  ;;  %v4110_v41 = vld [vmem:[%s768_s1] ss:$0 sm:$0xff] }
 0x93a   : > { %4532 = vmatmul.mubr.msk.bf16.vlgmr.msra.gmra.mrb[12].mxu0 %vm1083_vm0, %v1751_v32  ;;  %v1941_v50 = vpack.c.bf16 %v1939_v48, %v1938_v6  ;;  %v4111_v48 = vld [vmem:[%s771_s13] ss:$0 sm:$0xff]  ;;  %s5883_s13 = smov 0  }
 0x93b   : > { %4544 = vmatpush3.bf16.msra.mxu0 %v1943_v30  ;;  %4547 = vmatprep.mubr.msk.bf16.mxu0 %vm1083_vm0, %v1940_v44 }
 0x93c   : > { %4545 = vmatprep.subr.bf16.mxu0 %v1945_v47 }
 0x93f   : > { %4546 = vmatpush3.bf16.msra.mxu0 %v1945_v47 }
 0x940   : > { %4551 = vmatprep.subr.bf16.mxu0 %v4761_v49 }
 0x942   : > { %4548 = vmatmul.mubr.msk.bf16.vlgmr.msra.gmra.mrb[20].mxu0 %vm1083_vm0, %v1941_v50 }
 0x943   : > { %4552 = vmatpush3.bf16.msra.mxu0 %v4761_v49 }
 0x944   : > { %4553 = vmatprep.subr.bf16.mxu0 %v4762_v0 }
 0x947   : > { %4554 = vmatpush3.bf16.msra.mxu0 %v4762_v0 }
 0xa15   : > { %v4549_v1 = vpop.f32.mrb[20].mxu0 }
 0xa16   : > { %v1988_v3 = vpop.f32.mrb[21].mxu0 }
 0xa17   : > { %v4550_v51 = vpop.f32.mrb[22].mxu0 }
 0xa18   : > { %v2004_v52 = vpack.c.bf16 %v4550_v51, %v4549_v1  ;;  %v1991_v55 = vpop.f32.mrb[23].mxu0 }
 0xa19   : > { %v2003_v56 = vpack.c.bf16 %v1991_v55, %v1988_v3 }
 0xa1b   : > { %4555 = vmatprep.mubr.msk.bf16.mxu0 %vm1083_vm0, %v2003_v56 }
 0xa1c   : > { %4556 = vmatmul.mubr.msk.bf16.vlgmr.msra.gmra.mrb[12].mxu0 %vm1083_vm0, %v2004_v52 }
 0xaef   : > { %v4557_v58 = vpop.f32.mrb[12].mxu0 }
 0xaf0   : > { %v2061_v59 = vpop.f32.mrb[13].mxu0  ;;  %v2089_v23 = vadd.f32 %v4557_v58, %v4109_v57 }
 0xaf1   : > { %v2087_v60 = vadd.f32 %v4109_v57, %v2061_v59  ;;  %v4558_v61 = vpop.f32.mrb[14].mxu0 }
 0xaf2   : > { %v2064_v62 = vpop.f32.mrb[15].mxu0  ;;  %v2090_v63 = vadd.f32 %v4558_v61, %v4109_v57  ;;  %v2093_v18 = vadd.f32 %v2089_v23, %v5619_v24  ;;  %v5877_v61 = vmov 0.0  }
 0xaf3   : > { %v2088_v2 = vadd.f32 %v4109_v57, %v2064_v62  ;;  %v2091_v22 = vadd.f32 %v4835_v19, %v2087_v60  ;;  %v5875_v60 = vmov 0.0   ;;  %v5879_v62 = vmov 0.0  }
 0xaf4   : > { %v2094_v7 = vadd.f32 %v2090_v63, %v5621_v25  ;;  %v5881_v63 = vmov 0.0  }
 0xaf5   : > { %2097 = vadd.xlane.f32.xlu1 %v2091_v22  ;;  %v2092_v5 = vadd.f32 %v4836_v4, %v2088_v2 }
 0xaf7   : > { %2099 = vadd.xlane.f32.xlu0 %v2092_v5 }
 0xaf9   : > { %2103 = vadd.xlane.f32.xlu1 %v2094_v7 }
 0xafb   : > { %2101 = vadd.xlane.f32.xlu0 %v2093_v18 }
 0xb82   : > { %v2098_v20 = vpop.xlane.xlu1 %2097 }
 0xb83   : > { %v2106_v21 = vmul.f32 0.0078125, %v2098_v20 }
 0xb84   : > { %v2100_v8 = vpop.xlane.xlu0 %2099 }
 0xb85   : > { %v2110_v9 = vsub.f32 %v2091_v22, %v2106_v21  ;;  %v2107_v10 = vmul.f32 0.0078125, %v2100_v8 }
 0xb86   : > { %v2104_v11 = vpop.xlane.xlu1 %2103 }
 0xb87   : > { %v2111_v43 = vsub.f32 %v2092_v5, %v2107_v10  ;;  %v2109_v12 = vmul.f32 0.0078125, %v2104_v11  ;;  %v2114_v42 = vmul.f32 %v2110_v9, %v2110_v9 }
 0xb88   : > { %v2102_v53 = vpop.xlane.xlu0 %2101 }
 0xb89   : > { %v2113_v54 = vsub.f32 %v2094_v7, %v2109_v12  ;;  %v2108_v13 = vmul.f32 0.0078125, %v2102_v53  ;;  %2118 = vadd.xlane.f32.xlu0 %v2114_v42  ;;  %v2115_v14 = vmul.f32 %v2111_v43, %v2111_v43 }
 0xb8b   : > { %v2112_v15 = vsub.f32 %v2093_v18, %v2108_v13  ;;  %2120 = vadd.xlane.f32.xlu1 %v2115_v14  ;;  %v2117_v25 = vmul.f32 %v2113_v54, %v2113_v54 }
 0xb8d   : > { %v2116_v17 = vmul.f32 %v2112_v15, %v2112_v15 }
 0xb8f   : > { %2124 = vadd.xlane.f32.xlu1 %v2117_v25  ;;  %2122 = vadd.xlane.f32.xlu0 %v2116_v17 }
 0xc16   : > { %v2119_v24 = vpop.xlane.xlu0 %2118 }
 0xc17   : > { %v2126_v26 = vmul.f32 0.0078125, %v2119_v24 }
 0xc18   : > { %v2121_v27 = vpop.xlane.xlu1 %2120 }
 0xc19   : > { %v2130_v30 = vadd.f32 1e-05, %v2126_v26  ;;  %v2127_v34 = vmul.f32 0.0078125, %v2121_v27 }
 0xc1b   : > { %4827 = vrsqrt.f32 %v2130_v30  ;;  %v2131_v35 = vadd.f32 1e-05, %v2127_v34 }
 0xc1c   : > { %v2125_v36 = vpop.xlane.xlu1 %2124  ;;  %v2123_v37 = vpop.xlane.xlu0 %2122 }
 0xc1d   : > { %4829 = vrsqrt.f32 %v2131_v35  ;;  %v2129_v38 = vmul.f32 0.0078125, %v2125_v36  ;;  %v2128_v32 = vmul.f32 0.0078125, %v2123_v37 }
 0xc1f   : > { %v2133_v39 = vadd.f32 1e-05, %v2129_v38  ;;  %v2132_v40 = vadd.f32 1e-05, %v2128_v32 }
 0xc21   : > { %4831 = vrsqrt.f32 %v2133_v39 }
 0xc22   : > { %4833 = vrsqrt.f32 %v2132_v40 }
 0xc25   : > { %v4828_v33 = vpop.eup %4827 }
 0xc26   : > { %v2138_v44 = vmul.f32 %v4828_v33, %v2110_v9 }
 0xc27   : > { %v4830_v45 = vpop.eup %4829 }
 0xc28   : > { %v2148_v46 = vmul.f32 %v4110_v41, %v2138_v44  ;;  %v2139_v47 = vmul.f32 %v4830_v45, %v2111_v43 }
 0xc2a   : > { %v2149_v49 = vmul.f32 %v4110_v41, %v2139_v47  ;;  %v5859_v0 = vadd.f32 %v4111_v48, %v2148_v46 }
 0xc2b   : > { %v4832_v6 = vpop.eup %4831 }
 0xc2c   : > { %v4834_v50 = vpop.eup %4833  ;;  %v5861_v1 = vadd.f32 %v4111_v48, %v2149_v49  ;;  %v2141_v3 = vmul.f32 %v4832_v6, %v2113_v54 }
 0xc2d   : > { %v2140_v51 = vmul.f32 %v4834_v50, %v2112_v15 }
 0xc2e   : > { %v5865_v52 = vpack.c.bf16 %v5861_v1, %v5859_v0  ;;  %v2151_v55 = vmul.f32 %v4110_v41, %v2141_v3 }
 0xc2f   : > { %v2150_v56 = vmul.f32 %v4110_v41, %v2140_v51 }
 0xc30   : > { %v5867_v57 = vadd.f32 %v4111_v48, %v2151_v55 }
 0xc31   : > { %v5869_v58 = vadd.f32 %v4111_v48, %v2150_v56 }
 0xc33   : > { %v5873_v59 = vpack.c.bf16 %v5867_v57, %v5869_v58 }
 0xc34 LB: >> { %v5195_v2 = vmov 0   ;;  %s4112_s1 = sshll.u32 %s5181_s13, 10  ;;  %s2169_s13 = sadd.s32 1, %s5181_s13   ;;  %s5181_s13 = sphi %s5883_s13, %s2169_s13   ;;  %v5177_v63 = vphi %v5881_v63, %v6284_v63   ;;  %v5173_v62 = vphi %v5879_v62, %v6283_v62   ;;  %v5169_v61 = vphi %v5877_v61, %v6282_v61   ;;  %v5165_v60 = vphi %v5875_v60, %v6281_v60  }
 0xc35   : >> { %2770 = vmatprep.mubr.bf16.mxu0 %v5195_v2  ;;  %2823 = vmatprep.mubr.bf16.mxu1 %v5195_v2  ;;  %s5905_s24 = sshra.s32 %s4112_s1, 7  ;;  %s2245_s21 = sshra.s32 %s4112_s1, 3 }
 0xc36   : >> { %s4113_s29 = sshll.u32 %s5905_s24, 2  ;;  %s4114_s26 = sshll.u32 %s2245_s21, 2 }
 0xc37   : >> { %s5909_s19 = scalar_lea.vmem %s5530_s28, %s4113_s29 [#allocation6]  ;;  %s5942_s14 = scalar_lea.vmem %s5536_s9, %s4114_s26 [#allocation8] }
 0xc38   : >> { %v2179_v19 = vld [vmem:[%s5909_s19] sm:$0xff]  ;;  %v2180_v23 = vld [vmem:[%s5909_s19 + $0x8] sm:$0xff]  ;;  %s2243_s23 = scalar_lea.vmem %s5566_s18, %s5905_s24  ;;  %p2166_p3 = scmp.ge.s32.totalorder %s2169_s13, 2  }
 0xc39   : >> { %v2183_v22 = vld [vmem:[%s5909_s19 + $0x40] sm:$0xff]  ;;  %v2184_v5 = vld [vmem:[%s5909_s19 + $0x48] sm:$0xff]  ;;  %s6287_s18 = scalar_lea.vmem (%p2166_p3), [#allocation9], %s5518_s16  ;;  %p4246_p7 = scmp.ne.s32.totalorder (%p2166_p3), %s5303_s25, 1 }
 0xc3a   : >> { %v4116_v4 = vcombine.high %v2179_v19, %v2183_v22  ;;  %v4115_v7 = vcombine.low %v2179_v19, %v2183_v22  ;;  %v2187_v18 = vld [vmem:[%s5909_s19 + $0x80] sm:$0xff]  ;;  %v4118_v21 = vcombine.high %v2180_v23, %v2184_v5  ;;  %v4117_v8 = vcombine.low %v2180_v23, %v2184_v5  ;;  %v2188_v10 = vld [vmem:[%s5909_s19 + $0x88] sm:$0xff] }
 0xc3b   : >> { %v2191_v20 = vld [vmem:[%s5909_s19 + $0xc0] sm:$0xff]  ;;  %v2192_v11 = vld [vmem:[%s5909_s19 + $0xc8] sm:$0xff] }
 0xc3c   : >> { %v4124_v9 = vcombine.high %v2187_v18, %v2191_v20  ;;  %v2195_v43 = vld [vmem:[%s5909_s19 + $0x100] sm:$0xff]  ;;  %2738 = vmatprep.subr.bf16.mxu0 %v4116_v4  ;;  %v4126_v12 = vcombine.high %v2188_v10, %v2192_v11  ;;  %v2196_v53 = vld [vmem:[%s5909_s19 + $0x108] sm:$0xff]  ;;  %2791 = vmatprep.subr.bf16.mxu1 %v4118_v21  ;;  %v4123_v13 = vcombine.low %v2187_v18, %v2191_v20 }
 0xc3d   : >> { %v2199_v42 = vld [vmem:[%s5909_s19 + $0x140] sm:$0xff]  ;;  %v2200_v54 = vld [vmem:[%s5909_s19 + $0x148] sm:$0xff]  ;;  %2739 = vmatpush1.bf16.msra.mxu0 %v4115_v7  ;;  %2792 = vmatpush1.bf16.msra.mxu1 %v4117_v8  ;;  %v4125_v14 = vcombine.low %v2188_v10, %v2192_v11 }
 0xc3e   : >> { %2740 = vmatprep.subr.bf16.mxu0 %v4124_v9  ;;  %v4132_v15 = vcombine.high %v2195_v43, %v2199_v42  ;;  %2793 = vmatprep.subr.bf16.mxu1 %v4126_v12  ;;  %v4134_v25 = vcombine.high %v2196_v53, %v2200_v54  ;;  %v2203_v17 = vld [vmem:[%s5909_s19 + $0x180] sm:$0xff]  ;;  %v2204_v26 = vld [vmem:[%s5909_s19 + $0x188] sm:$0xff]  ;;  %v4131_v30 = vcombine.low %v2195_v43, %v2199_v42  ;;  %v2181_v9 = vld [vmem:[%s5909_s19 + $0x10] sm:$0xff] }
 0xc3f   : >> { %v2207_v24 = vld [vmem:[%s5909_s19 + $0x1c0] sm:$0xff]  ;;  %v2208_v27 = vld [vmem:[%s5909_s19 + $0x1c8] sm:$0xff]  ;;  %v4133_v34 = vcombine.low %v2196_v53, %v2200_v54  ;;  %v2185_v43 = vld [vmem:[%s5909_s19 + $0x50] sm:$0xff] }
 0xc40   : >> { %v4140_v35 = vcombine.high %v2203_v17, %v2207_v24  ;;  %v4142_v36 = vcombine.high %v2204_v26, %v2208_v27  ;;  %v2211_v37 = vld [vmem:[%s5909_s19 + $0x200] sm:$0xff]  ;;  %v2212_v32 = vld [vmem:[%s5909_s19 + $0x208] sm:$0xff]  ;;  %v4139_v40 = vcombine.low %v2203_v17, %v2207_v24  ;;  %v4141_v33 = vcombine.low %v2204_v26, %v2208_v27  ;;  %v2182_v42 = vld [vmem:[%s5909_s19 + $0x18] sm:$0xff] }
 0xc41   : >> { %2741 = vmatpush1.bf16.msra.mxu0 %v4123_v13  ;;  %2794 = vmatpush1.bf16.msra.mxu1 %v4125_v14  ;;  %v2215_v38 = vld [vmem:[%s5909_s19 + $0x240] sm:$0xff]  ;;  %v2216_v39 = vld [vmem:[%s5909_s19 + $0x248] sm:$0xff]  ;;  %v2186_v53 = vld [vmem:[%s5909_s19 + $0x58] sm:$0xff]  ;;  %v4119_v27 = vcombine.low %v2181_v9, %v2185_v43 }
 0xc42   : >> { %2742 = vmatprep.subr.bf16.mxu0 %v4132_v15  ;;  %2795 = vmatprep.subr.bf16.mxu1 %v4134_v25  ;;  %v4148_v41 = vcombine.high %v2211_v37, %v2215_v38  ;;  %v4150_v44 = vcombine.high %v2212_v32, %v2216_v39  ;;  %v2219_v45 = vld [vmem:[%s5909_s19 + $0x280] sm:$0xff]  ;;  %v2220_v47 = vld [vmem:[%s5909_s19 + $0x288] sm:$0xff]  ;;  %v4147_v49 = vcombine.low %v2211_v37, %v2215_v38  ;;  %v2189_v13 = vld [vmem:[%s5909_s19 + $0x90] sm:$0xff] }
 0xc43   : >> { %v2223_v46 = vld [vmem:[%s5909_s19 + $0x2c0] sm:$0xff]  ;;  %v2224_v48 = vld [vmem:[%s5909_s19 + $0x2c8] sm:$0xff]  ;;  %v4149_v6 = vcombine.low %v2212_v32, %v2216_v39  ;;  %v4120_v15 = vcombine.high %v2181_v9, %v2185_v43  ;;  %v2193_v25 = vld [vmem:[%s5909_s19 + $0xd0] sm:$0xff]  ;;  %v4122_v17 = vcombine.high %v2182_v42, %v2186_v53 }
 0xc44   : >> { %v4156_v50 = vcombine.high %v2219_v45, %v2223_v46  ;;  %v4158_v3 = vcombine.high %v2220_v47, %v2224_v48  ;;  %v2227_v51 = vld [vmem:[%s5909_s19 + $0x300] sm:$0xff]  ;;  %v2228_v56 = vld [vmem:[%s5909_s19 + $0x308] sm:$0xff]  ;;  %v4155_v22 = vcombine.low %v2219_v45, %v2223_v46  ;;  %v4157_v4 = vcombine.low %v2220_v47, %v2224_v48  ;;  %v2190_v24 = vld [vmem:[%s5909_s19 + $0x98] sm:$0xff] }
 0xc45   : >> { %2743 = vmatpush1.bf16.msra.mxu0 %v4131_v30  ;;  %2796 = vmatpush1.bf16.msra.mxu1 %v4133_v34  ;;  %v2231_v55 = vld [vmem:[%s5909_s19 + $0x340] sm:$0xff]  ;;  %v2232_v19 = vld [vmem:[%s5909_s19 + $0x348] sm:$0xff]  ;;  %v2194_v26 = vld [vmem:[%s5909_s19 + $0xd8] sm:$0xff]  ;;  %v4121_v34 = vcombine.low %v2182_v42, %v2186_v53  ;;  %v4127_v39 = vcombine.low %v2189_v13, %v2193_v25 }
 0xc46   : >> { %2744 = vmatprep.subr.bf16.mxu0 %v4140_v35  ;;  %2797 = vmatprep.subr.bf16.mxu1 %v4142_v36  ;;  %v2235_v23 = vld [vmem:[%s5909_s19 + $0x380] sm:$0xff]  ;;  %v4164_v5 = vcombine.high %v2227_v51, %v2231_v55  ;;  %v4166_v18 = vcombine.high %v2228_v56, %v2232_v19  ;;  %v2236_v20 = vld [vmem:[%s5909_s19 + $0x388] sm:$0xff]  ;;  %v4163_v8 = vcombine.low %v2227_v51, %v2231_v55  ;;  %v2197_v30 = vld [vmem:[%s5909_s19 + $0x110] sm:$0xff] }
 0xc47   : >> { %v2239_v7 = vld [vmem:[%s5909_s19 + $0x3c0] sm:$0xff]  ;;  %v2240_v21 = vld [vmem:[%s5909_s19 + $0x3c8] sm:$0xff]  ;;  %v4165_v10 = vcombine.low %v2228_v56, %v2232_v19  ;;  %v4128_v35 = vcombine.high %v2189_v13, %v2193_v25  ;;  %v2201_v36 = vld [vmem:[%s5909_s19 + $0x150] sm:$0xff]  ;;  %v4130_v37 = vcombine.high %v2190_v24, %v2194_v26 }
 0xc48   : >> { %v4172_v11 = vcombine.high %v2235_v23, %v2239_v7  ;;  %v4174_v12 = vcombine.high %v2236_v20, %v2240_v21  ;;  %v4171_v54 = vcombine.low %v2235_v23, %v2239_v7  ;;  %v4173_v14 = vcombine.low %v2236_v20, %v2240_v21  ;;  %v2198_v38 = vld [vmem:[%s5909_s19 + $0x118] sm:$0xff]  ;;  %v2217_v51 = vld [vmem:[%s5909_s19 + $0x250] sm:$0xff] }
 0xc49   : >> { %2745 = vmatpush1.bf16.msra.mxu0 %v4139_v40  ;;  %2798 = vmatpush1.bf16.msra.mxu1 %v4141_v33  ;;  %v2202_v32 = vld [vmem:[%s5909_s19 + $0x158] sm:$0xff]  ;;  %v2205_v40 = vld [vmem:[%s5909_s19 + $0x190] sm:$0xff]  ;;  %v4129_v33 = vcombine.low %v2190_v24, %v2194_v26  ;;  %v4135_v48 = vcombine.low %v2197_v30, %v2201_v36 }
 0xc4a   : >> { %2746 = vmatprep.subr.bf16.mxu0 %v4148_v41  ;;  %2799 = vmatprep.subr.bf16.mxu1 %v4150_v44  ;;  %v4136_v41 = vcombine.high %v2197_v30, %v2201_v36  ;;  %v2209_v44 = vld [vmem:[%s5909_s19 + $0x1d0] sm:$0xff]  ;;  %v4138_v45 = vcombine.high %v2198_v38, %v2202_v32  ;;  %v2206_v46 = vld [vmem:[%s5909_s19 + $0x198] sm:$0xff] }
 0xc4b   : >> { %v2210_v47 = vld [vmem:[%s5909_s19 + $0x1d8] sm:$0xff]  ;;  %v4143_v19 = vcombine.low %v2205_v40, %v2209_v44  ;;  %v2225_v23 = vld [vmem:[%s5909_s19 + $0x2d0] sm:$0xff] }
 0xc4c   : >> { %v2214_v55 = vld [vmem:[%s5909_s19 + $0x218] sm:$0xff]  ;;  %v2233_v9 = vld [vmem:[%s5909_s19 + $0x350] sm:$0xff] }
 0xc4d   : >> { %2747 = vmatpush1.bf16.msra.mxu0 %v4147_v49  ;;  %2800 = vmatpush1.bf16.msra.mxu1 %v4149_v6  ;;  %v4137_v49 = vcombine.low %v2198_v38, %v2202_v32  ;;  %v4144_v6 = vcombine.high %v2205_v40, %v2209_v44  ;;  %v2218_v56 = vld [vmem:[%s5909_s19 + $0x258] sm:$0xff]  ;;  %v2241_v13 = vld [vmem:[%s5909_s19 + $0x3d0] sm:$0xff]  ;;  %v4839_v32 = vld [vmem:[%s5942_s14] sm:$0xff]  }
 0xc4e   : >> { %2748 = vmatprep.subr.bf16.mxu0 %v4156_v50  ;;  %2801 = vmatprep.subr.bf16.mxu1 %v4158_v3  ;;  %v2213_v50 = vld [vmem:[%s5909_s19 + $0x210] sm:$0xff]  ;;  %v4146_v3 = vcombine.high %v2206_v46, %v2210_v47  ;;  %v2222_v7 = vld [vmem:[%s5909_s19 + $0x298] sm:$0xff]  ;;  %v4154_v20 = vcombine.high %v2214_v55, %v2218_v56  ;;  %v4841_v40 = vld [vmem:[%s5942_s14 + $0x48] sm:$0xff]  }
 0xc4f   : >> { %v4151_v21 = vcombine.low %v2213_v50, %v2217_v51  ;;  %v2230_v43 = vld [vmem:[%s5909_s19 + $0x318] sm:$0xff]  ;;  %v4844_v44 = vld [vmem:[%s5942_s14 + $0x88] sm:$0xff]  }
 0xc50   : >> { %v2238_v25 = vld [vmem:[%s5909_s19 + $0x398] sm:$0xff] }
 0xc51   : >> { %2749 = vmatpush1.bf16.msra.mxu0 %v4155_v22  ;;  %2802 = vmatpush1.bf16.msra.mxu1 %v4157_v4  ;;  %v2221_v22 = vld [vmem:[%s5909_s19 + $0x290] sm:$0xff]  ;;  %v4145_v4 = vcombine.low %v2206_v46, %v2210_v47 }
 0xc52   : >> { %2750 = vmatprep.subr.bf16.mxu0 %v4164_v5  ;;  %2803 = vmatprep.subr.bf16.mxu1 %v4166_v18  ;;  %v4152_v5 = vcombine.high %v2213_v50, %v2217_v51  ;;  %v2226_v18 = vld [vmem:[%s5909_s19 + $0x2d8] sm:$0xff]  ;;  %v4159_v53 = vcombine.low %v2221_v22, %v2225_v23  ;;  %v4846_v46 = vld [vmem:[%s5942_s14 + $0xd0] sm:$0xff]   ;;  %v4854_v51 = vld [vmem:[%s5942_s14 + $0xe0] sm:$0xff]  }
 0xc53   : >> { %v4162_v42 = vcombine.high %v2222_v7, %v2226_v18  ;;  %v4847_v47 = vld [vmem:[%s5942_s14 + $0x10] sm:$0xff]   ;;  %v4852_v50 = vld [vmem:[%s5942_s14 + $0x98] sm:$0xff]  }
 0xc55   : >> { %2751 = vmatpush1.bf16.msra.mxu0 %v4163_v8  ;;  %2804 = vmatpush1.bf16.msra.mxu1 %v4165_v10  ;;  %v2229_v8 = vld [vmem:[%s5909_s19 + $0x310] sm:$0xff]  ;;  %v4153_v10 = vcombine.low %v2214_v55, %v2218_v56  ;;  %v4855_v55 = vld [vmem:[%s5942_s14 + $0x20] sm:$0xff]  }
 0xc56   : >> { %2752 = vmatprep.subr.bf16.mxu0 %v4172_v11  ;;  %2805 = vmatprep.subr.bf16.mxu1 %v4174_v12  ;;  %v4160_v11 = vcombine.high %v2221_v22, %v2225_v23  ;;  %v2234_v12 = vld [vmem:[%s5909_s19 + $0x358] sm:$0xff]  ;;  %v4167_v26 = vcombine.low %v2229_v8, %v2233_v9  ;;  %v4856_v56 = vld [vmem:[%s5942_s14 + $0xa0] sm:$0xff]   ;;  %v4858_v22 = vld [vmem:[%s5942_s14 + $0xe8] sm:$0xff]  }
 0xc57   : >> { %v4170_v24 = vcombine.high %v2230_v43, %v2234_v12  ;;  %v4859_v23 = vld [vmem:[%s5942_s14 + $0x28] sm:$0xff]  }
 0xc59   : >> { %2753 = vmatpush1.bf16.msra.mxu0 %v4171_v54  ;;  %2806 = vmatpush1.bf16.msra.mxu1 %v4173_v14  ;;  %v2237_v54 = vld [vmem:[%s5909_s19 + $0x390] sm:$0xff]  ;;  %v4161_v14 = vcombine.low %v2222_v7, %v2226_v18 }
 0xc5a   : >> { %2844 = vmatprep.subr.bf16.mxu0 %v4120_v15  ;;  %2897 = vmatprep.subr.bf16.mxu1 %v4122_v17  ;;  %v4168_v15 = vcombine.high %v2229_v8, %v2233_v9  ;;  %v2242_v17 = vld [vmem:[%s5909_s19 + $0x3d8] sm:$0xff]  ;;  %v4176_v30 = vcombine.high %v2237_v54, %v2241_v13  ;;  %v4175_v36 = vcombine.low %v2237_v54, %v2241_v13  ;;  %v4862_v7 = vld [vmem:[%s5942_s14 + $0xf0] sm:$0xff]  }
 0xc5b   : >> { %v4177_v38 = vcombine.low %v2238_v25, %v2242_v17  ;;  %v4863_v18 = vld [vmem:[%s5942_s14 + $0x30] sm:$0xff]   ;;  %v4866_v8 = vld [vmem:[%s5942_s14 + $0xf8] sm:$0xff]  }
 0xc5c   : >> { %2771 = vmatmul.mubr.bf16.vlgmr.msra.gmra.mrb[0].mxu0 %v5865_v52  ;;  %2824 = vmatmul.mubr.bf16.vlgmr.msra.gmra.mrb[0].mxu1 %v5865_v52  ;;  %v4867_v9 = vld [vmem:[%s5942_s14 + $0x38] sm:$0xff]  }
 0xc5d   : >> { %2845 = vmatpush1.bf16.msra.mxu0 %v4119_v27  ;;  %2898 = vmatpush1.bf16.msra.mxu1 %v4121_v34  ;;  %v4169_v27 = vcombine.low %v2230_v43, %v2234_v12  ;;  %v4178_v34 = vcombine.high %v2238_v25, %v2242_v17  ;;  %v4870_v43 = vld [vmem:[%s5942_s14 + $0x1c0] sm:$0xff]  }
 0xc5e   : >> { %2846 = vmatprep.subr.bf16.mxu0 %v4128_v35  ;;  %2899 = vmatprep.subr.bf16.mxu1 %v4130_v37  ;;  %v4837_v35 = vld [vmem:[%s5942_s14 + $0x40] sm:$0xff]  }
 0xc5f   : >> { %2780 = vmatprep.mubr.bf16.mxu0 %v5195_v2  ;;  %2833 = vmatprep.mubr.bf16.mxu1 %v5195_v2  ;;  %v4838_v37 = vld [vmem:[%s5942_s14 + $0xc0] sm:$0xff]  }
 0xc60   : >> { %v6030_v12 = vld [vmem:[%s2243_s23] sm:$0xff] }
 0xc61   : >> { %2847 = vmatpush1.bf16.msra.mxu0 %v4127_v39  ;;  %2900 = vmatpush1.bf16.msra.mxu1 %v4129_v33  ;;  %v4840_v39 = vld [vmem:[%s5942_s14 + $0x80] sm:$0xff]   ;;  %v4842_v33 = vld [vmem:[%s5942_s14 + $0xc8] sm:$0xff]   ;;  %v2389_v54 = vrot.slane %v6030_v12, %v838_v16  ;;  %v2385_v13 = vrot.slane %v6030_v12, %v834_v31 }
 0xc62   : >> { %2848 = vmatprep.subr.bf16.mxu0 %v4136_v41  ;;  %2901 = vmatprep.subr.bf16.mxu1 %v4138_v45  ;;  %v4843_v41 = vld [vmem:[%s5942_s14 + $0x8] sm:$0xff]   ;;  %v4845_v45 = vld [vmem:[%s5942_s14 + $0x50] sm:$0xff]  }
 0xc64   : >> { %2781 = vmatmul.mubr.bf16.gmra.mrb[4].mxu0 %v5873_v59  ;;  %2834 = vmatmul.mubr.bf16.gmra.mrb[4].mxu1 %v5873_v59 }
 0xc65   : >> { %2849 = vmatpush1.bf16.msra.mxu0 %v4135_v48  ;;  %2902 = vmatpush1.bf16.msra.mxu1 %v4137_v49  ;;  %v4848_v48 = vld [vmem:[%s5942_s14 + $0x90] sm:$0xff]   ;;  %v4849_v49 = vld [vmem:[%s5942_s14 + $0x58] sm:$0xff]  }
 0xc66   : >> { %2850 = vmatprep.subr.bf16.mxu0 %v4144_v6  ;;  %2903 = vmatprep.subr.bf16.mxu1 %v4146_v3  ;;  %v4851_v6 = vld [vmem:[%s5942_s14 + $0x18] sm:$0xff]   ;;  %v4853_v3 = vld [vmem:[%s5942_s14 + $0x60] sm:$0xff]  }
 0xc67   : >> { %2876 = vmatprep.mubr.bf16.mxu0 %v5195_v2  ;;  %2929 = vmatprep.mubr.bf16.mxu1 %v5195_v2 }
 0xc69   : >> { %2851 = vmatpush1.bf16.msra.mxu0 %v4143_v19  ;;  %2904 = vmatpush1.bf16.msra.mxu1 %v4145_v4  ;;  %v4857_v19 = vld [vmem:[%s5942_s14 + $0x68] sm:$0xff]  }
 0xc6a   : >> { %2852 = vmatprep.subr.bf16.mxu0 %v4152_v5  ;;  %2905 = vmatprep.subr.bf16.mxu1 %v4154_v20  ;;  %v4860_v4 = vld [vmem:[%s5942_s14 + $0xa8] sm:$0xff]   ;;  %v4861_v5 = vld [vmem:[%s5942_s14 + $0x70] sm:$0xff]  }
 0xc6b   : >> { %v4864_v20 = vld [vmem:[%s5942_s14 + $0xb0] sm:$0xff]  }
 0xc6d   : >> { %2853 = vmatpush1.bf16.msra.mxu0 %v4151_v21  ;;  %2906 = vmatpush1.bf16.msra.mxu1 %v4153_v10  ;;  %v4865_v21 = vld [vmem:[%s5942_s14 + $0x78] sm:$0xff]  }
 0xc6e   : >> { %2854 = vmatprep.subr.bf16.mxu0 %v4160_v11  ;;  %2907 = vmatprep.subr.bf16.mxu1 %v4162_v42  ;;  %v4868_v10 = vld [vmem:[%s5942_s14 + $0xb8] sm:$0xff]   ;;  %v4869_v11 = vld [vmem:[%s5942_s14 + $0x140] sm:$0xff]   ;;  %v2392_v42 = vsub.s32 3, %v5625_v28 }
 0xc71   : >> { %2855 = vmatpush1.bf16.msra.mxu0 %v4159_v53  ;;  %2908 = vmatpush1.bf16.msra.mxu1 %v4161_v14  ;;  %v2381_v53 = vrot.slane %v6030_v12, %v830_v29  ;;  %v6043_v14 = vrot.slane %v6030_v12, %v2392_v42 }
 0xc72   : >> { %2856 = vmatprep.subr.bf16.mxu0 %v4168_v15  ;;  %2909 = vmatprep.subr.bf16.mxu1 %v4170_v24 }
 0xc75   : >> { %2857 = vmatpush1.bf16.msra.mxu0 %v4167_v26  ;;  %2910 = vmatpush1.bf16.msra.mxu1 %v4169_v27 }
 0xc76   : >> { %2858 = vmatprep.subr.bf16.mxu0 %v4176_v30  ;;  %2911 = vmatprep.subr.bf16.mxu1 %v4178_v34 }
 0xc79   : >> { %2859 = vmatpush1.bf16.msra.mxu0 %v4175_v36  ;;  %2912 = vmatpush1.bf16.msra.mxu1 %v4177_v38 }
 0xc7a   : >> { %4321 = vmatprep.subr.bf16.mxu0 %v4837_v35  ;;  %4349 = vmatprep.subr.bf16.mxu1 %v4838_v37 }
 0xc7c   : >> { %2877 = vmatmul.mubr.bf16.vlgmr.msra.gmra.mrb[8].mxu0 %v5865_v52  ;;  %2930 = vmatmul.mubr.bf16.vlgmr.msra.gmra.mrb[8].mxu1 %v5865_v52 }
 0xc7d   : >> { %2886 = vmatprep.mubr.bf16.mxu0 %v5195_v2  ;;  %2939 = vmatprep.mubr.bf16.mxu1 %v5195_v2  ;;  %v4850_v2 = vld [vmem:[%s5942_s14 + $0xd8] sm:$0xff]  }
 0xc7e   : >> { %4322 = vmatpush3.bf16.msra.mxu0 %v4839_v32  ;;  %4350 = vmatpush3.bf16.msra.mxu1 %v4840_v39 }
 0xc7f   : >> { %4323 = vmatprep.subr.bf16.mxu0 %v4841_v40  ;;  %4351 = vmatprep.subr.bf16.mxu1 %v4842_v33 }
 0xc82   : >> { %4324 = vmatpush3.bf16.msra.mxu0 %v4843_v41  ;;  %4352 = vmatpush3.bf16.msra.mxu1 %v4844_v44 }
 0xc83   : >> { %4325 = vmatprep.subr.bf16.mxu0 %v4845_v45  ;;  %4353 = vmatprep.subr.bf16.mxu1 %v4846_v46 }
 0xc84   : >> { %2887 = vmatmul.mubr.bf16.gmra.mrb[12].mxu0 %v5873_v59  ;;  %2940 = vmatmul.mubr.bf16.gmra.mrb[12].mxu1 %v5873_v59 }
 0xc86   : >> { %4326 = vmatpush3.bf16.msra.mxu0 %v4847_v47  ;;  %4354 = vmatpush3.bf16.msra.mxu1 %v4848_v48 }
 0xc87   : >> { %4327 = vmatprep.subr.bf16.mxu0 %v4849_v49  ;;  %4355 = vmatprep.subr.bf16.mxu1 %v4850_v2 }
 0xc8a   : >> { %4328 = vmatpush3.bf16.msra.mxu0 %v4851_v6  ;;  %4356 = vmatpush3.bf16.msra.mxu1 %v4852_v50 }
 0xc8b   : >> { %4329 = vmatprep.subr.bf16.mxu0 %v4853_v3  ;;  %4357 = vmatprep.subr.bf16.mxu1 %v4854_v51  ;;  %v4871_v51 = vld [vmem:[%s5942_s14 + $0x100] sm:$0xff]  }
 0xc8e   : >> { %4330 = vmatpush3.bf16.msra.mxu0 %v4855_v55  ;;  %4358 = vmatpush3.bf16.msra.mxu1 %v4856_v56 }
 0xc8f   : >> { %4331 = vmatprep.subr.bf16.mxu0 %v4857_v19  ;;  %4359 = vmatprep.subr.bf16.mxu1 %v4858_v22  ;;  %v4872_v19 = vld [vmem:[%s5942_s14 + $0x180] sm:$0xff]   ;;  %v4873_v22 = vld [vmem:[%s5942_s14 + $0x148] sm:$0xff]  }
 0xc92   : >> { %4332 = vmatpush3.bf16.msra.mxu0 %v4859_v23  ;;  %4360 = vmatpush3.bf16.msra.mxu1 %v4860_v4 }
 0xc93   : >> { %4333 = vmatprep.subr.bf16.mxu0 %v4861_v5  ;;  %4361 = vmatprep.subr.bf16.mxu1 %v4862_v7  ;;  %v4874_v7 = vld [vmem:[%s5942_s14 + $0x1c8] sm:$0xff]  }
 0xc96   : >> { %4334 = vmatpush3.bf16.msra.mxu0 %v4863_v18  ;;  %4362 = vmatpush3.bf16.msra.mxu1 %v4864_v20 }
 0xc97   : >> { %4335 = vmatprep.subr.bf16.mxu0 %v4865_v21  ;;  %4363 = vmatprep.subr.bf16.mxu1 %v4866_v8 }
 0xc9a   : >> { %4336 = vmatpush3.bf16.msra.mxu0 %v4867_v9  ;;  %4364 = vmatpush3.bf16.msra.mxu1 %v4868_v10 }
 0xc9b   : >> { %4377 = vmatprep.subr.bf16.mxu0 %v4869_v11  ;;  %4405 = vmatprep.subr.bf16.mxu1 %v4870_v43 }
 0xd2f   : >> { %v2772_v15 = vpop.f32.mrb[0].mxu0  ;;  %v2825_v17 = vpop.f32.mrb[0].mxu1 }
 0xd30   : >> { %v2773_v25 = vadd.f32 %v2772_v15, %v2381_v53  ;;  %v2774_v24 = vpop.f32.mrb[1].mxu0  ;;  %v2826_v26 = vadd.f32 %v2825_v17, %v2389_v54  ;;  %v2827_v30 = vpop.f32.mrb[1].mxu1  ;;  %v4875_v15 = vld [vmem:[%s5942_s14 + $0x108] sm:$0xff]  }
 0xd31   : >> { %v2775_v27 = vadd.f32 %v2774_v24, %v2385_v13  ;;  %v2776_v34 = vpop.f32.mrb[2].mxu0  ;;  %v2828_v36 = vadd.f32 %v2827_v30, %v6043_v14  ;;  %v2829_v38 = vpop.f32.mrb[2].mxu1  ;;  %v4876_v30 = vld [vmem:[%s5942_s14 + $0x188] sm:$0xff]  }
 0xd32   : >> { %v2950_v35 = vmax.f32 %v2773_v25, 0.0  ;;  %v2777_v37 = vadd.f32 %v2776_v34, %v2381_v53  ;;  %v2778_v32 = vpop.f32.mrb[3].mxu0  ;;  %v2952_v39 = vmax.f32 %v2826_v26, 0.0  ;;  %v2830_v40 = vadd.f32 %v2829_v38, %v2389_v54  ;;  %v2831_v41 = vpop.f32.mrb[3].mxu1  ;;  %v4878_v38 = vld [vmem:[%s5942_s14 + $0x1d0] sm:$0xff]  }
 0xd33   : >> { %v2779_v33 = vadd.f32 %v2778_v32, %v2385_v13  ;;  %v2953_v44 = vmax.f32 %v2828_v36, 0.0  ;;  %v2832_v46 = vadd.f32 %v2831_v41, %v6043_v14  ;;  %v2951_v47 = vmax.f32 %v2775_v27, 0.0 }
 0xd34   : >> { %v2958_v45 = vmax.f32 %v2777_v37, 0.0  ;;  %v2960_v48 = vmax.f32 %v2830_v40, 0.0 }
 0xd35   : >> { %v2959_v49 = vmax.f32 %v2779_v33, 0.0  ;;  %v2961_v6 = vmax.f32 %v2832_v46, 0.0  ;;  %v4879_v33 = vld [vmem:[%s5942_s14 + $0x110] sm:$0xff]   ;;  %v4883_v46 = vld [vmem:[%s5942_s14 + $0x118] sm:$0xff]  }
 0xd36   : >> { %v2982_v2 = vpack.c.bf16 %v2958_v45, %v2950_v35  ;;  %v2984_v50 = vpack.c.bf16 %v2960_v48, %v2952_v39  ;;  %v4882_v45 = vld [vmem:[%s5942_s14 + $0x1d8] sm:$0xff]   ;;  %v4885_v48 = vld [vmem:[%s5942_s14 + $0x160] sm:$0xff]  }
 0xd37   : >> { %v2983_v3 = vpack.c.bf16 %v2959_v49, %v2951_v47  ;;  %v2782_v55 = vpop.f32.mrb[4].mxu0  ;;  %v2985_v56 = vpack.c.bf16 %v2961_v6, %v2953_v44  ;;  %v2835_v4 = vpop.f32.mrb[4].mxu1  ;;  %v4880_v44 = vld [vmem:[%s5942_s14 + $0x190] sm:$0xff]   ;;  %v4884_v47 = vld [vmem:[%s5942_s14 + $0x198] sm:$0xff]   ;;  %v4886_v49 = vld [vmem:[%s5942_s14 + $0x1e0] sm:$0xff]  }
 0xd38   : >> { %v2783_v23 = vadd.f32 %v2782_v55, %v2381_v53  ;;  %v2784_v5 = vpop.f32.mrb[5].mxu0  ;;  %v2836_v18 = vadd.f32 %v2835_v4, %v2389_v54  ;;  %v2837_v21 = vpop.f32.mrb[5].mxu1  ;;  %v4888_v6 = vld [vmem:[%s5942_s14 + $0x1a0] sm:$0xff]   ;;  %v2404_v55 = vsub.s32 6, %v5625_v28  ;;  %v4892_v4 = vld [vmem:[%s5942_s14 + $0x1a8] sm:$0xff]  }
 0xd39   : >> { %3414 = vmatprep.mubr.bf16.mxu0 %v2983_v3  ;;  %v2785_v20 = vadd.f32 %v2784_v5, %v2385_v13  ;;  %v2786_v8 = vpop.f32.mrb[6].mxu0  ;;  %3463 = vmatprep.mubr.bf16.mxu1 %v2985_v56  ;;  %v2838_v10 = vadd.f32 %v2837_v21, %v6043_v14  ;;  %v2839_v43 = vpop.f32.mrb[6].mxu1  ;;  %v2396_v3 = vsub.s32 4, %v5625_v28  ;;  %v2400_v56 = vsub.s32 5, %v5625_v28  ;;  %v4893_v5 = vld [vmem:[%s5942_s14 + $0x170] sm:$0xff]  }
 0xd3a   : >> { %3415 = vmatmul.mubr.bf16.vlgmr.msra.gmra.mrb[16].mxu0 %v2982_v2  ;;  %v2966_v9 = vmax.f32 %v2783_v23, 0.0  ;;  %v2787_v11 = vadd.f32 %v2786_v8, %v2381_v53  ;;  %v2788_v42 = vpop.f32.mrb[7].mxu0  ;;  %3464 = vmatmul.mubr.bf16.vlgmr.msra.gmra.mrb[16].mxu1 %v2984_v50  ;;  %v2968_v25 = vmax.f32 %v2836_v18, 0.0  ;;  %v2840_v24 = vadd.f32 %v2839_v43, %v2389_v54  ;;  %v2841_v27 = vpop.f32.mrb[7].mxu1  ;;  %v4877_v53 = vld [vmem:[%s5942_s14 + $0x150] sm:$0xff]   ;;  %v4887_v2 = vld [vmem:[%s5942_s14 + $0x120] sm:$0xff]  }
 0xd3b   : >> { %4378 = vmatpush3.bf16.msra.mxu0 %v4871_v51  ;;  %v2967_v17 = vmax.f32 %v2785_v20, 0.0  ;;  %v2789_v26 = vadd.f32 %v2788_v42, %v2385_v13  ;;  %4406 = vmatpush3.bf16.msra.mxu1 %v4872_v19  ;;  %v2969_v34 = vmax.f32 %v2838_v10, 0.0  ;;  %v2842_v36 = vadd.f32 %v2841_v27, %v6043_v14  ;;  %v4881_v14 = vld [vmem:[%s5942_s14 + $0x158] sm:$0xff]   ;;  %v4889_v50 = vld [vmem:[%s5942_s14 + $0x168] sm:$0xff]   ;;  %v4894_v20 = vld [vmem:[%s5942_s14 + $0x1f0] sm:$0xff]  }
 0xd3c   : >> { %4379 = vmatprep.subr.bf16.mxu0 %v4873_v22  ;;  %v2974_v35 = vmax.f32 %v2787_v11, 0.0  ;;  %4407 = vmatprep.subr.bf16.mxu1 %v4874_v7  ;;  %v2976_v37 = vmax.f32 %v2840_v24, 0.0  ;;  %v4890_v51 = vld [vmem:[%s5942_s14 + $0x1e8] sm:$0xff]   ;;  %v2408_v19 = vsub.s32 7, %v5625_v28  ;;  %v2397_v23 = vrot.slane %v6030_v12, %v2396_v3  ;;  %v4896_v42 = vld [vmem:[%s5942_s14 + $0x1b0] sm:$0xff]  }
 0xd3d   : >> { %v2975_v32 = vmax.f32 %v2789_v26, 0.0  ;;  %v2977_v54 = vmax.f32 %v2842_v36, 0.0  ;;  %v4891_v22 = vld [vmem:[%s5942_s14 + $0x128] sm:$0xff]   ;;  %v6078_v7 = vrot.slane %v6030_v12, %v2404_v55  ;;  %v6081_v18 = vrot.slane %v6030_v12, %v2400_v56 }
 0xd3e   : >> { %v2990_v39 = vpack.c.bf16 %v2974_v35, %v2966_v9  ;;  %v2992_v13 = vpack.c.bf16 %v2976_v37, %v2968_v25  ;;  %v6085_v21 = vrot.slane %v6030_v12, %v2408_v19  ;;  %v4895_v9 = vld [vmem:[%s5942_s14 + $0x130] sm:$0xff]   ;;  %v4898_v12 = vld [vmem:[%s5942_s14 + $0x1f8] sm:$0xff]  }
 0xd3f   : >> { %4380 = vmatpush3.bf16.msra.mxu0 %v4875_v15  ;;  %v2991_v40 = vpack.c.bf16 %v2975_v32, %v2967_v17  ;;  %4408 = vmatpush3.bf16.msra.mxu1 %v4876_v30  ;;  %v2993_v41 = vpack.c.bf16 %v2977_v54, %v2969_v34  ;;  %v4897_v15 = vld [vmem:[%s5942_s14 + $0x178] sm:$0xff]  }
 0xd40   : >> { %4381 = vmatprep.subr.bf16.mxu0 %v4877_v53  ;;  %4409 = vmatprep.subr.bf16.mxu1 %v4878_v38  ;;  %v4899_v32 = vld [vmem:[%s5942_s14 + $0x138] sm:$0xff]  }
 0xd41   : >> { %3422 = vmatprep.mubr.bf16.mxu0 %v2991_v40  ;;  %3471 = vmatprep.mubr.bf16.mxu1 %v2993_v41 }
 0xd42   : >> { %3423 = vmatmul.mubr.bf16.gmra.mrb[20].mxu0 %v2990_v39  ;;  %3472 = vmatmul.mubr.bf16.gmra.mrb[20].mxu1 %v2992_v13 }
 0xd43   : >> { %4382 = vmatpush3.bf16.msra.mxu0 %v4879_v33  ;;  %4410 = vmatpush3.bf16.msra.mxu1 %v4880_v44  ;;  %v4900_v33 = vld [vmem:[%s5942_s14 + $0x1b8] sm:$0xff]  }
 0xd44   : >> { %4383 = vmatprep.subr.bf16.mxu0 %v4881_v14  ;;  %4411 = vmatprep.subr.bf16.mxu1 %v4882_v45 }
 0xd47   : >> { %4384 = vmatpush3.bf16.msra.mxu0 %v4883_v46  ;;  %4412 = vmatpush3.bf16.msra.mxu1 %v4884_v47 }
 0xd48   : >> { %4385 = vmatprep.subr.bf16.mxu0 %v4885_v48  ;;  %4413 = vmatprep.subr.bf16.mxu1 %v4886_v49 }
 0xd4b   : >> { %4386 = vmatpush3.bf16.msra.mxu0 %v4887_v2  ;;  %4414 = vmatpush3.bf16.msra.mxu1 %v4888_v6 }
 0xd4c   : >> { %4387 = vmatprep.subr.bf16.mxu0 %v4889_v50  ;;  %4415 = vmatprep.subr.bf16.mxu1 %v4890_v51 }
 0xd4f   : >> { %v2878_v8 = vpop.f32.mrb[8].mxu0  ;;  %4388 = vmatpush3.bf16.msra.mxu0 %v4891_v22  ;;  %v2931_v11 = vpop.f32.mrb[8].mxu1  ;;  %4416 = vmatpush3.bf16.msra.mxu1 %v4892_v4 }
 0xd50   : >> { %v2879_v10 = vadd.f32 %v2878_v8, %v2397_v23  ;;  %v2880_v43 = vpop.f32.mrb[9].mxu0  ;;  %4389 = vmatprep.subr.bf16.mxu0 %v4893_v5  ;;  %v2932_v25 = vadd.f32 %v2931_v11, %v6078_v7  ;;  %v2933_v24 = vpop.f32.mrb[9].mxu1  ;;  %4417 = vmatprep.subr.bf16.mxu1 %v4894_v20 }
 0xd51   : >> { %v2881_v17 = vadd.f32 %v2880_v43, %v6081_v18  ;;  %v2882_v26 = vpop.f32.mrb[10].mxu0  ;;  %v2934_v27 = vadd.f32 %v2933_v24, %v6085_v21  ;;  %v2935_v34 = vpop.f32.mrb[10].mxu1 }
 0xd52   : >> { %v2883_v30 = vadd.f32 %v2882_v26, %v2397_v23  ;;  %v2884_v35 = vpop.f32.mrb[11].mxu0  ;;  %v2956_v53 = vmax.f32 %v2932_v25, 0.0  ;;  %v2936_v36 = vadd.f32 %v2935_v34, %v6078_v7  ;;  %v2937_v38 = vpop.f32.mrb[11].mxu1  ;;  %v2954_v39 = vmax.f32 %v2879_v10, 0.0 }
 0xd53   : >> { %v2885_v37 = vadd.f32 %v2884_v35, %v6081_v18  ;;  %4390 = vmatpush3.bf16.msra.mxu0 %v4895_v9  ;;  %v2957_v54 = vmax.f32 %v2934_v27, 0.0  ;;  %v2938_v40 = vadd.f32 %v2937_v38, %v6085_v21  ;;  %4418 = vmatpush3.bf16.msra.mxu1 %v4896_v42  ;;  %v2955_v41 = vmax.f32 %v2881_v17, 0.0 }
 0xd54   : >> { %v2962_v13 = vmax.f32 %v2883_v30, 0.0  ;;  %4391 = vmatprep.subr.bf16.mxu0 %v4897_v15  ;;  %v2964_v44 = vmax.f32 %v2936_v36, 0.0  ;;  %4419 = vmatprep.subr.bf16.mxu1 %v4898_v12 }
 0xd55   : >> { %v2963_v14 = vmax.f32 %v2885_v37, 0.0  ;;  %v2965_v46 = vmax.f32 %v2938_v40, 0.0 }
 0xd56   : >> { %v2986_v45 = vpack.c.bf16 %v2962_v13, %v2954_v39  ;;  %v2988_v47 = vpack.c.bf16 %v2964_v44, %v2956_v53 }
 0xd57   : >> { %v2987_v48 = vpack.c.bf16 %v2963_v14, %v2955_v41  ;;  %v2888_v49 = vpop.f32.mrb[12].mxu0  ;;  %4392 = vmatpush3.bf16.msra.mxu0 %v4899_v32  ;;  %v2989_v2 = vpack.c.bf16 %v2965_v46, %v2957_v54  ;;  %v2941_v50 = vpop.f32.mrb[12].mxu1  ;;  %4420 = vmatpush3.bf16.msra.mxu1 %v4900_v33 }
 0xd58   : >> { %v2889_v6 = vadd.f32 %v2888_v49, %v2397_v23  ;;  %v2890_v3 = vpop.f32.mrb[13].mxu0  ;;  %v2942_v51 = vadd.f32 %v2941_v50, %v6078_v7  ;;  %v2943_v56 = vpop.f32.mrb[13].mxu1 }
 0xd59   : >> { %v2891_v55 = vadd.f32 %v2890_v3, %v6081_v18  ;;  %v2892_v19 = vpop.f32.mrb[14].mxu0  ;;  %3512 = vmatprep.mubr.bf16.mxu0 %v2987_v48  ;;  %v2944_v22 = vadd.f32 %v2943_v56, %v6085_v21  ;;  %v2945_v5 = vpop.f32.mrb[14].mxu1  ;;  %3561 = vmatprep.mubr.bf16.mxu1 %v2989_v2 }
 0xd5a   : >> { %v2893_v4 = vadd.f32 %v2892_v19, %v2397_v23  ;;  %v2894_v20 = vpop.f32.mrb[15].mxu0  ;;  %3513 = vmatmul.mubr.bf16.vlgmr.msra.gmra.mrb[24].mxu0 %v2986_v45  ;;  %v2972_v8 = vmax.f32 %v2942_v51, 0.0  ;;  %v2946_v9 = vadd.f32 %v2945_v5, %v6078_v7  ;;  %v2947_v11 = vpop.f32.mrb[15].mxu1  ;;  %3562 = vmatmul.mubr.bf16.vlgmr.msra.gmra.mrb[24].mxu1 %v2988_v47  ;;  %v2970_v43 = vmax.f32 %v2889_v6, 0.0 }
 0xd5b   : >> { %v2895_v10 = vadd.f32 %v2894_v20, %v6081_v18  ;;  %v2973_v42 = vmax.f32 %v2944_v22, 0.0  ;;  %v2948_v25 = vadd.f32 %v2947_v11, %v6085_v21  ;;  %v2971_v17 = vmax.f32 %v2891_v55, 0.0 }
 0xd5c   : >> { %v2978_v15 = vmax.f32 %v2893_v4, 0.0  ;;  %v2980_v24 = vmax.f32 %v2946_v9, 0.0 }
 0xd5d   : >> { %v2979_v26 = vmax.f32 %v2895_v10, 0.0  ;;  %v2981_v12 = vmax.f32 %v2948_v25, 0.0 }
 0xd5e   : >> { %v2994_v23 = vpack.c.bf16 %v2978_v15, %v2970_v43  ;;  %v2996_v27 = vpack.c.bf16 %v2980_v24, %v2972_v8 }
 0xd5f   : >> { %v2995_v30 = vpack.c.bf16 %v2979_v26, %v2971_v17  ;;  %v2997_v34 = vpack.c.bf16 %v2981_v12, %v2973_v42 }
 0xd61   : >> { %3520 = vmatprep.mubr.bf16.mxu0 %v2995_v30  ;;  %3569 = vmatprep.mubr.bf16.mxu1 %v2997_v34 }
 0xd62   : >> { %3521 = vmatmul.mubr.bf16.gmra.mrb[28].mxu0 %v2994_v23  ;;  %3570 = vmatmul.mubr.bf16.gmra.mrb[28].mxu1 %v2996_v27 }
 0xe0d   : >> { %v4337_v7 = vpop.f32.mrb[16].mxu0  ;;  %v4365_v18 = vpop.f32.mrb[16].mxu1 }
 0xe0e   : >> { %v4338_v35 = vpop.f32.mrb[17].mxu0  ;;  %v4366_v36 = vpop.f32.mrb[17].mxu1 }
 0xe0f   : >> { %v4339_v53 = vadd.f32 %v4338_v35, %v4337_v7  ;;  %v4340_v37 = vpop.f32.mrb[18].mxu0  ;;  %v4367_v38 = vadd.f32 %v4366_v36, %v4365_v18  ;;  %v4368_v21 = vpop.f32.mrb[18].mxu1 }
 0xe10   : >> { %v4341_v32 = vpop.f32.mrb[19].mxu0  ;;  %v4369_v54 = vpop.f32.mrb[19].mxu1 }
 0xe11   : >> { %v4342_v39 = vadd.f32 %v4341_v32, %v4340_v37  ;;  %v3466_v13 = vadd.f32 %v4367_v38, %v4339_v53  ;;  %v4370_v40 = vadd.f32 %v4369_v54, %v4368_v21 }
 0xe13   : >> { %v3469_v33 = vadd.f32 %v4370_v40, %v4342_v39 }
 0xe15   : >> { %v4343_v41 = vpop.f32.mrb[20].mxu0  ;;  %v4371_v44 = vpop.f32.mrb[20].mxu1 }
 0xe16   : >> { %v4344_v14 = vpop.f32.mrb[21].mxu0  ;;  %v4372_v46 = vpop.f32.mrb[21].mxu1 }
 0xe17   : >> { %v4345_v45 = vadd.f32 %v4344_v14, %v4343_v41  ;;  %v4346_v47 = vpop.f32.mrb[22].mxu0  ;;  %v4373_v48 = vadd.f32 %v4372_v46, %v4371_v44  ;;  %v4374_v49 = vpop.f32.mrb[22].mxu1 }
 0xe18   : >> { %v4347_v2 = vpop.f32.mrb[23].mxu0  ;;  %v4375_v50 = vpop.f32.mrb[23].mxu1 }
 0xe19   : >> { %v4348_v6 = vadd.f32 %v4347_v2, %v4346_v47  ;;  %v3474_v3 = vadd.f32 %v4373_v48, %v4345_v45  ;;  %v4376_v51 = vadd.f32 %v4375_v50, %v4374_v49 }
 0xe1b   : >> { %v3477_v55 = vadd.f32 %v4376_v51, %v4348_v6 }
 0xe2d   : >> { %v4393_v56 = vpop.f32.mrb[24].mxu0  ;;  %v4421_v19 = vpop.f32.mrb[24].mxu1 }
 0xe2e   : >> { %v4394_v22 = vpop.f32.mrb[25].mxu0  ;;  %v4422_v5 = vpop.f32.mrb[25].mxu1 }
 0xe2f   : >> { %v4395_v4 = vadd.f32 %v4394_v22, %v4393_v56  ;;  %v4396_v20 = vpop.f32.mrb[26].mxu0  ;;  %v4423_v8 = vadd.f32 %v4422_v5, %v4421_v19  ;;  %v4424_v9 = vpop.f32.mrb[26].mxu1 }
 0xe30   : >> { %v4397_v10 = vpop.f32.mrb[27].mxu0  ;;  %v4425_v42 = vpop.f32.mrb[27].mxu1 }
 0xe31   : >> { %v3515_v11 = vadd.f32 %v4395_v4, %v3466_v13  ;;  %v4398_v43 = vadd.f32 %v4397_v10, %v4396_v20  ;;  %v4426_v15 = vadd.f32 %v4425_v42, %v4424_v9 }
 0xe33   : >> { %v3564_v25 = vadd.f32 %v4423_v8, %v3515_v11  ;;  %v3518_v17 = vadd.f32 %v4398_v43, %v3469_v33  ;;  %v4243_v33 = vld [vmem:[%s765_s11] ss:$0 sm:$0xff] (%p2166_p3) }
 0xe34   : > { %v4244_v43 = vld [vmem:[%s774_s7] ss:$0 sm:$0xff] (%p2166_p3) }
 0xe35   : >> { %v3578_v24 = vadd.f32 %v5177_v63, %v3564_v25   ;;  %v3567_v26 = vadd.f32 %v4426_v15, %v3518_v17  ;;  %v4399_v23 = vpop.f32.mrb[28].mxu0  ;;  %v4427_v12 = vpop.f32.mrb[28].mxu1  ;;  %v4245_v15 = vld [vmem:[%s6287_s18] ss:$0 sm:$0xff] (%p2166_p3) }
 0xe36   : >> { %v4400_v27 = vpop.f32.mrb[29].mxu0  ;;  %v4428_v7 = vpop.f32.mrb[29].mxu1 }
 0xe37   : >> { %v3579_v30 = vadd.f32 %v5173_v62, %v3567_v26   ;;  %v4401_v34 = vadd.f32 %v4400_v27, %v4399_v23  ;;  %v4402_v18 = vpop.f32.mrb[30].mxu0  ;;  %v4429_v35 = vadd.f32 %v4428_v7, %v4427_v12  ;;  %v4430_v53 = vpop.f32.mrb[30].mxu1  ;;  %v3589_v41 = vadd.f32 (%p2166_p3), %v4243_v33, %v3578_v24 }
 0xe38   : >> { %v4403_v36 = vpop.f32.mrb[31].mxu0  ;;  %v4431_v21 = vpop.f32.mrb[31].mxu1 }
 0xe39   : >> { %v3523_v37 = vadd.f32 %v4401_v34, %v3474_v3  ;;  %v4404_v38 = vadd.f32 %v4403_v36, %v4402_v18  ;;  %v4432_v32 = vadd.f32 %v4431_v21, %v4430_v53  ;;  %v6283_v62 = vmov %v3579_v30 }
 0xe3a   : > { %v3590_v14 = vadd.f32 (%p2166_p3), %v4243_v33, %v3579_v30  ;;  %v3593_v46 = vadd.f32 (%p2166_p3), %v3589_v41, %v5859_v0 }
 0xe3b   : >> { %v3572_v39 = vadd.f32 %v4429_v35, %v3523_v37  ;;  %v3526_v54 = vadd.f32 %v4404_v38, %v3477_v55  ;;  %2168 = sbr.rel (!%p2166_p3) target bundleno = 3124 (0xc34), region = 204 }
 0xe3c   : > { %3599 = vadd.xlane.f32.xlu0 (%p2166_p3), %v3593_v46  ;;  %v3594_v48 = vadd.f32 (%p2166_p3), %v3590_v14, %v5861_v1 }
 0xe3d   : >> { %v3580_v13 = vadd.f32 %v5169_v61, %v3572_v39   ;;  %v3575_v63 = vadd.f32 %v4432_v32, %v3526_v54 }
 0xe3f   : >> { %v3581_v40 = vadd.f32 %v5165_v60, %v3575_v63   ;;  %v6282_v61 = vmov %v3580_v13  ;;  %v6284_v63 = vmov %v3578_v24  ;;  %v3591_v44 = vadd.f32 (%p2166_p3), %v4243_v33, %v3580_v13 }
 0xe40   : > { %3601 = vadd.xlane.f32.xlu0 (%p2166_p3), %v3594_v48 }
 0xe41   : >> { %v6281_v60 = vmov %v3581_v40  ;;  %v3592_v45 = vadd.f32 (%p2166_p3), %v4243_v33, %v3581_v40  ;;  %v3595_v47 = vadd.f32 (%p2166_p3), %v3591_v44, %v5869_v58 }
 0xe42   : > { %s6288_s12 = sld [smem:[#allocation34_spill]] (!%p4246_p7)  ;;  %v4247_v41 = vld [vmem:[#allocation11] ss:$0 sm:$0xff] (!%p4246_p7) }
 0xe43   : > { %3603 = vadd.xlane.f32.xlu1 %v3595_v47  ;;  %v3596_v49 = vadd.f32 %v3592_v45, %v5867_v57 }
 0xe47   : > { %3605 = vadd.xlane.f32.xlu1 %v3596_v49 }
 0xe48   : > { %v4909_v37 = vld [vmem:[%s6288_s12] sm:$0xff] (!%p4246_p7)   ;;  %v4910_v21 = vld [vmem:[%s6288_s12 + $0x8] sm:$0xff] (!%p4246_p7)   ;;  %v4911_v32 = vld [vmem:[%s6288_s12 + $0x10] sm:$0xff] (!%p4246_p7)  }
 0xe49   : > { %4559 = vmatprep.subr.bf16.mxu0 (!%p4246_p7), %v4909_v37  ;;  %v4912_v39 = vld [vmem:[%s6288_s12 + $0x18] sm:$0xff] (!%p4246_p7)   ;;  %v4913_v54 = vld [vmem:[%s6288_s12 + $0x20] sm:$0xff] (!%p4246_p7)   ;;  %v4914_v13 = vld [vmem:[%s6288_s12 + $0x28] sm:$0xff] (!%p4246_p7)  }
 0xe4a   : > { %4560 = vmatpush3.bf16.msra.mxu0 (!%p4246_p7), %v4909_v37  ;;  %v4915_v63 = vld [vmem:[%s6288_s12 + $0x30] sm:$0xff] (!%p4246_p7)   ;;  %v4916_v40 = vld [vmem:[%s6288_s12 + $0x38] sm:$0xff] (!%p4246_p7)  }
 0xe4b   : > { %4561 = vmatprep.subr.bf16.mxu0 (!%p4246_p7), %v4910_v21 }
 0xe4e   : > { %4562 = vmatpush3.bf16.msra.mxu0 (!%p4246_p7), %v4910_v21 }
 0xe4f   : > { %4563 = vmatprep.subr.bf16.mxu0 (!%p4246_p7), %v4911_v32 }
 0xe52   : > { %4564 = vmatpush3.bf16.msra.mxu0 (!%p4246_p7), %v4911_v32 }
 0xe53   : > { %4565 = vmatprep.subr.bf16.mxu0 (!%p4246_p7), %v4912_v39 }
 0xe56   : > { %4566 = vmatpush3.bf16.msra.mxu0 (!%p4246_p7), %v4912_v39 }
 0xe57   : > { %4567 = vmatprep.subr.bf16.mxu0 (!%p4246_p7), %v4913_v54 }
 0xe5a   : > { %4568 = vmatpush3.bf16.msra.mxu0 (!%p4246_p7), %v4913_v54 }
 0xe5b   : > { %4569 = vmatprep.subr.bf16.mxu0 (!%p4246_p7), %v4914_v13 }
 0xe5e   : > { %4570 = vmatpush3.bf16.msra.mxu0 (!%p4246_p7), %v4914_v13 }
 0xe5f   : > { %4571 = vmatprep.subr.bf16.mxu0 (!%p4246_p7), %v4915_v63 }
 0xe62   : > { %4572 = vmatpush3.bf16.msra.mxu0 (!%p4246_p7), %v4915_v63 }
 0xe63   : > { %4573 = vmatprep.subr.bf16.mxu0 (!%p4246_p7), %v4916_v40 }
 0xe66   : > { %4574 = vmatpush3.bf16.msra.mxu0 (!%p4246_p7), %v4916_v40 }
 0xec9   : > { %v3600_v28 = vpop.xlane.xlu0 %3599 }
 0xeca   : > { %v3607_v31 = vmul.f32 0.0078125, %v3600_v28 }
 0xecc   : > { %v3611_v52 = vsub.f32 %v3593_v46, %v3607_v31 }
 0xecd   : > { %v3602_v60 = vpop.xlane.xlu0 %3601 }
 0xece   : > { %v3608_v62 = vmul.f32 0.0078125, %v3602_v60  ;;  %v3615_v0 = vmul.f32 %v3611_v52, %v3611_v52 }
 0xed0   : > { %v3604_v29 = vpop.xlane.xlu1 %3603  ;;  %v3612_v58 = vsub.f32 %v3594_v48, %v3608_v62  ;;  %3619 = vadd.xlane.f32.xlu0 %v3615_v0 }
 0xed1   : > { %v3609_v16 = vmul.f32 0.0078125, %v3604_v29 }
 0xed2   : > { %v3616_v1 = vmul.f32 %v3612_v58, %v3612_v58 }
 0xed3   : > { %v3613_v59 = vsub.f32 %v3595_v47, %v3609_v16 }
 0xed4   : > { %v3606_v61 = vpop.xlane.xlu1 %3605  ;;  %3621 = vadd.xlane.f32.xlu1 %v3616_v1 }
 0xed5   : > { %v3610_v2 = vmul.f32 0.0078125, %v3606_v61  ;;  %v3617_v50 = vmul.f32 %v3613_v59, %v3613_v59 }
 0xed7   : > { %v3614_v6 = vsub.f32 %v3596_v49, %v3610_v2  ;;  %3623 = vadd.xlane.f32.xlu0 %v3617_v50 }
 0xed9   : > { %v3618_v57 = vmul.f32 %v3614_v6, %v3614_v6 }
 0xedb   : > { %3625 = vadd.xlane.f32.xlu1 %v3618_v57 }
 0xf5d   : > { %v3620_v3 = vpop.xlane.xlu0 %3619 }
 0xf5e   : > { %v3627_v51 = vmul.f32 0.0078125, %v3620_v3 }
 0xf60   : > { %v3631_v55 = vadd.f32 1e-05, %v3627_v51 }
 0xf61   : > { %v3622_v56 = vpop.xlane.xlu1 %3621 }
 0xf62   : > { %4901 = vrsqrt.f32 %v3631_v55  ;;  %v3628_v22 = vmul.f32 0.0078125, %v3622_v56 }
 0xf64   : > { %v3624_v19 = vpop.xlane.xlu0 %3623  ;;  %v3632_v5 = vadd.f32 1e-05, %v3628_v22 }
 0xf65   : > { %v3629_v4 = vmul.f32 0.0078125, %v3624_v19 }
 0xf66   : > { %4903 = vrsqrt.f32 %v3632_v5 }
 0xf67   : > { %v3633_v20 = vadd.f32 1e-05, %v3629_v4 }
 0xf68   : > { %v3626_v8 = vpop.xlane.xlu1 %3625 }
 0xf69   : > { %v3630_v9 = vmul.f32 0.0078125, %v3626_v8  ;;  %4905 = vrsqrt.f32 %v3633_v20 }
 0xf6b   : > { %v3634_v10 = vadd.f32 1e-05, %v3630_v9 }
 0xf6c   : > { %v4902_v11 = vpop.eup %4901 }
 0xf6d   : > { %4907 = vrsqrt.f32 %v3634_v10  ;;  %v3639_v42 = vmul.f32 %v4902_v11, %v3611_v52 }
 0xf6f   : > { %v3649_v25 = vmul.f32 %v4244_v43, %v3639_v42 }
 0xf70   : > { %v4904_v17 = vpop.eup %4903 }
 0xf71   : > { %v3659_v26 = vadd.f32 %v4245_v15, %v3649_v25  ;;  %v3640_v23 = vmul.f32 %v4904_v17, %v3612_v58 }
 0xf73   : > { %v4906_v24 = vpop.eup %4905  ;;  %3663 = vst [vmem:[#allocation2] sm:$0xff] %v3659_v26  ;;  %v3650_v27 = vmul.f32 %v4244_v43, %v3640_v23 }
 0xf74   : > { %v3641_v12 = vmul.f32 %v4906_v24, %v3613_v59 }
 0xf75   : > { %v3660_v7 = vadd.f32 %v4245_v15, %v3650_v27 }
 0xf76   : > { %v3651_v34 = vmul.f32 %v4244_v43, %v3641_v12 }
 0xf77   : > { %v4908_v30 = vpop.eup %4907  ;;  %3664 = vst [vmem:[#allocation2 + $0x8] sm:$0xff] %v3660_v7  ;;  %v3671_v38 = vpack.c.bf16 (!%p4246_p7), %v3660_v7, %v3659_v26 }
 0xf78   : > { %v3642_v18 = vmul.f32 %v4908_v30, %v3614_v6  ;;  %v3661_v35 = vadd.f32 %v4245_v15, %v3651_v34  ;;  %3670 = sbr.rel (%p4246_p7) target bundleno = 4186 (0x105a), region = 119 }
 0xf79   : > { %4575 = vmatprep.mubr.bf16.mxu0 (!%p4246_p7), %v3671_v38 }
 0xf7a   : > { %v3652_v53 = vmul.f32 %v4244_v43, %v3642_v18  ;;  %3665 = vst [vmem:[#allocation2 + $0x10] sm:$0xff] %v3661_v35 }
 0xf7c   : > { %v3662_v36 = vadd.f32 %v4245_v15, %v3652_v53 }
 0xf7e   : > { %3666 = vst [vmem:[#allocation2 + $0x18] sm:$0xff] %v3662_v36  ;;  %v3672_v33 = vpack.c.bf16 (!%p4246_p7), %v3662_v36, %v3661_v35 }
 0xf80   : > { %4576 = vmatmul.mubr.bf16.vlgmr.msra.gmra.mrb[0].mxu0 %v3672_v33 }
0x1053   : > { %v4577_v44 = vpop.f32.mrb[0].mxu0 }
0x1054   : > { %v3787_v14 = vadd.f32 %v4577_v44, %v4247_v41  ;;  %v3778_v45 = vpop.f32.mrb[1].mxu0 }
0x1055   : > { %v3779_v46 = vadd.f32 %v4247_v41, %v3778_v45  ;;  %v4578_v47 = vpop.f32.mrb[2].mxu0 }
0x1056   : > { %3795 = vst [vmem:[#allocation12 + $0x10] sm:$0xff] %v3787_v14  ;;  %v3790_v48 = vadd.f32 %v4578_v47, %v4247_v41  ;;  %v3781_v49 = vpop.f32.mrb[3].mxu0 }
0x1057   : > { %3793 = vst [vmem:[#allocation12] sm:$0xff] %v3779_v46  ;;  %v3782_v28 = vadd.f32 %v4247_v41, %v3781_v49 }
0x1058   : > { %3796 = vst [vmem:[#allocation12 + $0x18] sm:$0xff] %v3790_v48 }
0x1059   : > { %3794 = vst [vmem:[#allocation12 + $0x8] sm:$0xff] %v3782_v28 }
0x105a PF: > { %p4637_p12 = scmp.eq.s32.totalorder %s5303_s25, 1  ;;  %s5196_s14 = smov [#allocation12]  }
0x105b   : > { %s3803_s23 = sshll.u32 %s5196_s14, 4  ;;  %s3804_s23 = int_to_ptr.vmem [resolvable:$true] %s3803_s23 }
0x105c   : > { %s5065_s27 = scalar_lea.vmem %s3804_s23, 512  ;;  %p5072_p1 = scmp.lt.s32.totalorder %s3804_s23, %s3804_s23 }
0x105d   : > { %p5066_p5 = scmp.ne.s32.totalorder %s3804_s23, %s5065_s27  ;;  %p5073_p13 = scmp.lt.s32.totalorder %s5065_s27, %s5065_s27 }
0x105f   : > { %p5067_p11 = pnand %p5066_p5, %p4637_p12  ;;  %p5074_p0 = por %p5073_p13, %p5072_p1 }
0x1061   : > { %p5068_p10 = pneg %p5067_p11 }
0x1063   : > { %p5075_p9 = pnand %p5074_p0, %p5068_p10 }
0x1065   : > { %5078 = shalt.err (!%p5075_p9)
}
0x1066   : > { %s6289_s28 = sld [smem:[#allocation36_spill]] }
0x106c   : > { %s5079_s9 = scalar_lea.hbm %s6289_s28, 512 }
0x106d   : > { %p5080_p8 = scmp.ne.s32.totalorder %s6289_s28, %s5079_s9  ;;  %p5085_p4 = scmp.lt.u32.totalorder %s5079_s9, %s6289_s28 }
0x106f   : > { %p5081_p2 = pnand %p5080_p8, %p4637_p12 }
0x1071   : > { %p5082_p6 = pneg %p5081_p2 }
0x1073   : > { %p5087_p3 = pnand %p5085_p4, %p5082_p6 }
0x1075   : > { %5090 = shalt.err (!%p5087_p3)
}
0x1076   : > { %s5197_s8 = smov 128   ;;  %s5198_s30 = smov 8  }
0x1077   : > { %4614 = dma.vmem_to_hbm [thread:$0]  (%p4637_p12), %s3804_s23, 512, %s6289_s28, [#allocation5], %s5197_s8, %s5197_s8, %s5198_s30  }
0x1078   : > { %5144 = dma.done.wait (%p4637_p12), [#allocation5], 512  }
0x1079   : > { %5146 = vsyncadd (%p4637_p12), [#allocation5], 4294966784 }
0x107a PF: > { %s6290_s24 = sld [smem:[#allocation19_spill]]  ;;  %s6291_s6 = sld [smem:[#allocation18_spill]] }
0x107b   : > { %s6292_s23 = sld [smem:[#allocation20_spill]]  ;;  %s6293_s21 = smov %s5153_s22 }
0x1080   : > { %p33_p7 = scmp.ge.s32.totalorder %s6290_s24, 4   ;;  %s6294_s22 = smov %s6291_s6 }
0x1082   :  { %35 = sbr.rel (!%p33_p7) target bundleno = 25 (0x19), region = 215 }
0x1089   :  { %3819 = vsyncpa [#allocation4], 1 }
0x108a   :  { %3821 = vsyncpa [#allocation4 + $0x1], 1 }
0x108b   :  { %3822 = vsyncpa [#allocation7], 1 }
0x108c   :  { %3824 = vsyncpa [#allocation7 + $0x1], 1 }
0x108d   :  { %3825 = vsyncpa [#allocation10], 1 }
0x108e   :  { %3827 = vsyncpa [#allocation10 + $0x1], 1 }
0x108f   :  { %3828 = vsyncpa [#allocation5], 1 }
0x1090   :  { %3830 = vsyncpa [#allocation5 + $0x1], 1 }

</bundles_post_ra>
